<compile_context>
chip_gen: v7x
topology: tpu7x:2x2x1
jax: 0.10.0
libtpu: 0.0.40
codegen_flags: <defaults>
</compile_context>

<pallas_src>
import functools
import math

import jax
import jax.numpy as jnp
import numpy as np
from jax import lax
from jax.experimental import pallas as pl
from jax.experimental.pallas import tpu as pltpu


def _vmem_limit_bytes():
    # Generation-aware scoped-VMEM budget (v5e/v6e: 128 MiB, v7x: 64 MiB physical).
    try:
        cap = pltpu.get_tpu_info().vmem_capacity_bytes
        return int(min(cap * 3 // 4, 100 * 1024 * 1024))
    except Exception:
        return 48 * 1024 * 1024


_VMEM_LIMIT = _vmem_limit_bytes()


def _pick_tile(dim, target, align):
    """Largest tile <= target that divides `dim` and respects TPU alignment."""
    if dim <= target:
        return dim
    t = (target // align) * align
    while t >= align:
        if dim % t == 0:
            return t
        t -= align
    return dim


# --------------- fused RMSNorm + matmul (QKV projection) --------------------

def _rms_matmul_kernel(x_ref, ln_ref, w_ref, o_ref, *, eps):
    x = x_ref[...].astype(jnp.float32)
    var = jnp.mean(x * x, axis=-1, keepdims=True)
    xn = (x * lax.rsqrt(var + eps) * ln_ref[...].astype(jnp.float32)).astype(x_ref.dtype)
    o_ref[...] = jnp.dot(xn, w_ref[...],
                         preferred_element_type=jnp.float32).astype(o_ref.dtype)


def rms_matmul(x, ln_w, w, eps, *, tm=256, tn=512):
    """y = rmsnorm(x; ln_w) @ w  with x:(M,K), w:(K,N) (pre-transposed)."""
    M, K = x.shape
    K2, N = w.shape
    assert K == K2
    tm = _pick_tile(M, tm, 8)
    tn = _pick_tile(N, tn, 128)
    grid = (M // tm, N // tn)
    return pl.pallas_call(
        functools.partial(_rms_matmul_kernel, eps=eps),
        grid=grid,
        in_specs=[
            pl.BlockSpec((tm, K), lambda i, j: (i, 0)),
            pl.BlockSpec((1, K), lambda i, j: (0, 0)),
            pl.BlockSpec((K, tn), lambda i, j: (0, j)),
        ],
        out_specs=pl.BlockSpec((tm, tn), lambda i, j: (i, j)),
        out_shape=jax.ShapeDtypeStruct((M, N), x.dtype),
        compiler_params=pltpu.CompilerParams(
            dimension_semantics=("parallel", "parallel"),
            vmem_limit_bytes=_VMEM_LIMIT,
        ),
    )(x, ln_w.reshape(1, K), w)


# --------------- fused RMSNorm + gate_proj + up_proj + SwiGLU ----------------

def _rms_gate_up_kernel(x_ref, ln_ref, wg_ref, wu_ref, o_ref, *, eps):
    x = x_ref[...].astype(jnp.float32)
    var = jnp.mean(x * x, axis=-1, keepdims=True)
    xn = (x * lax.rsqrt(var + eps) * ln_ref[...].astype(jnp.float32)).astype(x_ref.dtype)
    g = jnp.dot(xn, wg_ref[...], preferred_element_type=jnp.float32)
    u = jnp.dot(xn, wu_ref[...], preferred_element_type=jnp.float32)
    o_ref[...] = (g * jax.nn.sigmoid(g) * u).astype(o_ref.dtype)


def rms_gate_up_silu(x, ln_w, wg, wu, eps, *, tm=256, tn=512):
    M, K = x.shape
    _, N = wg.shape
    tm = _pick_tile(M, tm, 8)
    tn = _pick_tile(N, tn, 128)
    grid = (M // tm, N // tn)
    return pl.pallas_call(
        functools.partial(_rms_gate_up_kernel, eps=eps),
        grid=grid,
        in_specs=[
            pl.BlockSpec((tm, K), lambda i, j: (i, 0)),
            pl.BlockSpec((1, K), lambda i, j: (0, 0)),
            pl.BlockSpec((K, tn), lambda i, j: (0, j)),
            pl.BlockSpec((K, tn), lambda i, j: (0, j)),
        ],
        out_specs=pl.BlockSpec((tm, tn), lambda i, j: (i, j)),
        out_shape=jax.ShapeDtypeStruct((M, N), x.dtype),
        compiler_params=pltpu.CompilerParams(
            dimension_semantics=("parallel", "parallel"),
            vmem_limit_bytes=_VMEM_LIMIT,
        ),
    )(x, ln_w.reshape(1, K), wg, wu)


# --------------- tiled linear with fused residual add (o_proj / down_proj) ---

def _linear_residual_kernel(x_ref, w_ref, r_ref, o_ref, acc_ref):
    @pl.when(pl.program_id(2) == 0)
    def _():
        acc_ref[...] = jnp.zeros_like(acc_ref)

    acc_ref[...] += jnp.dot(x_ref[...], w_ref[...],
                            preferred_element_type=jnp.float32)

    @pl.when(pl.program_id(2) == pl.num_programs(2) - 1)
    def _():
        o_ref[...] = (acc_ref[...] + r_ref[...].astype(jnp.float32)).astype(o_ref.dtype)


def linear_residual(x, w, residual, *, tm=512, tn=512, tk=1024):
    """y = x @ w + residual, with x:(M,K), w:(K,N) (pre-transposed)."""
    M, K = x.shape
    K2, N = w.shape
    assert K == K2
    tm = _pick_tile(M, tm, 8)
    tn = _pick_tile(N, tn, 128)
    tk = _pick_tile(K, tk, 128)
    grid = (M // tm, N // tn, K // tk)
    return pl.pallas_call(
        _linear_residual_kernel,
        grid=grid,
        in_specs=[
            pl.BlockSpec((tm, tk), lambda i, j, k: (i, k)),
            pl.BlockSpec((tk, tn), lambda i, j, k: (k, j)),
            pl.BlockSpec((tm, tn), lambda i, j, k: (i, j)),
        ],
        out_specs=pl.BlockSpec((tm, tn), lambda i, j, k: (i, j)),
        out_shape=jax.ShapeDtypeStruct((M, N), x.dtype),
        scratch_shapes=[pltpu.VMEM((tm, tn), jnp.float32)],
        compiler_params=pltpu.CompilerParams(
            dimension_semantics=("parallel", "parallel", "arbitrary"),
            vmem_limit_bytes=_VMEM_LIMIT,
        ),
    )(x, w, residual)


# --------------- flash attention: fused RoPE, causal skip, GQA ---------------

def _flash_rope_kernel(q_ref, k_ref, v_ref, cq_ref, sq_ref, ck_ref, sk_ref,
                       o_ref, m_ref, l_ref, acc_ref,
                       *, scale, group, head_dim, tq, tkv):
    qi = pl.program_id(2)
    ki = pl.program_id(3)
    D = head_dim

    @pl.when(ki == 0)
    def _init():
        m_ref[...] = jnp.full(m_ref.shape, -1e30, dtype=jnp.float32)
        l_ref[...] = jnp.zeros_like(l_ref)
        acc_ref[...] = jnp.zeros_like(acc_ref)

    # Causal block skip: only process KV blocks that contain >=1 unmasked column.
    # Every processed block has a valid column for every query row (ki*tkv <= q_pos),
    # so the -1e30 mask value / running-max init stays numerically safe.
    @pl.when(ki * tkv <= (qi + 1) * tq - 1)
    def _compute():
        # rotate_half via lane roll: roll(x, D/2) = [x2, x1]; negate the first half.
        half_sign = jnp.where(
            lax.broadcasted_iota(jnp.int32, (1, D), 1) < (D // 2), -1.0, 1.0
        ).astype(jnp.float32)

        def rope(x, cos, sin):
            xf = x.astype(jnp.float32)
            rot = pltpu.roll(xf, shift=D // 2, axis=1) * half_sign
            return xf * cos + rot * sin

        cq = cq_ref[...].astype(jnp.float32)
        sq = sq_ref[...].astype(jnp.float32)
        ck = ck_ref[...].astype(jnp.float32)
        sk = sk_ref[...].astype(jnp.float32)

        # Keep MXU operands in the native activation dtype (f32 accumulation).
        k = rope(k_ref[...], ck, sk).astype(k_ref.dtype)     # (tkv, D)
        v = v_ref[...]                                       # (tkv, D)

        rows = lax.broadcasted_iota(jnp.int32, (tq, tkv), 0)
        cols = lax.broadcasted_iota(jnp.int32, (tq, tkv), 1)
        causal = (ki * tkv + cols) <= (qi * tq + rows)

        for g in range(group):                               # static unroll over GQA group
            q_g = rope(q_ref[:, g * D:(g + 1) * D], cq, sq).astype(q_ref.dtype)
            s = lax.dot_general(q_g, k, (((1,), (1,)), ((), ())),
                                preferred_element_type=jnp.float32) * scale
            s = jnp.where(causal, s, -1e30)

            m_prev = m_ref[g]                                # (tq, 1)
            m_new = jnp.maximum(m_prev, jnp.max(s, axis=-1, keepdims=True))
            alpha = jnp.exp(m_prev - m_new)
            p = jnp.exp(s - m_new)                           # (tq, tkv) f32

            l_ref[g] = alpha * l_ref[g] + jnp.sum(p, axis=-1, keepdims=True)
            acc_ref[g] = alpha * acc_ref[g] + lax.dot_general(
                p.astype(v.dtype), v, (((1,), (0,)), ((), ())),
                preferred_element_type=jnp.float32)
            m_ref[g] = m_new

    @pl.when(ki == pl.num_programs(3) - 1)
    def _finalize():
        for g in range(group):
            inv_l = pl.reciprocal(l_ref[g], approx=True)
            o_ref[:, g * D:(g + 1) * D] = (acc_ref[g] * inv_l).astype(o_ref.dtype)


def flash_attention(qkv, cos, sin, *, B, S, nH, nKV, D, tq=128, tkv=128):
    """qkv: (B*S, nH*D + 2*nKV*D) fused projection output (q | k | v columns).
    Returns attention output as (B*S, nH*D) -- directly consumable by o_proj."""
    assert D % 128 == 0, "head_dim must be a multiple of 128 (lane width)"
    group = nH // nKV
    Nq = nH * D
    Nk = nKV * D
    M, Ntot = qkv.shape
    assert M == B * S and Ntot == Nq + 2 * Nk

    tq = _pick_tile(S, tq, 128)
    tkv = _pick_tile(S, tkv, 128)
    nqb = S // tq
    nkb = S // tkv
    grid = (B, nKV, nqb, nkb)
    scale = 1.0 / math.sqrt(D)

    q_spec = pl.BlockSpec((tq, group * D), lambda b, h, i, j: (b * nqb + i, h))
    k_spec = pl.BlockSpec((tkv, D), lambda b, h, i, j: (b * nkb + j, Nq // D + h))
    v_spec = pl.BlockSpec((tkv, D), lambda b, h, i, j: (b * nkb + j, (Nq + Nk) // D + h))
    cq_spec = pl.BlockSpec((tq, D), lambda b, h, i, j: (i, 0))
    sq_spec = pl.BlockSpec((tq, D), lambda b, h, i, j: (i, 0))
    ck_spec = pl.BlockSpec((tkv, D), lambda b, h, i, j: (j, 0))
    sk_spec = pl.BlockSpec((tkv, D), lambda b, h, i, j: (j, 0))
    o_spec = pl.BlockSpec((tq, group * D), lambda b, h, i, j: (b * nqb + i, h))

    return pl.pallas_call(
        functools.partial(_flash_rope_kernel, scale=scale, group=group,
                          head_dim=D, tq=tq, tkv=tkv),
        grid=grid,
        in_specs=[q_spec, k_spec, v_spec, cq_spec, sq_spec, ck_spec, sk_spec],
        out_specs=o_spec,
        out_shape=jax.ShapeDtypeStruct((M, Nq), qkv.dtype),
        scratch_shapes=[
            pltpu.VMEM((group, tq, 1), jnp.float32),   # running max m
            pltpu.VMEM((group, tq, 1), jnp.float32),   # running denom l
            pltpu.VMEM((group, tq, D), jnp.float32),   # running numerator acc
        ],
        compiler_params=pltpu.CompilerParams(
            dimension_semantics=("parallel", "parallel", "parallel", "arbitrary"),
            vmem_limit_bytes=_VMEM_LIMIT,
        ),
    )(qkv, qkv, qkv, cos, sin, cos, sin)


# ------------------------------ RoPE tables (JAX glue) -----------------------

def rope_tables(seq_len, head_dim, theta, dtype=jnp.float32):
    inv_freq = 1.0 / (theta ** (jnp.arange(0, head_dim, 2, dtype=jnp.float32) / head_dim))
    pos = jnp.arange(seq_len, dtype=jnp.float32)
    freqs = pos[:, None] * inv_freq[None, :]              # (S, D/2)
    emb = jnp.concatenate([freqs, freqs], axis=-1)        # (S, D)
    return jnp.cos(emb).astype(dtype), jnp.sin(emb).astype(dtype)


# ------------------------------ one-time param prep --------------------------

def prepare_params(raw):
    """One-time (load-time) layout prep: (out,in) -> (in,out), QKV concatenated."""
    return {
        "input_ln_w": raw["input_ln_w"],
        "post_ln_w": raw["post_ln_w"],
        "wqkv": jnp.concatenate([raw["q_w"], raw["k_w"], raw["v_w"]], axis=0).T,
        "wo": raw["o_w"].T,
        "wgate": raw["gate_w"].T,
        "wup": raw["up_w"].T,
        "wdown": raw["down_w"].T,
    }


# ------------------------------ decoder layer --------------------------------

def llama_decoder_layer(params, hidden_states, cfg):
    B, S, H = hidden_states.shape
    nH, nKV, D = cfg["num_heads"], cfg["num_kv_heads"], cfg["head_dim"]
    eps, theta = cfg["eps"], cfg["rope_theta"]
    M = B * S

    x2 = hidden_states.reshape(M, H)

    # input RMSNorm fused into the (q|k|v) projection
    qkv = rms_matmul(x2, params["input_ln_w"], params["wqkv"], eps)

    # attention (RoPE + causal online softmax + GQA) straight off the qkv buffer
    cos, sin = rope_tables(S, D, theta, dtype=hidden_states.dtype)
    attn = flash_attention(qkv, cos, sin, B=B, S=S, nH=nH, nKV=nKV, D=D)   # (M, nH*D)

    # o_proj with the residual add fused into the matmul epilogue
    hidden = linear_residual(attn, params["wo"], x2)

    # post-attention RMSNorm fused into gate/up + SwiGLU
    act = rms_gate_up_silu(hidden, params["post_ln_w"], params["wgate"],
                           params["wup"], eps)

    # down_proj with the second residual add fused into the matmul epilogue
    out = linear_residual(act, params["wdown"], hidden)
    return out.reshape(B, S, H)


# ------------------------------ reference ------------------------------------

def reference_layer(raw, hidden_states, cfg):
    B, S, H = hidden_states.shape
    nH, nKV, D = cfg["num_heads"], cfg["num_kv_heads"], cfg["head_dim"]
    eps, theta = cfg["eps"], cfg["rope_theta"]

    def rms(h, w):
        hf = h.astype(jnp.float32)
        var = jnp.mean(hf * hf, axis=-1, keepdims=True)
        return (w * hf * lax.rsqrt(var + eps)).astype(h.dtype)

    cos, sin = rope_tables(S, D, theta)

    def apply_rope(x):
        d = x.shape[-1]
        x1, x2 = x[..., : d // 2], x[..., d // 2:]
        rot = jnp.concatenate([-x2, x1], axis=-1)
        return x * cos[None, None] + rot * sin[None, None]

    residual = hidden_states
    xn = rms(hidden_states, raw["input_ln_w"])
    q = (xn @ raw["q_w"].T).reshape(B, S, nH, D).transpose(0, 2, 1, 3)
    k = (xn @ raw["k_w"].T).reshape(B, S, nKV, D).transpose(0, 2, 1, 3)
    v = (xn @ raw["v_w"].T).reshape(B, S, nKV, D).transpose(0, 2, 1, 3)
    q, k = apply_rope(q), apply_rope(k)
    rep = nH // nKV
    k = jnp.repeat(k, rep, axis=1)
    v = jnp.repeat(v, rep, axis=1)
    s = jnp.einsum("bhqd,bhkd->bhqk", q, k) / math.sqrt(D)
    causal = jnp.tril(jnp.ones((S, S), dtype=bool))
    s = jnp.where(causal, s, jnp.finfo(jnp.float32).min)
    p = jax.nn.softmax(s, axis=-1)
    attn = jnp.einsum("bhqk,bhkd->bhqd", p, v).transpose(0, 2, 1, 3).reshape(B, S, nH * D)
    hidden = residual + attn @ raw["o_w"].T

    residual2 = hidden
    hn = rms(hidden, raw["post_ln_w"])
    g = hn @ raw["gate_w"].T
    u = hn @ raw["up_w"].T
    mlp = (g * jax.nn.sigmoid(g) * u) @ raw["down_w"].T
    return residual2 + mlp


# --------------------------------- main ---------------------------------------

if __name__ == "__main__":
    # Small but tiling-real shapes: D=128 (lane-aligned head dim), 2 q / 2 kv blocks
    # so accumulation, causal block skipping and GQA grouping are exercised.
    B, S = 2, 256
    nH, nKV, D = 4, 2, 128
    H = nH * D          # 512
    I = 1024
    cfg = dict(num_heads=nH, num_kv_heads=nKV, head_dim=D, intermediate=I,
               eps=1e-6, rope_theta=10000.0)

    key = jax.random.PRNGKey(0)
    keys = jax.random.split(key, 10)

    def w(k, shape):
        return jax.random.normal(k, shape, dtype=jnp.float32) * 0.02

    # nn.Linear weights in PyTorch (out_features, in_features) layout.
    raw = {
        "q_w": w(keys[0], (nH * D, H)),
        "k_w": w(keys[1], (nKV * D, H)),
        "v_w": w(keys[2], (nKV * D, H)),
        "o_w": w(keys[3], (H, nH * D)),
        "gate_w": w(keys[4], (I, H)),
        "up_w": w(keys[5], (I, H)),
        "down_w": w(keys[6], (H, I)),
        "input_ln_w": 1.0 + 0.1 * jax.random.normal(keys[7], (H,), dtype=jnp.float32),
        "post_ln_w": 1.0 + 0.1 * jax.random.normal(keys[8], (H,), dtype=jnp.float32),
    }
    hidden_states = jax.random.normal(keys[9], (B, S, H), dtype=jnp.float32)

    params = prepare_params(raw)   # one-time load-time transpose / concat

    out = jax.block_until_ready(llama_decoder_layer(params, hidden_states, cfg))
    ref = jax.block_until_ready(reference_layer(raw, hidden_states, cfg))
    np.testing.assert_allclose(np.asarray(out), np.asarray(ref), rtol=2e-3, atol=2e-3)

    print("KERNEL_OK")
</pallas_src>

<mosaic_0001>
module attributes {stable_mosaic.version = 11 : i64} {
  func.func @_rms_matmul_kernel(%arg0: i32, %arg1: i32, %arg2: memref<256x512xf32, #tpu.memory_space<vmem>>, %arg3: memref<1x512xf32, #tpu.memory_space<vmem>>, %arg4: memref<512x512xf32, #tpu.memory_space<vmem>>, %arg5: memref<256x512xf32, #tpu.memory_space<vmem>>) attributes {dimension_semantics = [#tpu.dimension_semantics<parallel>, #tpu.dimension_semantics<parallel>], iteration_bounds = array<i64: 2, 2>, scalar_prefetch = 0 : i64, scratch_operands = 0 : i64, tpu.core_type = #tpu.core_type<tc>, window_params = [{transform_indices = @transform_0, window_bounds = array<i64: 256, 512>}, {pipeline_mode = #tpu.pipeline_mode<synchronous>, transform_indices = @transform_1, window_bounds = array<i64: 1, 512>}, {transform_indices = @transform_2, window_bounds = array<i64: 512, 512>}, {transform_indices = @transform_3, window_bounds = array<i64: 256, 512>}]} {
    %c0 = arith.constant 0 : index
    %c0_0 = arith.constant 0 : index
    %0 = vector.load %arg2[%c0, %c0_0] : memref<256x512xf32, #tpu.memory_space<vmem>>, vector<256x512xf32>
    %1 = arith.mulf %0, %0 : vector<256x512xf32>
    %cst = arith.constant dense<0.000000e+00> : vector<256xf32>
    %2 = vector.multi_reduction <add>, %1, %cst [1] : vector<256x512xf32> to vector<256xf32>
    %3 = vector.shape_cast %2 : vector<256xf32> to vector<256x1xf32>
    %cst_1 = arith.constant 5.120000e+02 : f32
    %4 = vector.broadcast %cst_1 : f32 to vector<256x1xf32>
    %5 = arith.divf %3, %4 : vector<256x1xf32>
    %cst_2 = arith.constant 9.99999997E-7 : f32
    %6 = vector.broadcast %cst_2 : f32 to vector<256x1xf32>
    %7 = arith.addf %5, %6 : vector<256x1xf32>
    %8 = math.rsqrt %7 : vector<256x1xf32>
    %9 = vector.broadcast %8 : vector<256x1xf32> to vector<256x512xf32>
    %10 = arith.mulf %0, %9 : vector<256x512xf32>
    %c0_3 = arith.constant 0 : index
    %c0_4 = arith.constant 0 : index
    %11 = vector.load %arg3[%c0_3, %c0_4] : memref<1x512xf32, #tpu.memory_space<vmem>>, vector<1x512xf32>
    %12 = vector.broadcast %11 : vector<1x512xf32> to vector<256x512xf32>
    %13 = arith.mulf %10, %12 : vector<256x512xf32>
    %c0_5 = arith.constant 0 : index
    %c0_6 = arith.constant 0 : index
    %14 = vector.load %arg4[%c0_5, %c0_6] : memref<512x512xf32, #tpu.memory_space<vmem>>, vector<512x512xf32>
    %cst_7 = arith.constant dense<0.000000e+00> : vector<256x512xf32>
    %15 = tpu.matmul %13, %14, %cst_7 {dimension_numbers = #tpu.dot_dimension_numbers<[1], [0], [0], [1], [0, 0, 1, 1], [], []>} : vector<256x512xf32>, vector<512x512xf32>, vector<256x512xf32> -> vector<256x512xf32>
    %c0_8 = arith.constant 0 : index
    %c0_9 = arith.constant 0 : index
    %16 = vector.load %arg5[%c0_8, %c0_9] : memref<256x512xf32, #tpu.memory_space<vmem>>, vector<256x512xf32>
    tpu.vector_store %arg5[%c0_8, %c0_9], %15 {strides = array<i32>} : memref<256x512xf32, #tpu.memory_space<vmem>>, vector<256x512xf32>,
    return
  }
  func.func @transform_0(%arg0: i32, %arg1: i32) -> (i32, i32) {
    %c0_i32 = arith.constant 0 : i32
    %c0_i32_0 = arith.constant 0 : i32
    return %arg0, %c0_i32 : i32, i32
  }
  func.func @transform_1(%arg0: i32, %arg1: i32) -> (i32, i32) {
    %c0_i32 = arith.constant 0 : i32
    %c0_i32_0 = arith.constant 0 : i32
    %c0_i32_1 = arith.constant 0 : i32
    return %c0_i32, %c0_i32_0 : i32, i32
  }
  func.func @transform_2(%arg0: i32, %arg1: i32) -> (i32, i32) {
    %c0_i32 = arith.constant 0 : i32
    %c0_i32_0 = arith.constant 0 : i32
    return %c0_i32, %arg1 : i32, i32
  }
  func.func @transform_3(%arg0: i32, %arg1: i32) -> (i32, i32) {
    %c0_i32 = arith.constant 0 : i32
    return %arg0, %arg1 : i32, i32
  }
}

</mosaic_0001>

<bundles_post_ra>
// kernel: tpu_custom_call.1
= control target key start
LH: loop header
LB: loop body
LE: loop exit
PB: predicated region body
PF: predicated region fallthrough
CT: control target
= control target key end

     0   :  { %s5041_s0 = inlined_call_operand.hbm [shape: f32[512,512], index: 0, kind: input, shape index: {}]   ;;  %s5042_s1 = inlined_call_operand.hbm [shape: f32[1,512], index: 1, kind: input, shape index: {}]   ;;  %s5043_s2 = inlined_call_operand.hbm [shape: f32[512,1024], index: 2, kind: input, shape index: {}]   ;;  %s5044_s3 = inlined_call_operand.hbm [shape: f32[512,1024], index: 3, kind: output, shape index: {}]  }
   0x1   :  { %5062 = sst [smem:[#allocation24_spill]] %s5041_s0 }
   0x2   :  { %5063 = sst [smem:[#allocation25_spill]] %s5044_s3 }
   0x3   :  { %8 = vsyncpa [#allocation3], 0 }
   0x4   :  { %10 = vsyncpa [#allocation3 + $0x1], 0 }
   0x5   :  { %11 = vsyncpa [#allocation6], 0 }
   0x6   :  { %12 = vsyncpa [#allocation4], 0 }
   0x7   :  { %14 = vsyncpa [#allocation4 + $0x1], 0  ;;  %s3621_s12 = smov 0   ;;  %s3623_s13 = smov 0  }
   0x8   :  { %s3625_s14 = smov 0   ;;  %s3627_s15 = smov 0  }
   0x9   :  { %s3629_s16 = smov 0   ;;  %s3631_s17 = smov 0  }
   0xa   :  { %s3633_s18 = smov 0   ;;  %s3635_s19 = smov 0  }
   0xb   :  { %s3637_s20 = smov 0   ;;  %s3639_s21 = smov 0  }
   0xc   :  { %s3641_s22 = smov 0   ;;  %s3643_s23 = smov 0  }
   0xd   :  { %s3645_s24 = smov 0   ;;  %s3647_s25 = smov 0  }
   0xe LB: > { %5064 = sst [smem:[#allocation13_spill]] %s3557_s17  ;;  %s29_s26 = sadd.s32 1, %s3581_s23  ;;  %s3589_s25 = sphi %s3647_s25, %s20_s25   ;;  %s3585_s24 = sphi %s3645_s24, %s5125_s24   ;;  %s3581_s23 = sphi %s3643_s23, %s5124_s23   ;;  %s3577_s22 = sphi %s3641_s22, %s5111_s22   ;;  %s3573_s21 = sphi %s3639_s21, %s5110_s21   ;;  %s3569_s20 = sphi %s3637_s20, %s5123_s20   ;;  %s3565_s19 = sphi %s3635_s19, %s5122_s19   ;;  %s3561_s18 = sphi %s3633_s18, %s5121_s18   ;;  %s3557_s17 = sphi %s3631_s17, %s5120_s17   ;;  %s3553_s16 = sphi %s3629_s16, %s5119_s16   ;;  %s3549_s15 = sphi %s3627_s15, %s5118_s15   ;;  %s3545_s14 = sphi %s3625_s14, %s5117_s14   ;;  %s3541_s13 = sphi %s3623_s13, %s5116_s13   ;;  %s3537_s12 = sphi %s3621_s12, %s5115_s12  }
   0xf   : > { %5065 = sst [smem:[#allocation14_spill]] %s3569_s20  ;;  %s32_s27 = sadd.s32 1, %s3585_s24 }
  0x10   : > { %5066 = sst [smem:[#allocation15_spill]] %s3573_s21  ;;  %p30_p0 = scmp.ge.s32.totalorder %s29_s26, 2 }
  0x11   : > { %5067 = sst [smem:[#allocation16_spill]] %s3577_s22  ;;  %s39_s28 = sadd.s32 1, %s3569_s20 }
  0x12   : > { %5068 = sst [smem:[#allocation17_spill]] %s3581_s23  ;;  %p46_p1 = scmp.ne.s32.totalorder %s3569_s20, %s3565_s19 }
  0x13   : > { %5069 = sst [smem:[#allocation18_spill]] %s3585_s24  ;;  %p5049_p2 = scmp.eq.s32.totalorder %s3589_s25, 0 }
  0x14   : > { %s5127_s26 = smov (%p30_p0, %s29_s26), 0  ;;  %s5129_s27 = smov (!%p30_p0, %s32_s27), %s3585_s24 }
  0x15   : > { %5070 = sst [smem:[#allocation19_spill]] %s5127_s26  ;;  %p3702_p3 = por %p5049_p2, %p46_p1 }
  0x16   : > { %s3708_s30 = ssub.s32 %s3581_s23, %s5127_s26  ;;  %p34_p4 = scmp.ge.s32.totalorder %s5129_s27, 2 }
  0x17   : > { %p5048_p6 = scmp.lt.s32.totalorder %s3589_s25, 4  ;;  %s162_s4 = sand.u32 1, %s3589_s25  }
  0x18   : > { %s5131_s27 = smov (%p34_p4, %s5129_s27), 0  ;;  %s164_s5 = sand.u32 1, %s3569_s20  }
  0x19   : > { %5072 = sst [smem:[#allocation20_spill]] %s5131_s27  ;;  %s36_s6 = ssub.s32 %s3585_s24, %s5131_s27 }
  0x1a   : > { %p37_p7 = scmp.eq.s32.totalorder %s36_s6, 0  ;;  %s111_s7 = sor.u32 %s3708_s30, %s36_s6 }
  0x1b   : > { %p3719_p8 = scmp.eq.s32.totalorder %s111_s7, 0  ;;  %s2600_s9 = sshll.u32 %s164_s5, 10 }
  0x1c   : > { %s3724_s10 = scalar_select %p37_p7, %s3569_s20, %s39_s28  }
  0x1d   : > { %s2620_s11 = sshll.u32 %s3585_s24, 14  ;;  %s5075_s0 = sld [smem:[#allocation24_spill]] }
  0x1e   : > { %5074 = sst [smem:[#allocation21_spill]] %s3724_s10  ;;  %s166_s27 = scalar_lea.vmem [#allocation2], %s2600_s9 }
  0x1f   : > { %s174_s21 = sshll.u32 %s166_s27, 4  ;;  %p3738_p9 = pnand %p5048_p6, %p3702_p3  ;;  %s3732_s21 = int_to_ptr.vmem [resolvable:$true] %s174_s21 }
  0x20   : > { %s3742_s28 = scalar_lea.sflag [#allocation3], %s162_s4 }
  0x21   : > { %p3349_p11 = pneg %p3738_p9 }
  0x23   : > { %s3730_s22 = scalar_lea.hbm %s5075_s0, %s2620_s11  ;;  %s3352_s29 = scalar_lea.hbm %s5075_s0, 32768 }
  0x24   : > { %s3347_s3 = scalar_lea.hbm %s3730_s22, 16384  ;;  %p3353_p0 = scmp.lt.u32.totalorder %s3730_s22, %s5075_s0 }
  0x25   : > { %p3348_p10 = scmp.ne.s32.totalorder %s3730_s22, %s3347_s3  ;;  %p3354_p1 = scmp.lt.u32.totalorder %s3352_s29, %s3347_s3 }
  0x26   : > { %p3356_p4 = scmp.lt.u32.totalorder %s3347_s3, %s3730_s22 }
  0x27   : > { %p3350_p12 = pnand %p3349_p11, %p3348_p10  ;;  %p3355_p3 = por %p3354_p1, %p3353_p0 }
  0x29   : > { %p3351_p13 = pneg %p3350_p12  ;;  %p3357_p7 = por %p3356_p4, %p3355_p3 }
  0x2b   : > { %p3358_p6 = pnand %p3357_p7, %p3351_p13 }
  0x2d   : > { %3361 = shalt.err (!%p3358_p6)
}
  0x2e   : > { %s3362_s4 = scalar_lea.vmem %s3732_s21, 16384  ;;  %s3591_s9 = smov [#allocation2]  }
  0x2f   : > { %p3363_p10 = scmp.ne.s32.totalorder %s3732_s21, %s3362_s4  ;;  %s3367_s11 = sshll.u32 %s3591_s9, 4  ;;  %s3368_s11 = int_to_ptr.vmem [resolvable:$false] %s3367_s11 }
  0x30   : > { %s3369_s26 = scalar_lea.vmem %s3368_s11, 32768  ;;  %p3370_p5 = scmp.lt.s32.totalorder %s3732_s21, %s3368_s11 }
  0x31   : > { %p3365_p12 = pnand %p3363_p10, %p3349_p11  ;;  %p3371_p0 = scmp.lt.s32.totalorder %s3369_s26, %s3362_s4 }
  0x33   : > { %p3366_p2 = pneg %p3365_p12  ;;  %p3372_p1 = por %p3371_p0, %p3370_p5 }
  0x35   : > { %p3373_p3 = pnand %p3372_p1, %p3366_p2 }
  0x37   : > { %3376 = shalt.err (!%p3373_p3)
}
  0x38   : > { %s5050_s3 = smov 512   ;;  %s5051_s27 = smov 32  }
  0x39   : > { %3024 = dma.hbm_to_vmem [thread:$0]  (!%p3738_p9), %s3730_s22, 16384, %s3732_s21, %s3742_s28, %s5050_s3, %s5050_s3, %s5051_s27  }
  0x3a   : > { %s3774_s29 = sadd.s32 4294967295, %s3589_s25   ;;  %s2596_s6 = sadd.s32 4294967294, %s3589_s25  }
  0x3b   : > { %p52_p2 = scmp.ne.s32.totalorder %s3565_s19, %s3561_s18  ;;  %p5056_p5 = scmp.eq.s32.totalorder %s3774_s29, 0 }
  0x3c   : > { %s86_s5 = sadd.s32 1, %s3557_s17  ;;  %p5077_p6 = scmp.eq.s32.totalorder %s3708_s30, 0 }
  0x3d   : > { %p3788_p11 = por %p5056_p5, %p52_p2  ;;  %p93_p9 = scmp.ne.s32.totalorder %s3557_s17, %s3553_s16 }
  0x3e   : > { %s3784_s7 = scalar_select %p5077_p6, %s3557_s17, %s86_s5  }
  0x3f   : > { %s5079_s21 = scalar_select %p3788_p11, 1, 0 }
  0x40   : > { %5078 = sst [smem:[#allocation22_spill]] %s3784_s7  ;;  %p99_p13 = scmp.ne.s32.totalorder %s3553_s16, %s3549_s15 }
  0x41   : > { %s114_s22 = sadd.s32 1, %s3545_s14  ;;  %p5080_p4 = scmp.eq.s32.totalorder %s3589_s25, 0 }
  0x42   : > { %p124_p10 = scmp.ne.s32.totalorder %s3545_s14, %s3541_s13  ;;  %p3807_p12 = por %p99_p13, %p5056_p5 }
  0x43   : > { %p3799_p7 = por %p93_p9, %p5080_p4  ;;  %p125_p0 = scmp.eq.s32.totalorder %s3774_s29, 3 }
  0x44   : > { %s5082_s18 = scalar_select %p3807_p12, 1, 0 }
  0x45   : > { %s3815_s30 = scalar_select %p3719_p8, %s3545_s14, %s114_s22  }
  0x46   : > { %p3817_p1 = por %p125_p0, %p124_p10  ;;  %p130_p3 = scmp.ne.s32.totalorder %s3541_s13, %s3537_s12 }
  0x47   : > { %5083 = sst [smem:[#allocation23_spill]] %s3815_s30  ;;  %p131_p2 = scmp.eq.s32.totalorder %s2596_s6, 3 }
  0x48   : > { %s5084_s15 = scalar_select %p3817_p1, 1, 0 }
  0x49   : > { %p2597_p6 = scmp.ge.s32.totalorder %s3589_s25, 1  ;;  %p138_p9 = scmp.lt.s32.totalorder %s3589_s25, 5 }
  0x4a   : > { %p3825_p4 = por %p131_p2, %p130_p3  ;;  %s3594_s8 = smov [#allocation5]  }
  0x4b   : > { %p3829_p13 = pnand %p2597_p6, %p138_p9  ;;  %s151_s26 = sshll.u32 %s3594_s8, 4  ;;  %s152_s26 = int_to_ptr.vmem [resolvable:$true] %s151_s26 }
  0x4c   : > { %s5085_s9 = scalar_select %p3825_p4, 1, 0 }
  0x4d   : > { %s5086_s11 = scalar_select %p3829_p13, 1, 0 }
  0x4e   : > { %p5087_p8 = scmp.lt.s32.totalorder %s3589_s25, 4  ;;  %p3017_p0 = pneg %p3829_p13 }
  0x4f   : > { %s186_s6 = sand.u32 1, %s3557_s17   ;;  %s2621_s27 = sshll.u32 %s3581_s23, 9 }
  0x50   : > { %p3837_p10 = pnand %p5087_p8, %p3799_p7  ;;  %s2604_s22 = sshll.u32 %s186_s6, 11 }
  0x51   : > { %p3846_p3 = pnand %p3017_p0, %p5056_p5  ;;  %s188_s0 = scalar_lea.vmem [#allocation7], %s2604_s22 }
  0x52   : > { %s5088_s5 = scalar_select %p3837_p10, 1, 0 }
  0x53   : > { %s195_s8 = sshll.u32 %s188_s0, 4  ;;  %s3854_s10 = scalar_lea.hbm %s5043_s2, %s2621_s27  ;;  %s3872_s8 = int_to_ptr.vmem [resolvable:$true] %s195_s8 }
  0x54   : > { %s3377_s30 = scalar_lea.hbm %s5042_s1, 64  ;;  %p3379_p2 = pneg %p3846_p3 }
  0x55   : > { %p3378_p7 = scmp.ne.s32.totalorder %s5042_s1, %s3377_s30  ;;  %p3384_p8 = scmp.lt.u32.totalorder %s3377_s30, %s5042_s1 }
  0x57   : > { %p3380_p6 = pnand %p3379_p2, %p3378_p7 }
  0x59   : > { %p3381_p9 = pneg %p3380_p6 }
  0x5b   : > { %p3386_p0 = pnand %p3384_p8, %p3381_p9 }
  0x5d   : > { %3389 = shalt.err (!%p3386_p0)
}
  0x5e   : > { %s3390_s0 = scalar_lea.vmem %s152_s26, 64  ;;  %p3398_p12 = scmp.lt.s32.totalorder %s152_s26, %s152_s26 }
  0x5f   : > { %p3391_p5 = scmp.ne.s32.totalorder %s152_s26, %s3390_s0  ;;  %p3399_p11 = scmp.lt.s32.totalorder %s3390_s0, %s3390_s0 }
  0x61   : > { %p3393_p4 = pnand %p3391_p5, %p3379_p2  ;;  %p3400_p13 = por %p3399_p11, %p3398_p12 }
  0x63   : > { %p3394_p1 = pneg %p3393_p4 }
  0x65   : > { %p3401_p10 = pnand %p3400_p13, %p3394_p1 }
  0x67   : > { %3404 = shalt.err (!%p3401_p10)
}
  0x68   : > { %3020 = dma.hbm_to_vmem [thread:$0]  (!%p3846_p3), %s5042_s1, 64, %s152_s26, [#allocation6]  }
  0x69   : > { %s3405_s23 = scalar_lea.hbm %s3854_s10, 32768  ;;  %p5090_p4 = scmp.ne.s32.totalorder %s5088_s5, 0 }
  0x6a   : > { %p3406_p5 = scmp.ne.s32.totalorder %s3854_s10, %s3405_s23  ;;  %s3410_s27 = scalar_lea.hbm %s5043_s2, 65536 }
  0x6b   : > { %p3407_p11 = pneg %p5090_p4  ;;  %p3411_p13 = scmp.lt.u32.totalorder %s3854_s10, %s5043_s2 }
  0x6c   : > { %p3412_p10 = scmp.lt.u32.totalorder %s3410_s27, %s3405_s23  ;;  %p3414_p7 = scmp.lt.u32.totalorder %s3405_s23, %s3854_s10 }
  0x6d   : > { %p3408_p12 = pnand %p3407_p11, %p3406_p5 }
  0x6e   : > { %p3413_p3 = por %p3412_p10, %p3411_p13 }
  0x6f   : > { %p3409_p1 = pneg %p3408_p12 }
  0x70   : > { %p3415_p2 = por %p3414_p7, %p3413_p3 }
  0x72   : > { %p3416_p6 = pnand %p3415_p2, %p3409_p1 }
  0x74   : > { %3419 = shalt.err (!%p3416_p6)
}
  0x75   : > { %s3420_s26 = scalar_lea.vmem %s3872_s8, 32768  ;;  %s3595_s4 = smov [#allocation7]  }
  0x76   : > { %p3421_p9 = scmp.ne.s32.totalorder %s3872_s8, %s3420_s26  ;;  %s3425_s6 = sshll.u32 %s3595_s4, 4  ;;  %s3426_s6 = int_to_ptr.vmem [resolvable:$false] %s3425_s6 }
  0x77   : > { %s3427_s22 = scalar_lea.vmem %s3426_s6, 65536  ;;  %p3428_p5 = scmp.lt.s32.totalorder %s3872_s8, %s3426_s6 }
  0x78   : > { %p3423_p8 = pnand %p3421_p9, %p3407_p11  ;;  %p3429_p12 = scmp.lt.s32.totalorder %s3427_s22, %s3420_s26 }
  0x7a   : > { %p3424_p0 = pneg %p3423_p8  ;;  %p3430_p13 = por %p3429_p12, %p3428_p5 }
  0x7c   : > { %p3431_p10 = pnand %p3430_p13, %p3424_p0 }
  0x7e   : > { %3434 = shalt.err (!%p3431_p10)
}
  0x7f   : > { %s3596_s0 = smov 1024   ;;  %s5091_s17 = smov 32  }
  0x80   : > { %s5092_s20 = smov 512   ;;  %p5093_p11 = scmp.ne.s32.totalorder %s5086_s11, 0 }
  0x81   : > { %3027 = dma.hbm_to_vmem [thread:$0]  (!%p5090_p4), %s3854_s10, 32768, %s3872_s8, %s3742_s28, %s3596_s0, %s5092_s20, %s5091_s17  }
  0x82   : > { %207 = sbr.rel (%p5093_p11) target bundleno = 797 (0x31d), region = 32  ;;  %s209_s23 = sand.u32 (!%p5093_p11), 1, %s3774_s29  }
  0x83   : > { %s211_s24 = sand.u32 (!%p5093_p11), 1, %s3565_s19   ;;  %s210_s27 = scalar_lea.sflag (!%p5093_p11), [#allocation3], %s209_s23 }
  0x84   : > { %s2608_s3 = sshll.u32 (!%p5093_p11), %s211_s24, 10  ;;  %p5094_p1 = scmp.ne.s32.totalorder (!%p5093_p11), %s5079_s21, 0 }
  0x85   : > { %s3906_s7 = scalar_lea.vmem (!%p5093_p11), [#allocation2], %s2608_s3 }
  0x89   : > { %3520 = dma.done.wait (%p5094_p1), %s210_s27, 16384  }
  0x8a   : > { %3522 = vsyncadd (%p5094_p1), %s210_s27, 4294950912  ;;  %p5095_p3 = scmp.eq.s32.totalorder %s3774_s29, 0 }
  0x8c   : > { %3524 = dma.done.wait (%p5095_p3), [#allocation6], 64   ;;  %p5096_p4 = pmov %p5095_p3 }
  0x8d   : > { %s224_s10 = sand.u32 1, %s3553_s16   ;;  %p5097_p7 = scmp.ne.s32.totalorder %s5082_s18, 0 }
  0x8e   : > { %3526 = vsyncadd (%p5096_p4), [#allocation6], 4294967232  ;;  %s2610_s28 = sshll.u32 %s224_s10, 11 }
  0x8f   : > { %s3917_s11 = scalar_lea.vmem [#allocation7], %s2610_s28 }
  0x90   : > { %3528 = dma.done.wait (%p5097_p7), %s210_s27, 32768  }
  0x91   : > { %3530 = vsyncadd (%p5097_p7), %s210_s27, 4294934528  ;;  %v258_v0 = vld [vmem:[%s3906_s7] sm:$0xff]  ;;  %v259_v1 = vld [vmem:[%s3906_s7 + $0x8] sm:$0xff]  ;;  %s251_s29 = sand.u32 1, %s3541_s13   ;;  %s5098_s5 = sld [smem:[#allocation15_spill]] }
  0x92   : > { %v260_v2 = vld [vmem:[%s3906_s7 + $0x10] sm:$0xff]  ;;  %v261_v3 = vld [vmem:[%s3906_s7 + $0x18] sm:$0xff]  ;;  %v386_v4 = vmul.f32 %v258_v0, %v258_v0  ;;  %v387_v5 = vmul.f32 %v259_v1, %v259_v1  ;;  %v262_v7 = vld [vmem:[%s3906_s7 + $0x20] sm:$0xff]  ;;  %s2611_s21 = sshll.u32 %s251_s29, 10  ;;  %s5099_s8 = sld [smem:[#allocation16_spill]] }
  0x93   : > { %v388_v6 = vmul.f32 %v260_v2, %v260_v2  ;;  %v263_v8 = vld [vmem:[%s3906_s7 + $0x28] sm:$0xff]  ;;  %v389_v9 = vmul.f32 %v261_v3, %v261_v3  ;;  %v264_v10 = vld [vmem:[%s3906_s7 + $0x30] sm:$0xff]  ;;  %v265_v11 = vld [vmem:[%s3906_s7 + $0x38] sm:$0xff]  ;;  %v390_v12 = vmul.f32 %v262_v7, %v262_v7  ;;  %s4823_s18 = scalar_lea.vmem [#allocation8], %s2611_s21  ;;  %s5100_s20 = sld [smem:[#allocation25_spill]] }
  0x94   : > { %v391_v13 = vmul.f32 %v263_v8, %v263_v8  ;;  %v266_v14 = vld [vmem:[%s3906_s7 + $0x40] sm:$0xff]  ;;  %v514_v15 = vadd.f32 %v387_v5, %v386_v4  ;;  %v392_v16 = vmul.f32 %v264_v10, %v264_v10  ;;  %v393_v17 = vmul.f32 %v265_v11, %v265_v11  ;;  %v267_v18 = vld [vmem:[%s3906_s7 + $0x48] sm:$0xff]  ;;  %v268_v19 = vld [vmem:[%s3906_s7 + $0x50] sm:$0xff]  ;;  %s2478_s6 = sshll.u32 %s4823_s18, 4  ;;  %s4965_s24 = scalar_lea.sflag [#allocation4], %s251_s29  ;;  %s4952_s6 = int_to_ptr.vmem [resolvable:$true] %s2478_s6 }
  0x95   : > { %v269_v20 = vld [vmem:[%s3906_s7 + $0x58] sm:$0xff]  ;;  %v394_v21 = vmul.f32 %v266_v14, %v266_v14  ;;  %v395_v23 = vmul.f32 %v267_v18, %v267_v18  ;;  %v396_v24 = vmul.f32 %v268_v19, %v268_v19  ;;  %v270_v26 = vld [vmem:[%s3906_s7 + $0x60] sm:$0xff]  ;;  %v271_v27 = vld [vmem:[%s3906_s7 + $0x68] sm:$0xff]  ;;  %s3435_s27 = scalar_lea.vmem %s4952_s6, 16384  ;;  %p5102_p6 = scmp.ne.s32.totalorder %s5084_s15, 0 }
  0x96   : > { %v519_v22 = vadd.f32 %v391_v13, %v390_v12  ;;  %v397_v25 = vmul.f32 %v269_v20, %v269_v20  ;;  %v272_v28 = vld [vmem:[%s3906_s7 + $0x70] sm:$0xff]  ;;  %v515_v29 = vadd.f32 %v514_v15, %v388_v6  ;;  %v273_v30 = vld [vmem:[%s3906_s7 + $0x78] sm:$0xff]  ;;  %v398_v31 = vmul.f32 %v270_v26, %v270_v26  ;;  %v274_v34 = vld [vmem:[%s3906_s7 + $0x80] sm:$0xff]  ;;  %p3436_p2 = scmp.ne.s32.totalorder %s4952_s6, %s3435_s27 }
  0x97   : > { %v399_v32 = vmul.f32 %v271_v27, %v271_v27  ;;  %v400_v33 = vmul.f32 %v272_v28, %v272_v28  ;;  %v275_v35 = vld [vmem:[%s3906_s7 + $0x88] sm:$0xff]  ;;  %v524_v37 = vadd.f32 %v395_v23, %v394_v21  ;;  %v401_v38 = vmul.f32 %v273_v30, %v273_v30  ;;  %v276_v39 = vld [vmem:[%s3906_s7 + $0x90] sm:$0xff]  ;;  %v277_v40 = vld [vmem:[%s3906_s7 + $0x98] sm:$0xff]  ;;  %s2614_s30 = sshll.u32 %s5098_s5, 2 }
  0x98   : > { %v520_v36 = vadd.f32 %v519_v22, %v392_v16  ;;  %v402_v41 = vmul.f32 %v274_v34, %v274_v34  ;;  %v278_v42 = vld [vmem:[%s3906_s7 + $0xa0] sm:$0xff]  ;;  %v516_v43 = vadd.f32 %v515_v29, %v389_v9  ;;  %v403_v45 = vmul.f32 %v275_v35, %v275_v35  ;;  %v279_v47 = vld [vmem:[%s3906_s7 + $0xa8] sm:$0xff]  ;;  %v280_v48 = vld [vmem:[%s3906_s7 + $0xb0] sm:$0xff]  ;;  %s2622_s26 = sshll.u32 %s5099_s8, 8  ;;  %p3437_p9 = pnand %p3436_p2, %p5102_p6 }
  0x99   : > { %v529_v44 = vadd.f32 %v399_v32, %v398_v31  ;;  %v404_v46 = vmul.f32 %v276_v39, %v276_v39  ;;  %v281_v49 = vld [vmem:[%s3906_s7 + $0xb8] sm:$0xff]  ;;  %v525_v51 = vadd.f32 %v524_v37, %v396_v24  ;;  %v405_v52 = vmul.f32 %v277_v40, %v277_v40  ;;  %v282_v54 = vld [vmem:[%s3906_s7 + $0xc0] sm:$0xff]  ;;  %v283_v55 = vld [vmem:[%s3906_s7 + $0xc8] sm:$0xff]  ;;  %s2475_s4 = sadd.s32 %s2622_s26, %s2614_s30  ;;  %s5101_s3 = smov %s5100_s20 }
  0x9a   : > { %v521_v50 = vadd.f32 %v520_v36, %v393_v17  ;;  %v406_v53 = vmul.f32 %v278_v42, %v278_v42  ;;  %v284_v56 = vld [vmem:[%s3906_s7 + $0xd0] sm:$0xff]  ;;  %517 = vadd.xlane.f32.xlu0 %v516_v43  ;;  %v534_v58 = vadd.f32 %v403_v45, %v402_v41  ;;  %v407_v59 = vmul.f32 %v279_v47, %v279_v47  ;;  %v286_v61 = vld [vmem:[%s3906_s7 + $0xe0] sm:$0xff]  ;;  %v287_v62 = vld [vmem:[%s3906_s7 + $0xe8] sm:$0xff]  ;;  %s2616_s22 = sshll.u32 %s2475_s4, 7  ;;  %p3438_p8 = pneg %p3437_p9 }
  0x9b   : > { %v530_v57 = vadd.f32 %v529_v44, %v400_v33  ;;  %v408_v60 = vmul.f32 %v280_v48, %v280_v48  ;;  %v526_v63 = vadd.f32 %v525_v51, %v397_v25  ;;  %v285_v0 = vld [vmem:[%s3906_s7 + $0xd8] sm:$0xff]  ;;  %v410_v1 = vmul.f32 %v282_v54, %v282_v54  ;;  %v288_v3 = vld [vmem:[%s3906_s7 + $0xf0] sm:$0xff]  ;;  %v290_v8 = vld [vmem:[%s3906_s7 + $0x100] sm:$0xff]  ;;  %s4957_s23 = scalar_lea.hbm %s5100_s20, %s2616_s22 }
  0x9c   : > { %v411_v2 = vmul.f32 %v283_v55, %v283_v55  ;;  %v535_v4 = vadd.f32 %v534_v58, %v404_v46  ;;  %v409_v5 = vmul.f32 %v281_v49, %v281_v49  ;;  %v539_v6 = vadd.f32 %v407_v59, %v406_v53  ;;  %v291_v9 = vld [vmem:[%s3906_s7 + $0x108] sm:$0xff]  ;;  %v289_v12 = vld [vmem:[%s3906_s7 + $0xf8] sm:$0xff]  ;;  %v292_v15 = vld [vmem:[%s3906_s7 + $0x110] sm:$0xff] }
  0x9d   : > { %v412_v7 = vmul.f32 %v284_v56, %v284_v56  ;;  %527 = vadd.xlane.f32.xlu1 %v526_v63  ;;  %v531_v10 = vadd.f32 %v530_v57, %v401_v38  ;;  %v414_v13 = vmul.f32 %v286_v61, %v286_v61  ;;  %v415_v14 = vmul.f32 %v287_v62, %v287_v62  ;;  %v294_v16 = vld [vmem:[%s3906_s7 + $0x120] sm:$0xff]  ;;  %v293_v21 = vld [vmem:[%s3906_s7 + $0x118] sm:$0xff]  ;;  %v295_v22 = vld [vmem:[%s3906_s7 + $0x128] sm:$0xff] }
  0x9e   : > { %v544_v11 = vadd.f32 %v411_v2, %v410_v1  ;;  %522 = vadd.xlane.f32.xlu0 %v521_v50  ;;  %v536_v17 = vadd.f32 %v535_v4, %v405_v52  ;;  %v540_v18 = vadd.f32 %v539_v6, %v408_v60  ;;  %v413_v19 = vmul.f32 %v285_v0, %v285_v0  ;;  %v296_v27 = vld [vmem:[%s3906_s7 + $0x130] sm:$0xff]  ;;  %v298_v28 = vld [vmem:[%s3906_s7 + $0x140] sm:$0xff]  ;;  %v299_v29 = vld [vmem:[%s3906_s7 + $0x148] sm:$0xff] }
  0x9f   : > { %v416_v20 = vmul.f32 %v288_v3, %v288_v3  ;;  %v549_v24 = vadd.f32 %v415_v14, %v414_v13  ;;  %v418_v25 = vmul.f32 %v290_v8, %v290_v8  ;;  %v419_v26 = vmul.f32 %v291_v9, %v291_v9  ;;  %v297_v33 = vld [vmem:[%s3906_s7 + $0x138] sm:$0xff]  ;;  %v300_v35 = vld [vmem:[%s3906_s7 + $0x150] sm:$0xff]  ;;  %v302_v40 = vld [vmem:[%s3906_s7 + $0x160] sm:$0xff] }
  0xa0   : > { %v545_v23 = vadd.f32 %v544_v11, %v412_v7  ;;  %v541_v30 = vadd.f32 %v540_v18, %v409_v5  ;;  %v417_v31 = vmul.f32 %v289_v12, %v289_v12  ;;  %v420_v32 = vmul.f32 %v292_v15, %v292_v15  ;;  %v303_v41 = vld [vmem:[%s3906_s7 + $0x168] sm:$0xff]  ;;  %v301_v44 = vld [vmem:[%s3906_s7 + $0x158] sm:$0xff]  ;;  %v304_v47 = vld [vmem:[%s3906_s7 + $0x170] sm:$0xff] }
  0xa1   : > { %v422_v34 = vmul.f32 %v294_v16, %v294_v16  ;;  %532 = vadd.xlane.f32.xlu1 %v531_v10  ;;  %v550_v36 = vadd.f32 %v549_v24, %v416_v20  ;;  %v421_v37 = vmul.f32 %v293_v21, %v293_v21  ;;  %v554_v38 = vadd.f32 %v419_v26, %v418_v25  ;;  %v306_v52 = vld [vmem:[%s3906_s7 + $0x180] sm:$0xff]  ;;  %v307_v53 = vld [vmem:[%s3906_s7 + $0x188] sm:$0xff]  ;;  %v305_v56 = vld [vmem:[%s3906_s7 + $0x178] sm:$0xff] }
  0xa2   : > { %v423_v39 = vmul.f32 %v295_v22, %v295_v22  ;;  %537 = vadd.xlane.f32.xlu0 %v536_v17  ;;  %v546_v42 = vadd.f32 %v545_v23, %v413_v19  ;;  %v424_v43 = vmul.f32 %v296_v27, %v296_v27  ;;  %v426_v45 = vmul.f32 %v298_v28, %v298_v28  ;;  %v308_v59 = vld [vmem:[%s3906_s7 + $0x190] sm:$0xff]  ;;  %v310_v60 = vld [vmem:[%s3906_s7 + $0x1a0] sm:$0xff]  ;;  %v309_v1 = vld [vmem:[%s3906_s7 + $0x198] sm:$0xff] }
  0xa3   : > { %v427_v46 = vmul.f32 %v299_v29, %v299_v29  ;;  %v555_v48 = vadd.f32 %v554_v38, %v420_v32  ;;  %v425_v49 = vmul.f32 %v297_v33, %v297_v33  ;;  %v428_v51 = vmul.f32 %v300_v35, %v300_v35  ;;  %v311_v2 = vld [vmem:[%s3906_s7 + $0x1a8] sm:$0xff]  ;;  %v312_v7 = vld [vmem:[%s3906_s7 + $0x1b0] sm:$0xff]  ;;  %v314_v8 = vld [vmem:[%s3906_s7 + $0x1c0] sm:$0xff] }
  0xa4   : > { %v559_v50 = vadd.f32 %v423_v39, %v422_v34  ;;  %v551_v54 = vadd.f32 %v550_v36, %v417_v31  ;;  %v430_v57 = vmul.f32 %v302_v40, %v302_v40  ;;  %v431_v58 = vmul.f32 %v303_v41, %v303_v41  ;;  %v315_v9 = vld [vmem:[%s3906_s7 + $0x1c8] sm:$0xff]  ;;  %v313_v13 = vld [vmem:[%s3906_s7 + $0x1b8] sm:$0xff]  ;;  %v316_v15 = vld [vmem:[%s3906_s7 + $0x1d0] sm:$0xff] }
  0xa5   : > { %v564_v55 = vadd.f32 %v427_v46, %v426_v45  ;;  %542 = vadd.xlane.f32.xlu1 %v541_v30  ;;  %v556_v61 = vadd.f32 %v555_v48, %v421_v37  ;;  %v429_v63 = vmul.f32 %v301_v44, %v301_v44  ;;  %v432_v0 = vmul.f32 %v304_v47, %v304_v47  ;;  %v318_v20 = vld [vmem:[%s3906_s7 + $0x1e0] sm:$0xff]  ;;  %v319_v21 = vld [vmem:[%s3906_s7 + $0x1e8] sm:$0xff]  ;;  %v317_v24 = vld [vmem:[%s3906_s7 + $0x1d8] sm:$0xff] }
  0xa6   : > { %v560_v62 = vadd.f32 %v559_v50, %v424_v43  ;;  %547 = vadd.xlane.f32.xlu0 %v546_v42  ;;  %v569_v4 = vadd.f32 %v431_v58, %v430_v57  ;;  %v434_v5 = vmul.f32 %v306_v52, %v306_v52  ;;  %v435_v6 = vmul.f32 %v307_v53, %v307_v53  ;;  %v320_v27 = vld [vmem:[%s3906_s7 + $0x1f0] sm:$0xff]  ;;  %v322_v32 = vld [vmem:[%s3906_s7 + $0x200] sm:$0xff]  ;;  %v323_v33 = vld [vmem:[%s3906_s7 + $0x208] sm:$0xff] }
  0xa7   : > { %v565_v3 = vadd.f32 %v564_v55, %v428_v51  ;;  %v433_v11 = vmul.f32 %v305_v56, %v305_v56  ;;  %v436_v12 = vmul.f32 %v308_v59, %v308_v59  ;;  %v438_v14 = vmul.f32 %v310_v60, %v310_v60  ;;  %v321_v36 = vld [vmem:[%s3906_s7 + $0x1f8] sm:$0xff]  ;;  %v324_v39 = vld [vmem:[%s3906_s7 + $0x210] sm:$0xff]  ;;  %v326_v40 = vld [vmem:[%s3906_s7 + $0x220] sm:$0xff] }
  0xa8   : > { %v561_v10 = vadd.f32 %v560_v62, %v425_v49  ;;  %v570_v16 = vadd.f32 %v569_v4, %v432_v0  ;;  %v437_v17 = vmul.f32 %v309_v1, %v309_v1  ;;  %v574_v18 = vadd.f32 %v435_v6, %v434_v5  ;;  %v325_v45 = vld [vmem:[%s3906_s7 + $0x218] sm:$0xff]  ;;  %v327_v46 = vld [vmem:[%s3906_s7 + $0x228] sm:$0xff]  ;;  %v328_v51 = vld [vmem:[%s3906_s7 + $0x230] sm:$0xff] }
  0xa9   : > { %v439_v19 = vmul.f32 %v311_v2, %v311_v2  ;;  %552 = vadd.xlane.f32.xlu1 %v551_v54  ;;  %v566_v22 = vadd.f32 %v565_v3, %v429_v63  ;;  %v440_v23 = vmul.f32 %v312_v7, %v312_v7  ;;  %v442_v25 = vmul.f32 %v314_v8, %v314_v8  ;;  %v330_v52 = vld [vmem:[%s3906_s7 + $0x240] sm:$0xff]  ;;  %v331_v53 = vld [vmem:[%s3906_s7 + $0x248] sm:$0xff]  ;;  %v329_v57 = vld [vmem:[%s3906_s7 + $0x238] sm:$0xff] }
  0xaa   : > { %v443_v26 = vmul.f32 %v315_v9, %v315_v9  ;;  %557 = vadd.xlane.f32.xlu0 %v556_v61  ;;  %v575_v28 = vadd.f32 %v574_v18, %v436_v12  ;;  %v441_v29 = vmul.f32 %v313_v13, %v313_v13  ;;  %v444_v31 = vmul.f32 %v316_v15, %v316_v15  ;;  %v332_v59 = vld [vmem:[%s3906_s7 + $0x250] sm:$0xff]  ;;  %v334_v0 = vld [vmem:[%s3906_s7 + $0x260] sm:$0xff]  ;;  %v335_v1 = vld [vmem:[%s3906_s7 + $0x268] sm:$0xff] }
  0xab   : > { %v579_v30 = vadd.f32 %v439_v19, %v438_v14  ;;  %v571_v34 = vadd.f32 %v570_v16, %v433_v11  ;;  %v446_v37 = vmul.f32 %v318_v20, %v318_v20  ;;  %v447_v38 = vmul.f32 %v319_v21, %v319_v21  ;;  %v333_v4 = vld [vmem:[%s3906_s7 + $0x258] sm:$0xff]  ;;  %v336_v7 = vld [vmem:[%s3906_s7 + $0x270] sm:$0xff]  ;;  %v338_v12 = vld [vmem:[%s3906_s7 + $0x280] sm:$0xff] }
  0xac   : > { %v584_v35 = vadd.f32 %v443_v26, %v442_v25  ;;  %v576_v41 = vadd.f32 %v575_v28, %v437_v17  ;;  %v445_v43 = vmul.f32 %v317_v24, %v317_v24  ;;  %v448_v44 = vmul.f32 %v320_v27, %v320_v27  ;;  %v339_v13 = vld [vmem:[%s3906_s7 + $0x288] sm:$0xff]  ;;  %v337_v16 = vld [vmem:[%s3906_s7 + $0x278] sm:$0xff]  ;;  %v340_v19 = vld [vmem:[%s3906_s7 + $0x290] sm:$0xff] }
  0xad   : > { %v580_v42 = vadd.f32 %v579_v30, %v440_v23  ;;  %562 = vadd.xlane.f32.xlu1 %v561_v10  ;;  %v589_v48 = vadd.f32 %v447_v38, %v446_v37  ;;  %v450_v49 = vmul.f32 %v322_v32, %v322_v32  ;;  %v451_v50 = vmul.f32 %v323_v33, %v323_v33  ;;  %v342_v20 = vld [vmem:[%s3906_s7 + $0x2a0] sm:$0xff]  ;;  %v341_v25 = vld [vmem:[%s3906_s7 + $0x298] sm:$0xff]  ;;  %v343_v26 = vld [vmem:[%s3906_s7 + $0x2a8] sm:$0xff] }
  0xae   : > { %v585_v47 = vadd.f32 %v584_v35, %v444_v31  ;;  %567 = vadd.xlane.f32.xlu0 %v566_v22  ;;  %v449_v55 = vmul.f32 %v321_v36, %v321_v36  ;;  %v452_v56 = vmul.f32 %v324_v39, %v324_v39  ;;  %v454_v58 = vmul.f32 %v326_v40, %v326_v40  ;;  %v344_v27 = vld [vmem:[%s3906_s7 + $0x2b0] sm:$0xff]  ;;  %v345_v32 = vld [vmem:[%s3906_s7 + $0x2b8] sm:$0xff]  ;;  %v346_v33 = vld [vmem:[%s3906_s7 + $0x2c0] sm:$0xff] }
  0xaf   : > { %v581_v54 = vadd.f32 %v580_v42, %v441_v29  ;;  %v590_v60 = vadd.f32 %v589_v48, %v448_v44  ;;  %v453_v61 = vmul.f32 %v325_v45, %v325_v45  ;;  %v594_v62 = vadd.f32 %v451_v50, %v450_v49  ;;  %v348_v39 = vld [vmem:[%s3906_s7 + $0x2d0] sm:$0xff]  ;;  %v349_v40 = vld [vmem:[%s3906_s7 + $0x2d8] sm:$0xff]  ;;  %v354_v48 = vld [vmem:[%s3906_s7 + $0x300] sm:$0xff] }
  0xb0   : > { %v455_v63 = vmul.f32 %v327_v46, %v327_v46  ;;  %v586_v2 = vadd.f32 %v585_v47, %v445_v43  ;;  %v456_v3 = vmul.f32 %v328_v51, %v328_v51  ;;  %v458_v5 = vmul.f32 %v330_v52, %v330_v52  ;;  %v351_v46 = vld [vmem:[%s3906_s7 + $0x2e8] sm:$0xff]  ;;  %v352_v47 = vld [vmem:[%s3906_s7 + $0x2f0] sm:$0xff] }
  0xb1   : > { %v459_v6 = vmul.f32 %v331_v53, %v331_v53  ;;  %572 = vadd.xlane.f32.xlu1 %v571_v34  ;;  %v595_v8 = vadd.f32 %v594_v62, %v452_v56  ;;  %v457_v9 = vmul.f32 %v329_v57, %v329_v57  ;;  %v460_v11 = vmul.f32 %v332_v59, %v332_v59  ;;  %v347_v34 = vld [vmem:[%s3906_s7 + $0x2c8] sm:$0xff]  ;;  %v353_v53 = vld [vmem:[%s3906_s7 + $0x2f8] sm:$0xff] }
  0xb2   : > { %v599_v10 = vadd.f32 %v455_v63, %v454_v58  ;;  %577 = vadd.xlane.f32.xlu0 %v576_v41  ;;  %v591_v14 = vadd.f32 %v590_v60, %v449_v55  ;;  %v462_v17 = vmul.f32 %v334_v0, %v334_v0  ;;  %v463_v18 = vmul.f32 %v335_v1, %v335_v1  ;;  %v350_v41 = vld [vmem:[%s3906_s7 + $0x2e0] sm:$0xff]  ;;  %v356_v55 = vld [vmem:[%s3906_s7 + $0x310] sm:$0xff] }
  0xb3   : > { %v604_v15 = vadd.f32 %v459_v6, %v458_v5  ;;  %v596_v21 = vadd.f32 %v595_v8, %v453_v61  ;;  %v461_v23 = vmul.f32 %v333_v4, %v333_v4  ;;  %v464_v24 = vmul.f32 %v336_v7, %v336_v7  ;;  %v1050_v56 = vld [vmem:[%s3917_s11 + $0x8] sm:$0xff]  ;;  %v357_v61 = vld [vmem:[%s3906_s7 + $0x318] sm:$0xff]  ;;  %v1049_v5 = vld [vmem:[%s3917_s11] sm:$0xff] }
  0xb4   : > { %v600_v22 = vadd.f32 %v599_v10, %v456_v3  ;;  %v609_v29 = vadd.f32 %v463_v18, %v462_v17  ;;  %v466_v30 = vmul.f32 %v338_v12, %v338_v12  ;;  %v467_v31 = vmul.f32 %v339_v13, %v339_v13  ;;  %v1054_v62 = vld [vmem:[%s3917_s11 + $0x28] sm:$0xff]  ;;  %v1052_v63 = vld [vmem:[%s3917_s11 + $0x18] sm:$0xff]  ;;  %v1053_v6 = vld [vmem:[%s3917_s11 + $0x20] sm:$0xff] }
  0xb5   : > { %v605_v28 = vadd.f32 %v604_v15, %v460_v11  ;;  %582 = vadd.xlane.f32.xlu1 %v581_v54  ;;  %v465_v36 = vmul.f32 %v337_v16, %v337_v16  ;;  %v468_v37 = vmul.f32 %v340_v19, %v340_v19  ;;  %v470_v38 = vmul.f32 %v342_v20, %v342_v20  ;;  %v355_v54 = vld [vmem:[%s3906_s7 + $0x308] sm:$0xff]  ;;  %v1056_v0 = vld [vmem:[%s3917_s11 + $0x38] sm:$0xff]  ;;  %v1051_v7 = vld [vmem:[%s3917_s11 + $0x10] sm:$0xff] }
  0xb6   : > { %v4013_v35 = vadd.f32 %v600_v22, %v457_v9  ;;  %587 = vadd.xlane.f32.xlu0 %v586_v2  ;;  %v610_v42 = vadd.f32 %v609_v29, %v464_v24  ;;  %v469_v43 = vmul.f32 %v341_v25, %v341_v25  ;;  %v614_v44 = vadd.f32 %v467_v31, %v466_v30  ;;  %v1055_v8 = vld [vmem:[%s3917_s11 + $0x30] sm:$0xff]  ;;  %v358_v13 = vld [vmem:[%s3906_s7 + $0x320] sm:$0xff]  ;;  %v1058_v20 = vld [vmem:[%s3917_s11 + $0x48] sm:$0xff] }
  0xb7   : > { %v471_v45 = vmul.f32 %v343_v26, %v343_v26  ;;  %v606_v49 = vadd.f32 %v605_v28, %v461_v23  ;;  %v472_v50 = vmul.f32 %v344_v27, %v344_v27  ;;  %v474_v51 = vmul.f32 %v346_v33, %v346_v33  ;;  %v360_v15 = vld [vmem:[%s3906_s7 + $0x330] sm:$0xff]  ;;  %v1064_v23 = vld [vmem:[%s3917_s11 + $0x78] sm:$0xff]  ;;  %v1057_v29 = vld [vmem:[%s3917_s11 + $0x40] sm:$0xff] }
  0xb8   : > { %v475_v52 = vmul.f32 %v347_v34, %v347_v34  ;;  %v615_v57 = vadd.f32 %v614_v44, %v468_v37  ;;  %v473_v58 = vmul.f32 %v345_v32, %v345_v32  ;;  %v476_v60 = vmul.f32 %v348_v39, %v348_v39  ;;  %v1062_v22 = vld [vmem:[%s3917_s11 + $0x68] sm:$0xff]  ;;  %v361_v28 = vld [vmem:[%s3906_s7 + $0x338] sm:$0xff]  ;;  %v1061_v30 = vld [vmem:[%s3917_s11 + $0x60] sm:$0xff] }
  0xb9   : > { %v619_v59 = vadd.f32 %v471_v45, %v470_v38  ;;  %592 = vadd.xlane.f32.xlu1 %v591_v14  ;;  %v4029_v1 = vadd.f32 %v610_v42, %v465_v36  ;;  %v478_v3 = vmul.f32 %v350_v41, %v350_v41  ;;  %v479_v4 = vmul.f32 %v351_v46, %v351_v46  ;;  %v359_v14 = vld [vmem:[%s3906_s7 + $0x328] sm:$0xff]  ;;  %v1059_v31 = vld [vmem:[%s3917_s11 + $0x50] sm:$0xff]  ;;  %v362_v38 = vld [vmem:[%s3906_s7 + $0x340] sm:$0xff] }
  0xba   : > { %v624_v2 = vadd.f32 %v475_v52, %v474_v51  ;;  %597 = vadd.xlane.f32.xlu0 %v596_v21  ;;  %v4035_v9 = vadd.f32 %v615_v57, %v469_v43  ;;  %v477_v11 = vmul.f32 %v349_v40, %v349_v40  ;;  %v480_v12 = vmul.f32 %v352_v47, %v352_v47  ;;  %v4043_v21 = vld [vmem:[%s3917_s11 + $0x58] sm:$0xff]  ;;  %v1063_v37 = vld [vmem:[%s3917_s11 + $0x70] sm:$0xff]  ;;  %v363_v39 = vld [vmem:[%s3906_s7 + $0x348] sm:$0xff] }
  0xbb   : > { %v620_v10 = vadd.f32 %v619_v59, %v472_v50  ;;  %v629_v17 = vadd.f32 %v479_v4, %v478_v3  ;;  %v482_v18 = vmul.f32 %v354_v48, %v354_v48  ;;  %v483_v19 = vmul.f32 %v355_v54, %v355_v54  ;;  %v364_v43 = vld [vmem:[%s3906_s7 + $0x350] sm:$0xff]  ;;  %v1068_v50 = vld [vmem:[%s3917_s11 + $0x98] sm:$0xff] }
  0xbc   : > { %v625_v16 = vadd.f32 %v624_v2, %v476_v60  ;;  %v481_v25 = vmul.f32 %v353_v53, %v353_v53  ;;  %v484_v26 = vmul.f32 %v356_v55, %v356_v55  ;;  %v2623_v27 = vpack.c.bf16 %v1054_v62, %v1050_v56  ;;  %v1066_v44 = vld [vmem:[%s3917_s11 + $0x88] sm:$0xff]  ;;  %v1072_v51 = vld [vmem:[%s3917_s11 + $0xb8] sm:$0xff]  ;;  %v1069_v56 = vld [vmem:[%s3917_s11 + $0xa0] sm:$0xff] }
  0xbd   : > { %v4046_v24 = vadd.f32 %v620_v10, %v473_v58  ;;  %602 = vadd.xlane.f32.xlu1 %v4013_v35  ;;  %v630_v32 = vadd.f32 %v629_v17, %v480_v12  ;;  %v485_v33 = vmul.f32 %v357_v61, %v357_v61  ;;  %v634_v34 = vadd.f32 %v483_v19, %v482_v18  ;;  %v1070_v35 = vld [vmem:[%s3917_s11 + $0xa8] sm:$0xff]  ;;  %v365_v55 = vld [vmem:[%s3906_s7 + $0x358] sm:$0xff] }
  0xbe   : > { %v2751_v36 = vpack.c.bf16 %v1056_v0, %v1052_v63  ;;  %607 = vadd.xlane.f32.xlu0 %v606_v49  ;;  %2624 = vmatprep.subr.bf16.mxu0 %v2623_v27  ;;  %v2625_v40 = vpack.c.bf16 %v1053_v6, %v1049_v5  ;;  %v2753_v41 = vpack.c.bf16 %v1055_v8, %v1051_v7  ;;  %v4062_v49 = vld [vmem:[%s3917_s11 + $0x80] sm:$0xff]  ;;  %v1067_v57 = vld [vmem:[%s3917_s11 + $0x90] sm:$0xff]  ;;  %v1078_v7 = vld [vmem:[%s3917_s11 + $0xe8] sm:$0xff] }
  0xbf   : > { %v486_v42 = vmul.f32 %v358_v13, %v358_v13  ;;  %v626_v45 = vadd.f32 %v625_v16, %v477_v11  ;;  %v635_v46 = vadd.f32 %v634_v34, %v484_v26  ;;  %v487_v47 = vmul.f32 %v359_v14, %v359_v14  ;;  %v1071_v58 = vld [vmem:[%s3917_s11 + $0xb0] sm:$0xff]  ;;  %v366_v63 = vld [vmem:[%s3906_s7 + $0x360] sm:$0xff]  ;;  %v367_v0 = vld [vmem:[%s3906_s7 + $0x368] sm:$0xff] }
  0xc0   : > { %2752 = vmatprep.subr.bf16.mxu1 %v2751_v36  ;;  %v488_v48 = vmul.f32 %v360_v15, %v360_v15  ;;  %v4064_v52 = vadd.f32 %v630_v32, %v481_v25  ;;  %2626 = vmatpush1.bf16.msra.mxu0 %v2625_v40  ;;  %v2627_v53 = vpack.c.bf16 %v1062_v22, %v1058_v20  ;;  %v368_v2 = vld [vmem:[%s3906_s7 + $0x370] sm:$0xff]  ;;  %v369_v6 = vld [vmem:[%s3906_s7 + $0x378] sm:$0xff]  ;;  %v4085_v15 = vld [vmem:[%s3917_s11 + $0xe0] sm:$0xff] }
  0xc1   : > { %2754 = vmatpush1.bf16.msra.mxu1 %v2753_v41  ;;  %v2755_v54 = vpack.c.bf16 %v1064_v23, %v4043_v21  ;;  %612 = vadd.xlane.f32.xlu1 %v4029_v1  ;;  %v489_v59 = vmul.f32 %v361_v28, %v361_v28  ;;  %v639_v60 = vadd.f32 %v487_v47, %v486_v42  ;;  %v1074_v1 = vld [vmem:[%s3917_s11 + $0xc8] sm:$0xff]  ;;  %v1076_v8 = vld [vmem:[%s3917_s11 + $0xd8] sm:$0xff]  ;;  %v4088_v16 = vld [vmem:[%s3917_s11 + $0xd0] sm:$0xff] }
  0xc2   : > { %v2629_v61 = vpack.c.bf16 %v1061_v30, %v1057_v29  ;;  %v2757_v62 = vpack.c.bf16 %v1063_v37, %v1059_v31  ;;  %617 = vadd.xlane.f32.xlu0 %v4035_v9  ;;  %2628 = vmatprep.subr.bf16.mxu0 %v2627_v53  ;;  %v490_v3 = vmul.f32 %v362_v38, %v362_v38  ;;  %v1080_v10 = vld [vmem:[%s3917_s11 + $0xf8] sm:$0xff]  ;;  %v4082_v9 = vld [vmem:[%s3917_s11 + $0xc0] sm:$0xff]  ;;  %v1079_v20 = vld [vmem:[%s3917_s11 + $0xf0] sm:$0xff] }
  0xc3   : > { %v491_v4 = vmul.f32 %v363_v39, %v363_v39  ;;  %v492_v5 = vmul.f32 %v364_v43, %v364_v43  ;;  %v636_v11 = vadd.f32 %v635_v46, %v485_v33  ;;  %v640_v12 = vadd.f32 %v639_v60, %v488_v48  ;;  %2756 = vmatprep.subr.bf16.mxu1 %v2755_v54  ;;  %v370_v22 = vld [vmem:[%s3906_s7 + $0x380] sm:$0xff]  ;;  %v371_v21 = vld [vmem:[%s3906_s7 + $0x388] sm:$0xff]  ;;  %v372_v27 = vld [vmem:[%s3906_s7 + $0x390] sm:$0xff] }
  0xc4   : > { %v2631_v13 = vpack.c.bf16 %v1070_v35, %v1066_v44  ;;  %v2759_v14 = vpack.c.bf16 %v1072_v51, %v1068_v50  ;;  %2630 = vmatpush1.bf16.msra.mxu0 %v2629_v61  ;;  %v2633_v18 = vpack.c.bf16 %v1069_v56, %v4062_v49  ;;  %v2761_v19 = vpack.c.bf16 %v1071_v58, %v1067_v57  ;;  %v1082_v28 = vld [vmem:[%s3917_s11 + $0x108] sm:$0xff]  ;;  %v373_v33 = vld [vmem:[%s3906_s7 + $0x398] sm:$0xff]  ;;  %v4102_v36 = vld [vmem:[%s3917_s11 + $0x100] sm:$0xff] }
  0xc5   : > { %2758 = vmatpush1.bf16.msra.mxu1 %v2757_v62  ;;  %v644_v17 = vadd.f32 %v491_v4, %v490_v3  ;;  %622 = vadd.xlane.f32.xlu1 %v4046_v24  ;;  %v493_v23 = vmul.f32 %v365_v55, %v365_v55  ;;  %v494_v25 = vmul.f32 %v366_v63, %v366_v63  ;;  %v1086_v29 = vld [vmem:[%s3917_s11 + $0x128] sm:$0xff]  ;;  %v1084_v34 = vld [vmem:[%s3917_s11 + $0x118] sm:$0xff]  ;;  %v4105_v41 = vld [vmem:[%s3917_s11 + $0x120] sm:$0xff] }
  0xc6   : > { %2632 = vmatprep.subr.bf16.mxu0 %v2631_v13  ;;  %v495_v26 = vmul.f32 %v367_v0, %v367_v0  ;;  %627 = vadd.xlane.f32.xlu0 %v626_v45  ;;  %v641_v30 = vadd.f32 %v640_v12, %v489_v59  ;;  %v496_v32 = vmul.f32 %v368_v2, %v368_v2  ;;  %v1088_v24 = vld [vmem:[%s3917_s11 + $0x138] sm:$0xff]  ;;  %v4108_v42 = vld [vmem:[%s3917_s11 + $0x110] sm:$0xff]  ;;  %v375_v47 = vld [vmem:[%s3906_s7 + $0x3a8] sm:$0xff] }
  0xc7   : > { %v645_v31 = vadd.f32 %v644_v17, %v492_v5  ;;  %2760 = vmatprep.subr.bf16.mxu1 %v2759_v14  ;;  %v497_v37 = vmul.f32 %v369_v6, %v369_v6  ;;  %v2635_v39 = vpack.c.bf16 %v1078_v7, %v1074_v1  ;;  %v2763_v40 = vpack.c.bf16 %v1080_v10, %v1076_v8  ;;  %v4111_v43 = vld [vmem:[%s3917_s11 + $0x130] sm:$0xff]  ;;  %v374_v46 = vld [vmem:[%s3906_s7 + $0x3a0] sm:$0xff]  ;;  %v1090_v54 = vld [vmem:[%s3917_s11 + $0x148] sm:$0xff] }
  0xc8   : > { %v649_v38 = vadd.f32 %v495_v26, %v494_v25  ;;  %2634 = vmatpush1.bf16.msra.mxu0 %v2633_v18  ;;  %v2637_v44 = vpack.c.bf16 %v4085_v15, %v4082_v9  ;;  %v2765_v35 = vpack.c.bf16 %v1079_v20, %v4088_v16  ;;  %v498_v45 = vmul.f32 %v370_v22, %v370_v22  ;;  %v376_v48 = vld [vmem:[%s3906_s7 + $0x3b0] sm:$0xff]  ;;  %v377_v53 = vld [vmem:[%s3906_s7 + $0x3b8] sm:$0xff]  ;;  %v1093_v2 = vld [vmem:[%s3917_s11 + $0x160] sm:$0xff] }
  0xc9   : > { %2762 = vmatpush1.bf16.msra.mxu1 %v2761_v19  ;;  %632 = vadd.xlane.f32.xlu1 %v4064_v52  ;;  %v499_v51 = vmul.f32 %v371_v21, %v371_v21  ;;  %v500_v49 = vmul.f32 %v372_v27, %v372_v27  ;;  %v1094_v55 = vld [vmem:[%s3917_s11 + $0x168] sm:$0xff]  ;;  %v646_v56 = vadd.f32 %v645_v31, %v493_v23  ;;  %v1092_v59 = vld [vmem:[%s3917_s11 + $0x158] sm:$0xff]  ;;  %v4126_v52 = vld [vmem:[%s3917_s11 + $0x140] sm:$0xff] }
  0xca   : > { %v650_v50 = vadd.f32 %v649_v38, %v496_v32  ;;  %2636 = vmatprep.subr.bf16.mxu0 %v2635_v39  ;;  %637 = vadd.xlane.f32.xlu0 %v636_v11  ;;  %v2639_v57 = vpack.c.bf16 %v1086_v29, %v1082_v28  ;;  %v2767_v58 = vpack.c.bf16 %v1088_v24, %v1084_v34  ;;  %v1096_v60 = vld [vmem:[%s3917_s11 + $0x178] sm:$0xff]  ;;  %v1091_v3 = vld [vmem:[%s3917_s11 + $0x150] sm:$0xff]  ;;  %v379_v8 = vld [vmem:[%s3906_s7 + $0x3c8] sm:$0xff] }
  0xcb   : > { %2764 = vmatprep.subr.bf16.mxu1 %v2763_v40  ;;  %v501_v61 = vmul.f32 %v373_v33, %v373_v33  ;;  %v654_v62 = vadd.f32 %v499_v51, %v498_v45  ;;  %v2641_v63 = vpack.c.bf16 %v4105_v41, %v4102_v36  ;;  %v2769_v0 = vpack.c.bf16 %v4111_v43, %v4108_v42  ;;  %v1095_v4 = vld [vmem:[%s3917_s11 + $0x170] sm:$0xff]  ;;  %v378_v7 = vld [vmem:[%s3906_s7 + $0x3c0] sm:$0xff]  ;;  %v1098_v9 = vld [vmem:[%s3917_s11 + $0x188] sm:$0xff] }
  0xcc   : > { %2638 = vmatpush1.bf16.msra.mxu0 %v2637_v44  ;;  %v502_v5 = vmul.f32 %v374_v46, %v374_v46  ;;  %v503_v6 = vmul.f32 %v375_v47, %v375_v47  ;;  %v504_v1 = vmul.f32 %v376_v48, %v376_v48  ;;  %v380_v10 = vld [vmem:[%s3906_s7 + $0x3d0] sm:$0xff]  ;;  %v651_v11 = vadd.f32 %v650_v50, %v497_v37  ;;  %v381_v14 = vld [vmem:[%s3906_s7 + $0x3d8] sm:$0xff]  ;;  %v1097_v22 = vld [vmem:[%s3917_s11 + $0x180] sm:$0xff] }
  0xcd   : > { %2766 = vmatpush1.bf16.msra.mxu1 %v2765_v35  ;;  %642 = vadd.xlane.f32.xlu1 %v641_v30  ;;  %v655_v12 = vadd.f32 %v654_v62, %v500_v49  ;;  %v2643_v13 = vpack.c.bf16 %v1094_v55, %v1090_v54  ;;  %v1102_v15 = vld [vmem:[%s3917_s11 + $0x1a8] sm:$0xff]  ;;  %v505_v16 = vmul.f32 %v377_v53, %v377_v53  ;;  %v1100_v19 = vld [vmem:[%s3917_s11 + $0x198] sm:$0xff]  ;;  %v1101_v27 = vld [vmem:[%s3917_s11 + $0x1a0] sm:$0xff] }
  0xce   : > { %2640 = vmatprep.subr.bf16.mxu0 %v2639_v57  ;;  %647 = vadd.xlane.f32.xlu0 %v646_v56  ;;  %v659_v17 = vadd.f32 %v503_v6, %v502_v5  ;;  %v2771_v18 = vpack.c.bf16 %v1096_v60, %v1092_v59  ;;  %v1104_v20 = vld [vmem:[%s3917_s11 + $0x1b8] sm:$0xff]  ;;  %v2645_v23 = vpack.c.bf16 %v1093_v2, %v4126_v52  ;;  %v1099_v28 = vld [vmem:[%s3917_s11 + $0x190] sm:$0xff]  ;;  %v383_v34 = vld [vmem:[%s3906_s7 + $0x3e8] sm:$0xff] }
  0xcf   : > { %2768 = vmatprep.subr.bf16.mxu1 %v2767_v58  ;;  %v656_v21 = vadd.f32 %v655_v12, %v501_v61  ;;  %v506_v25 = vmul.f32 %v378_v7, %v378_v7  ;;  %v507_v26 = vmul.f32 %v379_v8, %v379_v8  ;;  %v1103_v29 = vld [vmem:[%s3917_s11 + $0x1b0] sm:$0xff]  ;;  %v2773_v31 = vpack.c.bf16 %v1095_v4, %v1091_v3  ;;  %v382_v33 = vld [vmem:[%s3906_s7 + $0x3e0] sm:$0xff]  ;;  %v1106_v40 = vld [vmem:[%s3917_s11 + $0x1c8] sm:$0xff] }
  0xd0   : > { %2642 = vmatpush1.bf16.msra.mxu0 %v2641_v63  ;;  %v660_v30 = vadd.f32 %v659_v17, %v504_v1  ;;  %v508_v32 = vmul.f32 %v380_v10, %v380_v10  ;;  %v384_v24 = vld [vmem:[%s3906_s7 + $0x3f0] sm:$0xff]  ;;  %v509_v36 = vmul.f32 %v381_v14, %v381_v14  ;;  %v2647_v38 = vpack.c.bf16 %v1102_v15, %v1098_v9  ;;  %v385_v39 = vld [vmem:[%s3906_s7 + $0x3f8] sm:$0xff]  ;;  %v1105_v54 = vld [vmem:[%s3917_s11 + $0x1c0] sm:$0xff] }
  0xd1   : > { %2770 = vmatpush1.bf16.msra.mxu1 %v2769_v0  ;;  %652 = vadd.xlane.f32.xlu1 %v651_v11  ;;  %v664_v37 = vadd.f32 %v507_v26, %v506_v25  ;;  %v1110_v41 = vld [vmem:[%s3917_s11 + $0x1e8] sm:$0xff]  ;;  %v2775_v43 = vpack.c.bf16 %v1104_v20, %v1100_v19  ;;  %v2649_v44 = vpack.c.bf16 %v1101_v27, %v1097_v22  ;;  %v1108_v35 = vld [vmem:[%s3917_s11 + $0x1d8] sm:$0xff]  ;;  %v1109_v55 = vld [vmem:[%s3917_s11 + $0x1e0] sm:$0xff] }
  0xd2   : > { %2644 = vmatprep.subr.bf16.mxu0 %v2643_v13  ;;  %657 = vadd.xlane.f32.xlu0 %v656_v21  ;;  %v661_v42 = vadd.f32 %v660_v30, %v505_v16  ;;  %v1112_v45 = vld [vmem:[%s3917_s11 + $0x1f8] sm:$0xff]  ;;  %v510_v47 = vmul.f32 %v382_v33, %v382_v33  ;;  %v511_v48 = vmul.f32 %v383_v34, %v383_v34  ;;  %v1107_v59 = vld [vmem:[%s3917_s11 + $0x1d0] sm:$0xff]  ;;  %v1114_v52 = vld [vmem:[%s3917_s11 + $0x208] sm:$0xff] }
  0xd3   : > { %2772 = vmatprep.subr.bf16.mxu1 %v2771_v18  ;;  %v665_v46 = vadd.f32 %v664_v37, %v508_v32  ;;  %v512_v50 = vmul.f32 %v384_v24, %v384_v24  ;;  %v2777_v51 = vpack.c.bf16 %v1103_v29, %v1099_v28  ;;  %v513_v49 = vmul.f32 %v385_v39, %v385_v39  ;;  %v1111_v60 = vld [vmem:[%s3917_s11 + $0x1f0] sm:$0xff]  ;;  %v1118_v61 = vld [vmem:[%s3917_s11 + $0x228] sm:$0xff]  ;;  %v1116_v62 = vld [vmem:[%s3917_s11 + $0x218] sm:$0xff] }
  0xd4   : > { %2646 = vmatpush1.bf16.msra.mxu0 %v2645_v23  ;;  %v2651_v53 = vpack.c.bf16 %v1110_v41, %v1106_v40  ;;  %v669_v57 = vadd.f32 %v511_v48, %v510_v47  ;;  %v2779_v58 = vpack.c.bf16 %v1112_v45, %v1108_v35  ;;  %v1120_v63 = vld [vmem:[%s3917_s11 + $0x238] sm:$0xff]  ;;  %v2653_v2 = vpack.c.bf16 %v1109_v55, %v1105_v54  ;;  %v1113_v4 = vld [vmem:[%s3917_s11 + $0x200] sm:$0xff]  ;;  %v1115_v8 = vld [vmem:[%s3917_s11 + $0x210] sm:$0xff] }
  0xd5   : > { %2774 = vmatpush1.bf16.msra.mxu1 %v2773_v31  ;;  %662 = vadd.xlane.f32.xlu1 %v661_v42  ;;  %v666_v56 = vadd.f32 %v665_v46, %v509_v36  ;;  %v2781_v3 = vpack.c.bf16 %v1111_v60, %v1107_v59  ;;  %v1117_v5 = vld [vmem:[%s3917_s11 + $0x220] sm:$0xff]  ;;  %v2655_v1 = vpack.c.bf16 %v1118_v61, %v1114_v52  ;;  %v1119_v10 = vld [vmem:[%s3917_s11 + $0x230] sm:$0xff]  ;;  %v1122_v11 = vld [vmem:[%s3917_s11 + $0x248] sm:$0xff]  ;;  %v901_v18 = vlaneseq }
  0xd6   : > { %2648 = vmatprep.subr.bf16.mxu0 %v2647_v38  ;;  %2776 = vmatprep.subr.bf16.mxu1 %v2775_v43  ;;  %v670_v0 = vadd.f32 %v669_v57, %v512_v50  ;;  %v2783_v7 = vpack.c.bf16 %v1120_v63, %v1116_v62  ;;  %v1126_v12 = vld [vmem:[%s3917_s11 + $0x268] sm:$0xff]  ;;  %v1124_v13 = vld [vmem:[%s3917_s11 + $0x258] sm:$0xff]  ;;  %v2657_v9 = vpack.c.bf16 %v1117_v5, %v1113_v4  ;;  %v1121_v16 = vld [vmem:[%s3917_s11 + $0x240] sm:$0xff] }
  0xd7   : > { %667 = vadd.xlane.f32.xlu0 %v666_v56  ;;  %v1128_v14 = vld [vmem:[%s3917_s11 + $0x278] sm:$0xff]  ;;  %v2785_v15 = vpack.c.bf16 %v1119_v10, %v1115_v8  ;;  %v1125_v17 = vld [vmem:[%s3917_s11 + $0x260] sm:$0xff]  ;;  %v2659_v19 = vpack.c.bf16 %v1126_v12, %v1122_v11  ;;  %v1123_v22 = vld [vmem:[%s3917_s11 + $0x250] sm:$0xff]  ;;  %v4182_v32 = vshrl.u32 %v901_v18, 7 }
  0xd8   : > { %2650 = vmatpush1.bf16.msra.mxu0 %v2649_v44  ;;  %v671_v6 = vadd.f32 %v670_v0, %v513_v49  ;;  %v2787_v20 = vpack.c.bf16 %v1128_v14, %v1124_v13  ;;  %v1127_v21 = vld [vmem:[%s3917_s11 + $0x270] sm:$0xff]  ;;  %v1130_v23 = vld [vmem:[%s3917_s11 + $0x288] sm:$0xff]  ;;  %v1132_v26 = vld [vmem:[%s3917_s11 + $0x298] sm:$0xff]  ;;  %v2661_v28 = vpack.c.bf16 %v1125_v17, %v1121_v16 }
  0xd9   : > { %2778 = vmatpush1.bf16.msra.mxu1 %v2777_v51  ;;  %2652 = vmatprep.subr.bf16.mxu0 %v2651_v53  ;;  %v1134_v25 = vld [vmem:[%s3917_s11 + $0x2a8] sm:$0xff]  ;;  %v1136_v27 = vld [vmem:[%s3917_s11 + $0x2b8] sm:$0xff]  ;;  %v2789_v29 = vpack.c.bf16 %v1127_v21, %v1123_v22  ;;  %v1129_v30 = vld [vmem:[%s3917_s11 + $0x280] sm:$0xff]  ;;  %v911_v35 = vsub.s32 2, %v4182_v32  ;;  %v915_v51 = vsub.s32 3, %v4182_v32 }
  0xda   : > { %2780 = vmatprep.subr.bf16.mxu1 %v2779_v58  ;;  %672 = vadd.xlane.f32.xlu1 %v671_v6  ;;  %v1133_v31 = vld [vmem:[%s3917_s11 + $0x2a0] sm:$0xff]  ;;  %v2663_v33 = vpack.c.bf16 %v1134_v25, %v1130_v23  ;;  %v2791_v34 = vpack.c.bf16 %v1136_v27, %v1132_v26  ;;  %v1131_v24 = vld [vmem:[%s3917_s11 + $0x290] sm:$0xff]  ;;  %v1138_v37 = vld [vmem:[%s3917_s11 + $0x2c8] sm:$0xff] }
  0xdb   : > { %v1135_v36 = vld [vmem:[%s3917_s11 + $0x2b0] sm:$0xff]  ;;  %v1142_v38 = vld [vmem:[%s3917_s11 + $0x2e8] sm:$0xff]  ;;  %v1140_v39 = vld [vmem:[%s3917_s11 + $0x2d8] sm:$0xff]  ;;  %v2665_v41 = vpack.c.bf16 %v1133_v31, %v1129_v30 }
  0xdc   : > { %2654 = vmatpush1.bf16.msra.mxu0 %v2653_v2  ;;  %v1144_v40 = vld [vmem:[%s3917_s11 + $0x2f8] sm:$0xff]  ;;  %v2793_v42 = vpack.c.bf16 %v1135_v36, %v1131_v24  ;;  %v1137_v43 = vld [vmem:[%s3917_s11 + $0x2c0] sm:$0xff]  ;;  %v2667_v45 = vpack.c.bf16 %v1142_v38, %v1138_v37  ;;  %v1139_v47 = vld [vmem:[%s3917_s11 + $0x2d0] sm:$0xff] }
  0xdd   : > { %2782 = vmatpush1.bf16.msra.mxu1 %v2781_v3  ;;  %2656 = vmatprep.subr.bf16.mxu0 %v2655_v1  ;;  %v1141_v44 = vld [vmem:[%s3917_s11 + $0x2e0] sm:$0xff]  ;;  %v2795_v46 = vpack.c.bf16 %v1144_v40, %v1140_v39  ;;  %v1143_v48 = vld [vmem:[%s3917_s11 + $0x2f0] sm:$0xff]  ;;  %v1146_v50 = vld [vmem:[%s3917_s11 + $0x308] sm:$0xff] }
  0xde   : > { %2784 = vmatprep.subr.bf16.mxu1 %v2783_v7  ;;  %v1150_v49 = vld [vmem:[%s3917_s11 + $0x328] sm:$0xff]  ;;  %v1148_v53 = vld [vmem:[%s3917_s11 + $0x318] sm:$0xff]  ;;  %v2669_v56 = vpack.c.bf16 %v1141_v44, %v1137_v43  ;;  %v2797_v57 = vpack.c.bf16 %v1143_v48, %v1139_v47  ;;  %v1145_v58 = vld [vmem:[%s3917_s11 + $0x300] sm:$0xff] }
  0xdf   : > { %v1152_v54 = vld [vmem:[%s3917_s11 + $0x338] sm:$0xff]  ;;  %v1149_v59 = vld [vmem:[%s3917_s11 + $0x320] sm:$0xff]  ;;  %v2671_v52 = vpack.c.bf16 %v1150_v49, %v1146_v50  ;;  %v1147_v62 = vld [vmem:[%s3917_s11 + $0x310] sm:$0xff] }
  0xe0   : > { %2658 = vmatpush1.bf16.msra.mxu0 %v2657_v9  ;;  %v4200_v55 = vld [vmem:[#allocation5] sm:$0xf]  ;;  %v2799_v61 = vpack.c.bf16 %v1152_v54, %v1148_v53  ;;  %v1151_v63 = vld [vmem:[%s3917_s11 + $0x330] sm:$0xff]  ;;  %v1154_v0 = vld [vmem:[%s3917_s11 + $0x348] sm:$0xff]  ;;  %v2673_v6 = vpack.c.bf16 %v1149_v59, %v1145_v58 }
  0xe1   : > { %2786 = vmatpush1.bf16.msra.mxu1 %v2785_v15  ;;  %2660 = vmatprep.subr.bf16.mxu0 %v2659_v19  ;;  %v4205_v60 = vrot.slane %v4200_v55, %v911_v35  ;;  %v4211_v2 = vrot.slane %v4200_v55, %v915_v51  ;;  %v1158_v3 = vld [vmem:[%s3917_s11 + $0x368] sm:$0xff]  ;;  %v1156_v4 = vld [vmem:[%s3917_s11 + $0x358] sm:$0xff]  ;;  %v2801_v1 = vpack.c.bf16 %v1151_v63, %v1147_v62  ;;  %v1153_v7 = vld [vmem:[%s3917_s11 + $0x340] sm:$0xff]  ;;  %v907_v62 = vsub.s32 1, %v4182_v32 }
  0xe2   : > { %2788 = vmatprep.subr.bf16.mxu1 %v2787_v20  ;;  %v1160_v5 = vld [vmem:[%s3917_s11 + $0x378] sm:$0xff]  ;;  %v1157_v8 = vld [vmem:[%s3917_s11 + $0x360] sm:$0xff]  ;;  %v2675_v10 = vpack.c.bf16 %v1158_v3, %v1154_v0  ;;  %v1155_v12 = vld [vmem:[%s3917_s11 + $0x350] sm:$0xff]  ;;  %v903_v63 = vsub.s32 0, %v4182_v32 }
  0xe3   : > { %v2803_v11 = vpack.c.bf16 %v1160_v5, %v1156_v4  ;;  %v1159_v13 = vld [vmem:[%s3917_s11 + $0x370] sm:$0xff]  ;;  %v1162_v14 = vld [vmem:[%s3917_s11 + $0x388] sm:$0xff]  ;;  %v1164_v15 = vld [vmem:[%s3917_s11 + $0x398] sm:$0xff]  ;;  %v2677_v17 = vpack.c.bf16 %v1157_v8, %v1153_v7  ;;  %v4243_v7 = vrot.slane %v4200_v55, %v907_v62 }
  0xe4   : > { %2662 = vmatpush1.bf16.msra.mxu0 %v2661_v28  ;;  %v1166_v9 = vld [vmem:[%s3917_s11 + $0x3a8] sm:$0xff]  ;;  %v1168_v16 = vld [vmem:[%s3917_s11 + $0x3b8] sm:$0xff]  ;;  %v2805_v18 = vpack.c.bf16 %v1159_v13, %v1155_v12  ;;  %v1161_v19 = vld [vmem:[%s3917_s11 + $0x380] sm:$0xff]  ;;  %v4246_v8 = vrot.slane %v4200_v55, %v903_v63 }
  0xe5   : > { %2790 = vmatpush1.bf16.msra.mxu1 %v2789_v29  ;;  %2664 = vmatprep.subr.bf16.mxu0 %v2663_v33  ;;  %v1165_v20 = vld [vmem:[%s3917_s11 + $0x3a0] sm:$0xff]  ;;  %v2679_v22 = vpack.c.bf16 %v1166_v9, %v1162_v14  ;;  %v2807_v21 = vpack.c.bf16 %v1168_v16, %v1164_v15  ;;  %v1163_v23 = vld [vmem:[%s3917_s11 + $0x390] sm:$0xff]  ;;  %v1170_v26 = vld [vmem:[%s3917_s11 + $0x3c8] sm:$0xff] }
  0xe6   : > { %2792 = vmatprep.subr.bf16.mxu1 %v2791_v34  ;;  %v1167_v25 = vld [vmem:[%s3917_s11 + $0x3b0] sm:$0xff]  ;;  %v1174_v27 = vld [vmem:[%s3917_s11 + $0x3e8] sm:$0xff]  ;;  %v1172_v28 = vld [vmem:[%s3917_s11 + $0x3d8] sm:$0xff]  ;;  %v2681_v30 = vpack.c.bf16 %v1165_v20, %v1161_v19 }
  0xe7   : > { %v1176_v29 = vld [vmem:[%s3917_s11 + $0x3f8] sm:$0xff]  ;;  %v2809_v31 = vpack.c.bf16 %v1167_v25, %v1163_v23  ;;  %v1169_v33 = vld [vmem:[%s3917_s11 + $0x3c0] sm:$0xff]  ;;  %v2683_v24 = vpack.c.bf16 %v1174_v27, %v1170_v26  ;;  %v1171_v37 = vld [vmem:[%s3917_s11 + $0x3d0] sm:$0xff] }
  0xe8   : > { %2666 = vmatpush1.bf16.msra.mxu0 %v2665_v41  ;;  %v1173_v34 = vld [vmem:[%s3917_s11 + $0x3e0] sm:$0xff]  ;;  %v2811_v36 = vpack.c.bf16 %v1176_v29, %v1172_v28  ;;  %v1175_v38 = vld [vmem:[%s3917_s11 + $0x3f0] sm:$0xff]  ;;  %v1178_v39 = vld [vmem:[%s3917_s11 + $0x408] sm:$0xff] }
  0xe9   : > { %2794 = vmatpush1.bf16.msra.mxu1 %v2793_v42  ;;  %2668 = vmatprep.subr.bf16.mxu0 %v2667_v45  ;;  %v1182_v40 = vld [vmem:[%s3917_s11 + $0x428] sm:$0xff]  ;;  %v1180_v41 = vld [vmem:[%s3917_s11 + $0x418] sm:$0xff]  ;;  %v2685_v43 = vpack.c.bf16 %v1173_v34, %v1169_v33  ;;  %v2813_v44 = vpack.c.bf16 %v1175_v38, %v1171_v37  ;;  %v1177_v32 = vld [vmem:[%s3917_s11 + $0x400] sm:$0xff] }
  0xea   : > { %2796 = vmatprep.subr.bf16.mxu1 %v2795_v46  ;;  %v1184_v42 = vld [vmem:[%s3917_s11 + $0x438] sm:$0xff]  ;;  %v2687_v35 = vpack.c.bf16 %v1182_v40, %v1178_v39  ;;  %v1179_v12 = vld [vmem:[%s3917_s11 + $0x410] sm:$0xff]  ;;  %v1186_v9 = vld [vmem:[%s3917_s11 + $0x448] sm:$0xff] }
  0xeb   : > { %v2815_v45 = vpack.c.bf16 %v1184_v42, %v1180_v41  ;;  %v1183_v13 = vld [vmem:[%s3917_s11 + $0x430] sm:$0xff]  ;;  %v3219_v15 = vld [vmem:[%s3906_s7 + $0x8] sm:$0xff]  ;;  %v1188_v20 = vld [vmem:[%s3917_s11 + $0x458] sm:$0xff] }
  0xec   : > { %2670 = vmatpush1.bf16.msra.mxu0 %v2669_v56  ;;  %v1190_v19 = vld [vmem:[%s3917_s11 + $0x468] sm:$0xff]  ;;  %v1192_v55 = vld [vmem:[%s3917_s11 + $0x478] sm:$0xff]  ;;  %v2817_v29 = vpack.c.bf16 %v1183_v13, %v1179_v12  ;;  %v1189_v37 = vld [vmem:[%s3917_s11 + $0x460] sm:$0xff] }
  0xed   : > { %2798 = vmatpush1.bf16.msra.mxu1 %v2797_v57  ;;  %2672 = vmatprep.subr.bf16.mxu0 %v2671_v52  ;;  %v2691_v34 = vpack.c.bf16 %v1190_v19, %v1186_v9  ;;  %v3222_v38 = vld [vmem:[%s3906_s7 + $0x28] sm:$0xff]  ;;  %v3223_v40 = vld [vmem:[%s3906_s7 + $0x20] sm:$0xff]  ;;  %v1187_v42 = vld [vmem:[%s3917_s11 + $0x450] sm:$0xff] }
  0xee   : > { %2800 = vmatprep.subr.bf16.mxu1 %v2799_v61  ;;  %v1193_v63 = vld [vmem:[%s3917_s11 + $0x480] sm:$0xff] }
  0xef   : > { %v3226_v12 = vld [vmem:[%s3906_s7 + $0x60] sm:$0xff]  ;;  %v3227_v19 = vld [vmem:[%s3906_s7 + $0x88] sm:$0xff] }
  0xf0   : > { %2674 = vmatpush1.bf16.msra.mxu0 %v2673_v6 }
  0xf1   : > { %2802 = vmatpush1.bf16.msra.mxu1 %v2801_v1  ;;  %2676 = vmatprep.subr.bf16.mxu0 %v2675_v10  ;;  %v1181_v10 = vld [vmem:[%s3917_s11 + $0x420] sm:$0xff] }
  0xf2   : > { %2804 = vmatprep.subr.bf16.mxu1 %v2803_v11  ;;  %v2689_v28 = vpack.c.bf16 %v1181_v10, %v1177_v32  ;;  %v1202_v32 = vld [vmem:[%s3917_s11 + $0x4c8] sm:$0xff] }
  0xf4   : > { %2678 = vmatpush1.bf16.msra.mxu0 %v2677_v17  ;;  %v3220_v17 = vld [vmem:[%s3906_s7] sm:$0xff] }
  0xf5   : > { %2806 = vmatpush1.bf16.msra.mxu1 %v2805_v18  ;;  %2680 = vmatprep.subr.bf16.mxu0 %v2679_v22 }
  0xf6   : > { %2808 = vmatprep.subr.bf16.mxu1 %v2807_v21 }
  0xf8   : > { %2682 = vmatpush1.bf16.msra.mxu0 %v2681_v30 }
  0xf9   : > { %2810 = vmatpush1.bf16.msra.mxu1 %v2809_v31  ;;  %2684 = vmatprep.subr.bf16.mxu0 %v2683_v24  ;;  %v3221_v31 = vld [vmem:[%s3906_s7 + $0x48] sm:$0xff]  ;;  %v2819_v24 = vpack.c.bf16 %v1192_v55, %v1188_v20 }
  0xfa   : > { %2812 = vmatprep.subr.bf16.mxu1 %v2811_v36  ;;  %v1185_v36 = vld [vmem:[%s3917_s11 + $0x440] sm:$0xff] }
  0xfc   : > { %2686 = vmatpush1.bf16.msra.mxu0 %v2685_v43  ;;  %v1191_v43 = vld [vmem:[%s3917_s11 + $0x470] sm:$0xff] }
  0xfd   : > { %2814 = vmatpush1.bf16.msra.mxu1 %v2813_v44  ;;  %2688 = vmatprep.subr.bf16.mxu0 %v2687_v35  ;;  %v1194_v35 = vld [vmem:[%s3917_s11 + $0x488] sm:$0xff] }
  0xfe   : > { %2816 = vmatprep.subr.bf16.mxu1 %v2815_v45 }
 0x127   : > { %v518_v46 = vpop.xlane.xlu0 %517 }
 0x128   : > { %v675_v47 = vmul.f32 0.001953125, %v518_v46  ;;  %v3224_v46 = vld [vmem:[%s3906_s7 + $0x40] sm:$0xff] }
 0x12a   : > { %v707_v48 = vadd.f32 1e-06, %v675_v47  ;;  %v528_v50 = vpop.xlane.xlu1 %527 }
 0x12b   : > { %v523_v51 = vpop.xlane.xlu0 %522  ;;  %v677_v49 = vmul.f32 0.001953125, %v528_v50  ;;  %v1196_v50 = vld [vmem:[%s3917_s11 + $0x498] sm:$0xff] }
 0x12c   : > { %3155 = vrsqrt.f32 %v707_v48  ;;  %v676_v53 = vmul.f32 0.001953125, %v523_v51  ;;  %v1198_v48 = vld [vmem:[%s3917_s11 + $0x4a8] sm:$0xff]  ;;  %v1200_v51 = vld [vmem:[%s3917_s11 + $0x4b8] sm:$0xff] }
 0x12d   : > { %v709_v54 = vadd.f32 1e-06, %v677_v49 }
 0x12e   : > { %v708_v56 = vadd.f32 1e-06, %v676_v53  ;;  %v533_v57 = vpop.xlane.xlu1 %532 }
 0x12f   : > { %3157 = vrsqrt.f32 %v709_v54  ;;  %v678_v58 = vmul.f32 0.001953125, %v533_v57  ;;  %v538_v59 = vpop.xlane.xlu0 %537 }
 0x130   : > { %3159 = vrsqrt.f32 %v708_v56  ;;  %v679_v52 = vmul.f32 0.001953125, %v538_v59  ;;  %v2693_v59 = vpack.c.bf16 %v1189_v37, %v1185_v36  ;;  %v3228_v37 = vld [vmem:[%s3906_s7 + $0x80] sm:$0xff] }
 0x131   : > { %v710_v61 = vadd.f32 1e-06, %v678_v58 }
 0x132   : > { %v711_v0 = vadd.f32 1e-06, %v679_v52  ;;  %v543_v3 = vpop.xlane.xlu1 %542  ;;  %v2821_v52 = vpack.c.bf16 %v1191_v43, %v1187_v42  ;;  %v3229_v43 = vld [vmem:[%s3906_s7 + $0xa8] sm:$0xff] }
 0x133   : > { %3161 = vrsqrt.f32 %v710_v61  ;;  %v680_v4 = vmul.f32 0.001953125, %v543_v3  ;;  %v548_v5 = vpop.xlane.xlu0 %547  ;;  %v3225_v61 = vld [vmem:[%s3906_s7 + $0x68] sm:$0xff] }
 0x134   : > { %3163 = vrsqrt.f32 %v711_v0  ;;  %v681_v6 = vmul.f32 0.001953125, %v548_v5  ;;  %v1197_v0 = vld [vmem:[%s3917_s11 + $0x4a0] sm:$0xff]  ;;  %v2823_v5 = vpack.c.bf16 %v1200_v51, %v1196_v50 }
 0x135   : > { %v712_v1 = vadd.f32 1e-06, %v680_v4  ;;  %v2695_v4 = vpack.c.bf16 %v1198_v48, %v1194_v35  ;;  %v1209_v48 = vld [vmem:[%s3917_s11 + $0x500] sm:$0xff] }
 0x136   : > { %v4250_v11 = vpop.eup %3155  ;;  %v553_v14 = vpop.xlane.xlu1 %552  ;;  %v713_v22 = vadd.f32 1e-06, %v681_v6  ;;  %v1195_v6 = vld [vmem:[%s3917_s11 + $0x490] sm:$0xff]  ;;  %v1213_v50 = vld [vmem:[%s3917_s11 + $0x520] sm:$0xff] }
 0x137   : > { %v772_v16 = vmul.f32 %v3219_v15, %v4250_v11  ;;  %v771_v18 = vmul.f32 %v3220_v17, %v4250_v11  ;;  %3165 = vrsqrt.f32 %v712_v1  ;;  %v682_v21 = vmul.f32 0.001953125, %v553_v14  ;;  %v558_v23 = vpop.xlane.xlu0 %557  ;;  %v1199_v1 = vld [vmem:[%s3917_s11 + $0x4b0] sm:$0xff]  ;;  %v1206_v15 = vld [vmem:[%s3917_s11 + $0x4e8] sm:$0xff]  ;;  %v1208_v17 = vld [vmem:[%s3917_s11 + $0x4f8] sm:$0xff] }
 0x138   : > { %v683_v44 = vmul.f32 0.001953125, %v558_v23  ;;  %3167 = vrsqrt.f32 %v713_v22  ;;  %v2697_v22 = vpack.c.bf16 %v1197_v0, %v1193_v63  ;;  %v1201_v23 = vld [vmem:[%s3917_s11 + $0x4c0] sm:$0xff] }
 0x139   : > { %v4262_v25 = vpop.eup %3157  ;;  %v922_v26 = vmul.f32 %v4243_v7, %v772_v16  ;;  %v921_v27 = vmul.f32 %v4246_v8, %v771_v18  ;;  %v714_v45 = vadd.f32 1e-06, %v682_v21  ;;  %v1204_v16 = vld [vmem:[%s3917_s11 + $0x4d8] sm:$0xff]  ;;  %v2825_v21 = vpack.c.bf16 %v1199_v1, %v1195_v6  ;;  %v3231_v1 = vld [vmem:[%s3906_s7 + $0xc8] sm:$0xff] }
 0x13a   : > { %v4266_v30 = vpop.eup %3159  ;;  %v780_v33 = vmul.f32 %v3221_v31, %v4262_v25  ;;  %v779_v47 = vmul.f32 %v3224_v46, %v4262_v25  ;;  %v563_v57 = vpop.xlane.xlu1 %562  ;;  %v715_v3 = vadd.f32 1e-06, %v683_v44  ;;  %v1203_v31 = vld [vmem:[%s3917_s11 + $0x4d0] sm:$0xff] }
 0x13b   : > { %1369 = vmatprep.mubr.f32.mxu0 %v922_v26  ;;  %1883 = vmatprep.mubr.f32.mxu1 %v922_v26  ;;  %v776_v39 = vmul.f32 %v3222_v38, %v4266_v30  ;;  %v775_v41 = vmul.f32 %v3223_v40, %v4266_v30  ;;  %3169 = vrsqrt.f32 %v714_v45  ;;  %v684_v14 = vmul.f32 0.001953125, %v563_v57  ;;  %v568_v9 = vpop.xlane.xlu0 %567  ;;  %v1205_v26 = vld [vmem:[%s3917_s11 + $0x4e0] sm:$0xff]  ;;  %v1212_v40 = vld [vmem:[%s3917_s11 + $0x518] sm:$0xff]  ;;  %v1215_v57 = vld [vmem:[%s3917_s11 + $0x530] sm:$0xff] }
 0x13c   : > { %1370 = vmatmul.mubr.f32.vlgmr.msra.gmra.mrb[0].mxu0 %v921_v27  ;;  %1884 = vmatmul.mubr.f32.vlgmr.msra.gmra.mrb[0].mxu1 %v921_v27  ;;  %v930_v56 = vmul.f32 %v4243_v7, %v780_v33  ;;  %v929_v10 = vmul.f32 %v4246_v8, %v779_v47  ;;  %v685_v27 = vmul.f32 0.001953125, %v568_v9  ;;  %v1207_v33 = vld [vmem:[%s3917_s11 + $0x4f0] sm:$0xff]  ;;  %3171 = vrsqrt.f32 %v715_v3  ;;  %v1222_v3 = vld [vmem:[%s3917_s11 + $0x568] sm:$0xff]  ;;  %v1221_v9 = vld [vmem:[%s3917_s11 + $0x560] sm:$0xff] }
 0x13d   : > { %v4284_v49 = vpop.eup %3161  ;;  %2690 = vmatpush1.bf16.msra.mxu0 %v2689_v28  ;;  %2818 = vmatpush1.bf16.msra.mxu1 %v2817_v29  ;;  %v926_v53 = vmul.f32 %v4243_v7, %v776_v39  ;;  %v925_v54 = vmul.f32 %v4246_v8, %v775_v41  ;;  %v2699_v28 = vpack.c.bf16 %v1206_v15, %v1202_v32  ;;  %v716_v36 = vadd.f32 1e-06, %v684_v14  ;;  %v1214_v39 = vld [vmem:[%s3917_s11 + $0x528] sm:$0xff]  ;;  %v1216_v41 = vld [vmem:[%s3917_s11 + $0x538] sm:$0xff]  ;;  %v1217_v14 = vld [vmem:[%s3917_s11 + $0x540] sm:$0xff] }
 0x13e   : > { %v4289_v58 = vpop.eup %3163  ;;  %2692 = vmatprep.subr.bf16.mxu0 %v2691_v34  ;;  %2820 = vmatprep.subr.bf16.mxu1 %v2819_v24  ;;  %v784_v62 = vmul.f32 %v3225_v61, %v4284_v49  ;;  %v783_v13 = vmul.f32 %v3226_v12, %v4284_v49  ;;  %v2827_v29 = vpack.c.bf16 %v1208_v17, %v1204_v16  ;;  %v1210_v34 = vld [vmem:[%s3917_s11 + $0x508] sm:$0xff]  ;;  %v573_v35 = vpop.xlane.xlu1 %572  ;;  %v717_v51 = vadd.f32 1e-06, %v685_v27  ;;  %v3230_v61 = vld [vmem:[%s3906_s7 + $0xa0] sm:$0xff] }
 0x13f   : > { %1375 = vmatprep.mubr.f32.mxu0 %v926_v53  ;;  %1889 = vmatprep.mubr.f32.mxu1 %v926_v53  ;;  %v788_v20 = vmul.f32 %v3227_v19, %v4289_v58  ;;  %v787_v38 = vmul.f32 %v3228_v37, %v4289_v58  ;;  %v2701_v46 = vpack.c.bf16 %v1205_v26, %v1201_v23  ;;  %3173 = vrsqrt.f32 %v716_v36  ;;  %v578_v0 = vpop.xlane.xlu0 %577  ;;  %v1223_v19 = vld [vmem:[%s3917_s11 + $0x570] sm:$0xff]  ;;  %v3232_v23 = vld [vmem:[%s3906_s7 + $0xc0] sm:$0xff]  ;;  %v1230_v27 = vld [vmem:[%s3917_s11 + $0x5a8] sm:$0xff] }
 0x140   : > { %1376 = vmatmul.mubr.f32.gmra.mrb[2].mxu0 %v925_v54  ;;  %1890 = vmatmul.mubr.f32.gmra.mrb[2].mxu1 %v925_v54  ;;  %v934_v18 = vmul.f32 %v4243_v7, %v784_v62  ;;  %v933_v24 = vmul.f32 %v4246_v8, %v783_v13  ;;  %v2829_v47 = vpack.c.bf16 %v1207_v33, %v1203_v31  ;;  %v686_v63 = vmul.f32 0.001953125, %v573_v35  ;;  %v3233_v33 = vld [vmem:[%s3906_s7 + $0xe8] sm:$0xff]  ;;  %v1231_v35 = vld [vmem:[%s3917_s11 + $0x5b0] sm:$0xff] }
 0x141   : > { %1381 = vmatprep.mubr.f32.mxu0 %v930_v56  ;;  %1895 = vmatprep.mubr.f32.mxu1 %v930_v56  ;;  %v4307_v55 = vpop.eup %3165  ;;  %v938_v42 = vmul.f32 %v4243_v7, %v788_v20  ;;  %v2703_v53 = vpack.c.bf16 %v1214_v39, %v1210_v34  ;;  %v2831_v54 = vpack.c.bf16 %v1216_v41, %v1212_v40  ;;  %v1211_v56 = vld [vmem:[%s3917_s11 + $0x510] sm:$0xff]  ;;  %v687_v15 = vmul.f32 0.001953125, %v578_v0  ;;  %v1226_v20 = vld [vmem:[%s3917_s11 + $0x588] sm:$0xff]  ;;  %v1225_v39 = vld [vmem:[%s3917_s11 + $0x580] sm:$0xff] }
 0x142   : > { %2694 = vmatpush1.bf16.msra.mxu0 %v2693_v59  ;;  %2822 = vmatpush1.bf16.msra.mxu1 %v2821_v52  ;;  %v792_v44 = vmul.f32 %v3229_v43, %v4307_v55  ;;  %v4323_v45 = vpop.eup %3167  ;;  %v1218_v59 = vld [vmem:[%s3917_s11 + $0x548] sm:$0xff]  ;;  %v937_v52 = vmul.f32 %v4246_v8, %v787_v38  ;;  %v791_v62 = vmul.f32 %v3230_v61, %v4307_v55  ;;  %3175 = vrsqrt.f32 %v717_v51  ;;  %v1229_v40 = vld [vmem:[%s3917_s11 + $0x5a0] sm:$0xff] }
 0x143   : > { %2696 = vmatprep.subr.bf16.mxu0 %v2695_v4  ;;  %2824 = vmatprep.subr.bf16.mxu1 %v2823_v5  ;;  %v1220_v4 = vld [vmem:[%s3917_s11 + $0x558] sm:$0xff]  ;;  %v796_v32 = vmul.f32 %v3231_v1, %v4323_v45  ;;  %v2705_v12 = vpack.c.bf16 %v1213_v50, %v1209_v48  ;;  %v2833_v13 = vpack.c.bf16 %v1215_v57, %v1211_v56  ;;  %v719_v41 = vadd.f32 1e-06, %v687_v15 }
 0x144   : > { %1382 = vmatmul.mubr.f32.gmra.mrb[4].mxu0 %v929_v10  ;;  %1896 = vmatmul.mubr.f32.gmra.mrb[4].mxu1 %v929_v10  ;;  %v1224_v5 = vld [vmem:[%s3917_s11 + $0x578] sm:$0xff]  ;;  %v942_v6 = vmul.f32 %v4243_v7, %v792_v44  ;;  %v2707_v16 = vpack.c.bf16 %v1222_v3, %v1218_v59  ;;  %v795_v26 = vmul.f32 %v3232_v23, %v4323_v45  ;;  %v1227_v44 = vld [vmem:[%s3917_s11 + $0x590] sm:$0xff]  ;;  %v1233_v3 = vld [vmem:[%s3917_s11 + $0x5c0] sm:$0xff] }
 0x145   : > { %1387 = vmatprep.mubr.f32.mxu0 %v934_v18  ;;  %1901 = vmatprep.mubr.f32.mxu1 %v934_v18  ;;  %v4339_v10 = vpop.eup %3169  ;;  %v2835_v17 = vpack.c.bf16 %v1224_v5, %v1220_v4  ;;  %v1219_v18 = vld [vmem:[%s3917_s11 + $0x550] sm:$0xff]  ;;  %v946_v31 = vmul.f32 %v4243_v7, %v796_v32  ;;  %v2709_v37 = vpack.c.bf16 %v1221_v9, %v1217_v14  ;;  %v3234_v48 = vld [vmem:[%s3906_s7 + $0xe0] sm:$0xff] }
 0x146   : > { %2698 = vmatpush1.bf16.msra.mxu0 %v2697_v22  ;;  %2826 = vmatpush1.bf16.msra.mxu1 %v2825_v21  ;;  %v941_v22 = vmul.f32 %v4246_v8, %v791_v62  ;;  %v718_v21 = vadd.f32 1e-06, %v686_v63  ;;  %v800_v34 = vmul.f32 %v3233_v33, %v4339_v10  ;;  %v4355_v36 = vpop.eup %3171  ;;  %v2837_v38 = vpack.c.bf16 %v1223_v19, %v1219_v18  ;;  %v1236_v56 = vld [vmem:[%s3917_s11 + $0x5d8] sm:$0xff]  ;;  %v1237_v4 = vld [vmem:[%s3917_s11 + $0x5e0] sm:$0xff]  ;;  %v1235_v32 = vld [vmem:[%s3917_s11 + $0x5d0] sm:$0xff] }
 0x147   : > { %2700 = vmatprep.subr.bf16.mxu0 %v2699_v28  ;;  %2828 = vmatprep.subr.bf16.mxu1 %v2827_v29  ;;  %v1228_v28 = vld [vmem:[%s3917_s11 + $0x598] sm:$0xff]  ;;  %v799_v50 = vmul.f32 %v3234_v48, %v4339_v10  ;;  %v2713_v63 = vpack.c.bf16 %v1229_v40, %v1225_v39  ;;  %v2841_v0 = vpack.c.bf16 %v1231_v35, %v1227_v44  ;;  %v1250_v39 = vld [vmem:[%s3917_s11 + $0x648] sm:$0xff] }
 0x148   : > { %1388 = vmatmul.mubr.f32.gmra.mrb[6].mxu0 %v933_v24  ;;  %1902 = vmatmul.mubr.f32.gmra.mrb[6].mxu1 %v933_v24  ;;  %v1232_v29 = vld [vmem:[%s3917_s11 + $0x5b8] sm:$0xff]  ;;  %v583_v24 = vpop.xlane.xlu1 %582  ;;  %3177 = vrsqrt.f32 %v718_v21  ;;  %v950_v59 = vmul.f32 %v4243_v7, %v800_v34  ;;  %v1254_v35 = vld [vmem:[%s3917_s11 + $0x668] sm:$0xff] }
 0x149   : > { %1393 = vmatprep.mubr.f32.mxu0 %v938_v42  ;;  %1907 = vmatprep.mubr.f32.mxu1 %v938_v42  ;;  %v2711_v42 = vpack.c.bf16 %v1230_v27, %v1226_v20  ;;  %v2839_v43 = vpack.c.bf16 %v1232_v29, %v1228_v28  ;;  %v688_v51 = vmul.f32 0.001953125, %v583_v24  ;;  %v1240_v57 = vld [vmem:[%s3917_s11 + $0x5f8] sm:$0xff]  ;;  %v4371_v62 = vpop.eup %3173  ;;  %3179 = vrsqrt.f32 %v719_v41  ;;  %v1241_v29 = vld [vmem:[%s3917_s11 + $0x600] sm:$0xff] }
 0x14a   : > { %2702 = vmatpush1.bf16.msra.mxu0 %v2701_v46  ;;  %2830 = vmatpush1.bf16.msra.mxu1 %v2829_v47  ;;  %v1234_v46 = vld [vmem:[%s3917_s11 + $0x5c8] sm:$0xff]  ;;  %v945_v47 = vmul.f32 %v4246_v8, %v795_v26  ;;  %v2843_v1 = vpack.c.bf16 %v1240_v57, %v1236_v56  ;;  %v949_v14 = vmul.f32 %v4246_v8, %v799_v50  ;;  %v3236_v15 = vld [vmem:[%s3906_s7 + $0x100] sm:$0xff] }
 0x14b   : > { %2704 = vmatprep.subr.bf16.mxu0 %v2703_v53  ;;  %2832 = vmatprep.subr.bf16.mxu1 %v2831_v54  ;;  %v588_v53 = vpop.xlane.xlu0 %587  ;;  %v1238_v54 = vld [vmem:[%s3917_s11 + $0x5e8] sm:$0xff]  ;;  %v720_v9 = vadd.f32 1e-06, %v688_v51  ;;  %v1244_v18 = vld [vmem:[%s3917_s11 + $0x618] sm:$0xff]  ;;  %v2717_v27 = vpack.c.bf16 %v1237_v4, %v1233_v3  ;;  %v1249_v57 = vld [vmem:[%s3917_s11 + $0x640] sm:$0xff] }
 0x14c   : > { %1394 = vmatmul.mubr.f32.gmra.mrb[8].mxu0 %v937_v52  ;;  %1908 = vmatmul.mubr.f32.gmra.mrb[8].mxu1 %v937_v52  ;;  %v3235_v52 = vld [vmem:[%s3906_s7 + $0x108] sm:$0xff]  ;;  %v689_v5 = vmul.f32 0.001953125, %v588_v53  ;;  %v1248_v19 = vld [vmem:[%s3917_s11 + $0x638] sm:$0xff]  ;;  %v593_v23 = vpop.xlane.xlu1 %592  ;;  %v4387_v26 = vpop.eup %3175  ;;  %v1255_v3 = vld [vmem:[%s3917_s11 + $0x670] sm:$0xff] }
 0x14d   : > { %1399 = vmatprep.mubr.f32.mxu0 %v942_v6  ;;  %1913 = vmatprep.mubr.f32.mxu1 %v942_v6  ;;  %v804_v61 = vmul.f32 %v3235_v52, %v4355_v36  ;;  %v2715_v6 = vpack.c.bf16 %v1238_v54, %v1234_v46  ;;  %v2847_v24 = vpack.c.bf16 %v1248_v19, %v1244_v18  ;;  %3181 = vrsqrt.f32 %v720_v9  ;;  %v3238_v41 = vld [vmem:[%s3906_s7 + $0x120] sm:$0xff]  ;;  %v3239_v50 = vld [vmem:[%s3906_s7 + $0x148] sm:$0xff] }
 0x14e   : > { %2706 = vmatpush1.bf16.msra.mxu0 %v2705_v12  ;;  %2834 = vmatpush1.bf16.msra.mxu1 %v2833_v13  ;;  %v1239_v12 = vld [vmem:[%s3917_s11 + $0x5f0] sm:$0xff]  ;;  %v1242_v13 = vld [vmem:[%s3917_s11 + $0x608] sm:$0xff]  ;;  %v721_v33 = vadd.f32 1e-06, %v689_v5  ;;  %v1252_v46 = vld [vmem:[%s3917_s11 + $0x658] sm:$0xff]  ;;  %v812_v51 = vmul.f32 %v3239_v50, %v4387_v26 }
 0x14f   : > { %2708 = vmatprep.subr.bf16.mxu0 %v2707_v16  ;;  %2836 = vmatprep.subr.bf16.mxu1 %v2835_v17  ;;  %v803_v16 = vmul.f32 %v3236_v15, %v4355_v36  ;;  %v1246_v17 = vld [vmem:[%s3917_s11 + $0x628] sm:$0xff]  ;;  %v954_v20 = vmul.f32 %v4243_v7, %v804_v61  ;;  %v2845_v28 = vpack.c.bf16 %v1239_v12, %v1235_v32  ;;  %v598_v44 = vpop.xlane.xlu0 %597  ;;  %v1265_v50 = vld [vmem:[%s3917_s11 + $0x6c0] sm:$0xff] }
 0x150   : > { %1400 = vmatmul.mubr.f32.gmra.mrb[10].mxu0 %v941_v22  ;;  %1914 = vmatmul.mubr.f32.gmra.mrb[10].mxu1 %v941_v22  ;;  %v3237_v22 = vld [vmem:[%s3906_s7 + $0x128] sm:$0xff]  ;;  %v2719_v34 = vpack.c.bf16 %v1246_v17, %v1242_v13  ;;  %v691_v52 = vmul.f32 0.001953125, %v598_v44  ;;  %v2723_v61 = vpack.c.bf16 %v1254_v35, %v1250_v39  ;;  %3183 = vrsqrt.f32 %v721_v33  ;;  %v1260_v13 = vld [vmem:[%s3917_s11 + $0x698] sm:$0xff]  ;;  %v603_v17 = vpop.xlane.xlu1 %602 }
 0x151   : > { %1405 = vmatprep.mubr.f32.mxu0 %v946_v31  ;;  %1919 = vmatprep.mubr.f32.mxu1 %v946_v31  ;;  %v808_v21 = vmul.f32 %v3237_v22, %v4371_v62  ;;  %v1245_v31 = vld [vmem:[%s3917_s11 + $0x620] sm:$0xff]  ;;  %v953_v40 = vmul.f32 %v4246_v8, %v803_v16  ;;  %v1258_v4 = vld [vmem:[%s3917_s11 + $0x688] sm:$0xff]  ;;  %v962_v9 = vmul.f32 %v4243_v7, %v812_v51 }
 0x152   : > { %2710 = vmatpush1.bf16.msra.mxu0 %v2709_v37  ;;  %2838 = vmatpush1.bf16.msra.mxu1 %v2837_v38  ;;  %v1243_v37 = vld [vmem:[%s3917_s11 + $0x610] sm:$0xff]  ;;  %v4403_v53 = vpop.eup %3177  ;;  %v2721_v54 = vpack.c.bf16 %v1245_v31, %v1241_v29  ;;  %v1262_v12 = vld [vmem:[%s3917_s11 + $0x6a8] sm:$0xff]  ;;  %v1257_v22 = vld [vmem:[%s3917_s11 + $0x680] sm:$0xff] }
 0x153   : > { %2712 = vmatprep.subr.bf16.mxu0 %v2711_v42  ;;  %2840 = vmatprep.subr.bf16.mxu1 %v2839_v43  ;;  %v1247_v38 = vld [vmem:[%s3917_s11 + $0x630] sm:$0xff]  ;;  %v807_v42 = vmul.f32 %v3238_v41, %v4371_v62  ;;  %v690_v43 = vmul.f32 0.001953125, %v593_v23  ;;  %v958_v48 = vmul.f32 %v4243_v7, %v808_v21  ;;  %v3241_v15 = vld [vmem:[%s3906_s7 + $0x168] sm:$0xff]  ;;  %v4419_v18 = vpop.eup %3179  ;;  %v723_v23 = vadd.f32 1e-06, %v691_v52  ;;  %v608_v39 = vpop.xlane.xlu0 %607  ;;  %v1268_v41 = vld [vmem:[%s3917_s11 + $0x6d8] sm:$0xff] }
 0x154   : > { %1406 = vmatmul.mubr.f32.gmra.mrb[12].mxu0 %v945_v47  ;;  %1920 = vmatmul.mubr.f32.gmra.mrb[12].mxu1 %v945_v47  ;;  %v1256_v47 = vld [vmem:[%s3917_s11 + $0x678] sm:$0xff]  ;;  %v2849_v56 = vpack.c.bf16 %v1247_v38, %v1243_v37  ;;  %v816_v16 = vmul.f32 %v3241_v15, %v4403_v53  ;;  %v1261_v21 = vld [vmem:[%s3917_s11 + $0x6a0] sm:$0xff]  ;;  %v1259_v29 = vld [vmem:[%s3917_s11 + $0x690] sm:$0xff]  ;;  %v692_v38 = vmul.f32 0.001953125, %v603_v17 }
 0x155   : > { %1411 = vmatprep.mubr.f32.mxu0 %v950_v59  ;;  %1925 = vmatprep.mubr.f32.mxu1 %v950_v59  ;;  %v1253_v59 = vld [vmem:[%s3917_s11 + $0x660] sm:$0xff]  ;;  %v957_v5 = vmul.f32 %v4246_v8, %v807_v42  ;;  %v1263_v31 = vld [vmem:[%s3917_s11 + $0x6b0] sm:$0xff]  ;;  %v1266_v33 = vld [vmem:[%s3917_s11 + $0x6c8] sm:$0xff] }
 0x156   : > { %2714 = vmatpush1.bf16.msra.mxu0 %v2713_v63  ;;  %2842 = vmatpush1.bf16.msra.mxu1 %v2841_v0  ;;  %v2851_v63 = vpack.c.bf16 %v1256_v47, %v1252_v46  ;;  %v1251_v0 = vld [vmem:[%s3917_s11 + $0x650] sm:$0xff]  ;;  %v2725_v19 = vpack.c.bf16 %v1253_v59, %v1249_v57  ;;  %v1272_v42 = vld [vmem:[%s3917_s11 + $0x6f8] sm:$0xff]  ;;  %v3243_v44 = vld [vmem:[%s3906_s7 + $0x188] sm:$0xff]  ;;  %v2729_v47 = vpack.c.bf16 %v1261_v21, %v1257_v22 }
 0x157   : > { %2716 = vmatprep.subr.bf16.mxu0 %v2715_v6  ;;  %2844 = vmatprep.subr.bf16.mxu1 %v2843_v1  ;;  %v722_v6 = vadd.f32 1e-06, %v690_v43  ;;  %v3240_v1 = vld [vmem:[%s3906_s7 + $0x140] sm:$0xff]  ;;  %v966_v43 = vmul.f32 %v4243_v7, %v816_v16  ;;  %v820_v35 = vmul.f32 %v3243_v44, %v4419_v18  ;;  %v4435_v46 = vpop.eup %3181  ;;  %v2859_v57 = vpack.c.bf16 %v1272_v42, %v1268_v41  ;;  %v1267_v59 = vld [vmem:[%s3917_s11 + $0x6d0] sm:$0xff]  ;;  %v3247_v41 = vld [vmem:[%s3906_s7 + $0x1c8] sm:$0xff] }
 0x158   : > { %1412 = vmatmul.mubr.f32.gmra.mrb[14].mxu0 %v949_v14  ;;  %1926 = vmatmul.mubr.f32.gmra.mrb[14].mxu1 %v949_v14  ;;  %v811_v32 = vmul.f32 %v3240_v1, %v4387_v26  ;;  %v1264_v14 = vld [vmem:[%s3917_s11 + $0x6b8] sm:$0xff]  ;;  %v1269_v51 = vld [vmem:[%s3917_s11 + $0x6e0] sm:$0xff]  ;;  %v1271_v52 = vld [vmem:[%s3917_s11 + $0x6f0] sm:$0xff] }
 0x159   : > { %1417 = vmatprep.mubr.f32.mxu0 %v954_v20  ;;  %1931 = vmatprep.mubr.f32.mxu1 %v954_v20  ;;  %v2853_v20 = vpack.c.bf16 %v1255_v3, %v1251_v0  ;;  %3185 = vrsqrt.f32 %v722_v6  ;;  %v724_v0 = vadd.f32 1e-06, %v692_v38  ;;  %v3244_v3 = vld [vmem:[%s3906_s7 + $0x180] sm:$0xff]  ;;  %v2733_v15 = vpack.c.bf16 %v1269_v51, %v1265_v50 }
 0x15a   : > { %2718 = vmatpush1.bf16.msra.mxu0 %v2717_v27  ;;  %2846 = vmatpush1.bf16.msra.mxu1 %v2845_v28  ;;  %v2727_v27 = vpack.c.bf16 %v1262_v12, %v1258_v4  ;;  %v2855_v28 = vpack.c.bf16 %v1264_v14, %v1260_v13  ;;  %3187 = vrsqrt.f32 %v723_v23  ;;  %v819_v4 = vmul.f32 %v3244_v3, %v4419_v18  ;;  %v1276_v6 = vld [vmem:[%s3917_s11 + $0x718] sm:$0xff]  ;;  %v3245_v12 = vld [vmem:[%s3906_s7 + $0x1a8] sm:$0xff]  ;;  %v613_v14 = vpop.xlane.xlu1 %612  ;;  %v1275_v23 = vld [vmem:[%s3917_s11 + $0x710] sm:$0xff] }
 0x15b   : > { %2720 = vmatprep.subr.bf16.mxu0 %v2719_v34  ;;  %2848 = vmatprep.subr.bf16.mxu1 %v2847_v24  ;;  %v961_v34 = vmul.f32 %v4246_v8, %v811_v32  ;;  %v3242_v24 = vld [vmem:[%s3906_s7 + $0x160] sm:$0xff]  ;;  %v970_v32 = vmul.f32 %v4243_v7, %v820_v35  ;;  %v824_v13 = vmul.f32 %v3245_v12, %v4435_v46  ;;  %3189 = vrsqrt.f32 %v724_v0  ;;  %v1294_v3 = vld [vmem:[%s3917_s11 + $0x7a8] sm:$0xff] }
 0x15c   : > { %1418 = vmatmul.mubr.f32.gmra.mrb[16].mxu0 %v953_v40  ;;  %1932 = vmatmul.mubr.f32.gmra.mrb[16].mxu1 %v953_v40  ;;  %v815_v37 = vmul.f32 %v3242_v24, %v4403_v53  ;;  %v1270_v40 = vld [vmem:[%s3917_s11 + $0x6e8] sm:$0xff]  ;;  %v1280_v1 = vld [vmem:[%s3917_s11 + $0x738] sm:$0xff]  ;;  %v2861_v16 = vpack.c.bf16 %v1271_v52, %v1267_v59  ;;  %v1273_v17 = vld [vmem:[%s3917_s11 + $0x700] sm:$0xff]  ;;  %v618_v24 = vpop.xlane.xlu0 %617 }
 0x15d   : > { %1423 = vmatprep.mubr.f32.mxu0 %v958_v48  ;;  %1937 = vmatprep.mubr.f32.mxu1 %v958_v48  ;;  %v2857_v48 = vpack.c.bf16 %v1263_v31, %v1259_v29  ;;  %v2863_v21 = vpack.c.bf16 %v1280_v1, %v1276_v6  ;;  %v969_v29 = vmul.f32 %v4246_v8, %v819_v4  ;;  %v3246_v31 = vld [vmem:[%s3906_s7 + $0x1a0] sm:$0xff]  ;;  %v695_v50 = vmul.f32 0.001953125, %v618_v24  ;;  %v1290_v59 = vld [vmem:[%s3917_s11 + $0x788] sm:$0xff] }
 0x15e   : > { %2722 = vmatpush1.bf16.msra.mxu0 %v2721_v54  ;;  %2850 = vmatpush1.bf16.msra.mxu1 %v2849_v56  ;;  %v693_v54 = vmul.f32 0.001953125, %v608_v39  ;;  %v2731_v56 = vpack.c.bf16 %v1270_v40, %v1266_v33  ;;  %v823_v33 = vmul.f32 %v3246_v31, %v4435_v46  ;;  %v1284_v38 = vld [vmem:[%s3917_s11 + $0x758] sm:$0xff]  ;;  %v974_v40 = vmul.f32 %v4243_v7, %v824_v13  ;;  %v3249_v1 = vld [vmem:[%s3906_s7 + $0x1e8] sm:$0xff]  ;;  %v623_v12 = vpop.xlane.xlu1 %622 }
 0x15f   : > { %2724 = vmatprep.subr.bf16.mxu0 %v2723_v61  ;;  %2852 = vmatprep.subr.bf16.mxu1 %v2851_v63  ;;  %v1274_v61 = vld [vmem:[%s3917_s11 + $0x708] sm:$0xff]  ;;  %v965_v63 = vmul.f32 %v4246_v8, %v815_v37  ;;  %v1288_v39 = vld [vmem:[%s3917_s11 + $0x778] sm:$0xff] }
 0x160   : > { %1424 = vmatmul.mubr.f32.gmra.mrb[18].mxu0 %v957_v5  ;;  %1938 = vmatmul.mubr.f32.gmra.mrb[18].mxu1 %v957_v5  ;;  %v1278_v5 = vld [vmem:[%s3917_s11 + $0x728] sm:$0xff]  ;;  %v973_v52 = vmul.f32 %v4246_v8, %v823_v33  ;;  %v1292_v4 = vld [vmem:[%s3917_s11 + $0x798] sm:$0xff]  ;;  %v696_v33 = vmul.f32 0.001953125, %v623_v12 }
 0x161   : > { %1429 = vmatprep.mubr.f32.mxu0 %v962_v9  ;;  %1943 = vmatprep.mubr.f32.mxu1 %v962_v9  ;;  %v4451_v9 = vpop.eup %3183  ;;  %v2735_v22 = vpack.c.bf16 %v1278_v5, %v1274_v61  ;;  %v1286_v37 = vld [vmem:[%s3917_s11 + $0x768] sm:$0xff]  ;;  %v1296_v5 = vld [vmem:[%s3917_s11 + $0x7b8] sm:$0xff] }
 0x162   : > { %2726 = vmatpush1.bf16.msra.mxu0 %v2725_v19  ;;  %2854 = vmatpush1.bf16.msra.mxu1 %v2853_v20  ;;  %v1277_v19 = vld [vmem:[%s3917_s11 + $0x720] sm:$0xff]  ;;  %v725_v20 = vadd.f32 1e-06, %v693_v54  ;;  %v828_v42 = vmul.f32 %v3247_v41, %v4451_v9  ;;  %v2867_v54 = vpack.c.bf16 %v1288_v39, %v1284_v38  ;;  %v1302_v24 = vld [vmem:[%s3917_s11 + $0x7e8] sm:$0xff]  ;;  %v1304_v38 = vld [vmem:[%s3917_s11 + $0x7f8] sm:$0xff] }
 0x163   : > { %2728 = vmatprep.subr.bf16.mxu0 %v2727_v27  ;;  %2856 = vmatprep.subr.bf16.mxu1 %v2855_v28  ;;  %v1279_v27 = vld [vmem:[%s3917_s11 + $0x730] sm:$0xff]  ;;  %v1282_v28 = vld [vmem:[%s3917_s11 + $0x748] sm:$0xff]  ;;  %v2737_v44 = vpack.c.bf16 %v1277_v19, %v1273_v17  ;;  %v1293_v17 = vld [vmem:[%s3917_s11 + $0x7a0] sm:$0xff]  ;;  %v727_v19 = vadd.f32 1e-06, %v695_v50 }
 0x164   : > { %1430 = vmatmul.mubr.f32.gmra.mrb[20].mxu0 %v961_v34  ;;  %1944 = vmatmul.mubr.f32.gmra.mrb[20].mxu1 %v961_v34  ;;  %v694_v34 = vmul.f32 0.001953125, %v613_v14  ;;  %v2865_v35 = vpack.c.bf16 %v1279_v27, %v1275_v23  ;;  %v2739_v51 = vpack.c.bf16 %v1286_v37, %v1282_v28  ;;  %3191 = vrsqrt.f32 %v725_v20  ;;  %v1295_v23 = vld [vmem:[%s3917_s11 + $0x7b0] sm:$0xff]  ;;  %v1298_v27 = vld [vmem:[%s3917_s11 + $0x7c8] sm:$0xff]  ;;  %v1300_v37 = vld [vmem:[%s3917_s11 + $0x7d8] sm:$0xff] }
 0x165   : > { %1435 = vmatprep.mubr.f32.mxu0 %v966_v43  ;;  %1949 = vmatprep.mubr.f32.mxu1 %v966_v43  ;;  %v4467_v43 = vpop.eup %3185  ;;  %v978_v6 = vmul.f32 %v4243_v7, %v828_v42  ;;  %v2743_v20 = vpack.c.bf16 %v1294_v3, %v1290_v59  ;;  %v2747_v50 = vpack.c.bf16 %v1302_v24, %v1298_v27  ;;  %v3253_v3 = vld [vmem:[%s3906_s7 + $0x228] sm:$0xff] }
 0x166   : > { %2730 = vmatpush1.bf16.msra.mxu0 %v2729_v47  ;;  %2858 = vmatpush1.bf16.msra.mxu1 %v2857_v48  ;;  %v1281_v47 = vld [vmem:[%s3917_s11 + $0x740] sm:$0xff]  ;;  %v726_v61 = vadd.f32 1e-06, %v694_v34  ;;  %v4483_v13 = vpop.eup %3187  ;;  %v628_v34 = vpop.xlane.xlu0 %627 }
 0x167   : > { %2732 = vmatprep.subr.bf16.mxu0 %v2731_v56  ;;  %2860 = vmatprep.subr.bf16.mxu1 %v2859_v57  ;;  %v1285_v48 = vld [vmem:[%s3917_s11 + $0x760] sm:$0xff]  ;;  %v1283_v56 = vld [vmem:[%s3917_s11 + $0x750] sm:$0xff]  ;;  %v4499_v42 = vpop.eup %3189 }
 0x168   : > { %1436 = vmatmul.mubr.f32.gmra.mrb[22].mxu0 %v965_v63  ;;  %1950 = vmatmul.mubr.f32.gmra.mrb[22].mxu1 %v965_v63  ;;  %v1287_v57 = vld [vmem:[%s3917_s11 + $0x770] sm:$0xff]  ;;  %v3248_v63 = vld [vmem:[%s3906_s7 + $0x1c0] sm:$0xff]  ;;  %v2741_v14 = vpack.c.bf16 %v1285_v48, %v1281_v47  ;;  %3193 = vrsqrt.f32 %v726_v61  ;;  %v697_v48 = vmul.f32 0.001953125, %v628_v34  ;;  %v3257_v24 = vld [vmem:[%s3906_s7 + $0x268] sm:$0xff] }
 0x169   : > { %1441 = vmatprep.mubr.f32.mxu0 %v970_v32  ;;  %1955 = vmatprep.mubr.f32.mxu1 %v970_v32  ;;  %v827_v0 = vmul.f32 %v3248_v63, %v4451_v9  ;;  %v832_v32 = vmul.f32 %v3249_v1, %v4467_v43  ;;  %v1297_v47 = vld [vmem:[%s3917_s11 + $0x7c0] sm:$0xff]  ;;  %3195 = vrsqrt.f32 %v727_v19 }
 0x16a   : > { %2734 = vmatpush1.bf16.msra.mxu0 %v2733_v15  ;;  %2862 = vmatpush1.bf16.msra.mxu1 %v2861_v16  ;;  %v2869_v15 = vpack.c.bf16 %v1287_v57, %v1283_v56  ;;  %v1289_v16 = vld [vmem:[%s3917_s11 + $0x780] sm:$0xff]  ;;  %v1299_v56 = vld [vmem:[%s3917_s11 + $0x7d0] sm:$0xff]  ;;  %v729_v12 = vadd.f32 1e-06, %v697_v48  ;;  %v638_v19 = vpop.xlane.xlu0 %637 }
 0x16b   : > { %2736 = vmatprep.subr.bf16.mxu0 %v2735_v22  ;;  %2864 = vmatprep.subr.bf16.mxu1 %v2863_v21  ;;  %v2871_v22 = vpack.c.bf16 %v1296_v5, %v1292_v4  ;;  %v1291_v21 = vld [vmem:[%s3917_s11 + $0x790] sm:$0xff]  ;;  %v977_v28 = vmul.f32 %v4246_v8, %v827_v0  ;;  %v982_v39 = vmul.f32 %v4243_v7, %v832_v32  ;;  %v3252_v61 = vld [vmem:[%s3906_s7 + $0x200] sm:$0xff]  ;;  %v633_v5 = vpop.xlane.xlu1 %632  ;;  %v699_v27 = vmul.f32 0.001953125, %v638_v19  ;;  %v3263_v19 = vld [vmem:[%s3906_s7 + $0x2c8] sm:$0xff] }
 0x16c   : > { %1442 = vmatmul.mubr.f32.gmra.mrb[24].mxu0 %v969_v29  ;;  %1956 = vmatmul.mubr.f32.gmra.mrb[24].mxu1 %v969_v29  ;;  %v3250_v29 = vld [vmem:[%s3906_s7 + $0x1e0] sm:$0xff]  ;;  %v1303_v57 = vld [vmem:[%s3917_s11 + $0x7f0] sm:$0xff]  ;;  %v835_v63 = vmul.f32 %v3252_v61, %v4483_v13  ;;  %v840_v4 = vmul.f32 %v3253_v3, %v4499_v42  ;;  %v3261_v3 = vld [vmem:[%s3906_s7 + $0x2a8] sm:$0xff] }
 0x16d   : > { %1447 = vmatprep.mubr.f32.mxu0 %v974_v40  ;;  %1961 = vmatprep.mubr.f32.mxu1 %v974_v40  ;;  %v831_v31 = vmul.f32 %v3250_v29, %v4467_v43  ;;  %v3251_v40 = vld [vmem:[%s3906_s7 + $0x208] sm:$0xff]  ;;  %v2877_v32 = vpack.c.bf16 %v1303_v57, %v1299_v56  ;;  %v3260_v61 = vld [vmem:[%s3906_s7 + $0x280] sm:$0xff] }
 0x16e   : > { %2738 = vmatpush1.bf16.msra.mxu0 %v2737_v44  ;;  %2866 = vmatpush1.bf16.msra.mxu1 %v2865_v35  ;;  %v836_v41 = vmul.f32 %v3251_v40, %v4483_v13  ;;  %v2745_v44 = vpack.c.bf16 %v1293_v17, %v1289_v16  ;;  %v2873_v35 = vpack.c.bf16 %v1295_v23, %v1291_v21  ;;  %v698_v17 = vmul.f32 0.001953125, %v633_v5  ;;  %v648_v48 = vpop.xlane.xlu0 %647 }
 0x16f   : > { %2740 = vmatprep.subr.bf16.mxu0 %v2739_v51  ;;  %2868 = vmatprep.subr.bf16.mxu1 %v2867_v54  ;;  %v2875_v51 = vpack.c.bf16 %v1304_v38, %v1300_v37  ;;  %v1301_v54 = vld [vmem:[%s3917_s11 + $0x7e0] sm:$0xff]  ;;  %v981_v59 = vmul.f32 %v4246_v8, %v831_v31  ;;  %v643_v38 = vpop.xlane.xlu1 %642  ;;  %v731_v40 = vadd.f32 1e-06, %v699_v27  ;;  %v701_v57 = vmul.f32 0.001953125, %v648_v48 }
 0x170   : > { %1448 = vmatmul.mubr.f32.gmra.mrb[26].mxu0 %v973_v52  ;;  %1962 = vmatmul.mubr.f32.gmra.mrb[26].mxu1 %v973_v52  ;;  %v728_v52 = vadd.f32 1e-06, %v696_v33  ;;  %v986_v0 = vmul.f32 %v4243_v7, %v836_v41  ;;  %v2749_v1 = vpack.c.bf16 %v1301_v54, %v1297_v47  ;;  %v730_v29 = vadd.f32 1e-06, %v698_v17  ;;  %v3256_v31 = vld [vmem:[%s3906_s7 + $0x240] sm:$0xff] }
 0x171   : > { %1453 = vmatprep.mubr.f32.mxu0 %v978_v6  ;;  %1967 = vmatprep.mubr.f32.mxu1 %v978_v6  ;;  %v4511_v6 = vpop.eup %3191  ;;  %v700_v47 = vmul.f32 0.001953125, %v643_v38 }
 0x172   : > { %2742 = vmatpush1.bf16.msra.mxu0 %v2741_v14  ;;  %2870 = vmatpush1.bf16.msra.mxu1 %v2869_v15  ;;  %3197 = vrsqrt.f32 %v728_v52  ;;  %v985_v14 = vmul.f32 %v4246_v8, %v835_v63  ;;  %v3254_v15 = vld [vmem:[%s3906_s7 + $0x220] sm:$0xff]  ;;  %v4519_v23 = vpop.eup %3193  ;;  %v843_v33 = vmul.f32 %v3256_v31, %v4511_v6 }
 0x173   : > { %2744 = vmatprep.subr.bf16.mxu0 %v2743_v20  ;;  %2872 = vmatprep.subr.bf16.mxu1 %v2871_v22  ;;  %v839_v16 = vmul.f32 %v3254_v15, %v4499_v42  ;;  %v990_v20 = vmul.f32 %v4243_v7, %v840_v4  ;;  %v3255_v22 = vld [vmem:[%s3906_s7 + $0x248] sm:$0xff]  ;;  %3199 = vrsqrt.f32 %v729_v12  ;;  %v848_v37 = vmul.f32 %v3257_v24, %v4519_v23  ;;  %v653_v5 = vpop.xlane.xlu1 %652 }
 0x174   : > { %1454 = vmatmul.mubr.f32.gmra.mrb[28].mxu0 %v977_v28  ;;  %1968 = vmatmul.mubr.f32.gmra.mrb[28].mxu1 %v977_v28  ;;  %v844_v21 = vmul.f32 %v3255_v22, %v4511_v6  ;;  %3201 = vrsqrt.f32 %v730_v29  ;;  %v993_v41 = vmul.f32 %v4246_v8, %v843_v33  ;;  %v732_v52 = vadd.f32 1e-06, %v700_v47  ;;  %v658_v22 = vpop.xlane.xlu0 %657  ;;  %v3264_v29 = vld [vmem:[%s3906_s7 + $0x2c0] sm:$0xff] }
 0x175   : > { %1459 = vmatprep.mubr.f32.mxu0 %v982_v39  ;;  %1973 = vmatprep.mubr.f32.mxu1 %v982_v39  ;;  %v989_v28 = vmul.f32 %v4246_v8, %v839_v16  ;;  %v4527_v39 = vpop.eup %3195  ;;  %3203 = vrsqrt.f32 %v731_v40  ;;  %v702_v16 = vmul.f32 0.001953125, %v653_v5  ;;  %v703_v33 = vmul.f32 0.001953125, %v658_v22  ;;  %v3266_v47 = vld [vmem:[%s3906_s7 + $0x2e0] sm:$0xff] }
 0x176   : > { %2746 = vmatpush1.bf16.msra.mxu0 %v2745_v44  ;;  %2874 = vmatpush1.bf16.msra.mxu1 %v2873_v35  ;;  %v994_v34 = vmul.f32 %v4243_v7, %v844_v21  ;;  %v3258_v44 = vld [vmem:[%s3906_s7 + $0x260] sm:$0xff]  ;;  %v851_v63 = vmul.f32 %v3260_v61, %v4527_v39  ;;  %3205 = vrsqrt.f32 %v732_v52 }
 0x177   : > { %2748 = vmatprep.subr.bf16.mxu0 %v2747_v50  ;;  %2876 = vmatprep.subr.bf16.mxu1 %v2875_v51  ;;  %v847_v35 = vmul.f32 %v3258_v44, %v4519_v23  ;;  %v998_v50 = vmul.f32 %v4243_v7, %v848_v37  ;;  %v3259_v51 = vld [vmem:[%s3906_s7 + $0x288] sm:$0xff] }
 0x178   : > { %1460 = vmatmul.mubr.f32.gmra.mrb[30].mxu0 %v981_v59  ;;  %1974 = vmatmul.mubr.f32.gmra.mrb[30].mxu1 %v981_v59  ;;  %v852_v54 = vmul.f32 %v3259_v51, %v4527_v39  ;;  %v1001_v12 = vmul.f32 %v4246_v8, %v851_v63  ;;  %v3265_v37 = vld [vmem:[%s3906_s7 + $0x2e8] sm:$0xff]  ;;  %v3268_v63 = vld [vmem:[%s3906_s7 + $0x300] sm:$0xff] }
 0x179   : > { %1465 = vmatprep.mubr.f32.mxu0 %v986_v0  ;;  %1979 = vmatprep.mubr.f32.mxu1 %v986_v0  ;;  %v997_v59 = vmul.f32 %v4246_v8, %v847_v35  ;;  %v735_v35 = vadd.f32 1e-06, %v703_v33  ;;  %v3267_v51 = vld [vmem:[%s3906_s7 + $0x308] sm:$0xff] }
 0x17a   : > { %2750 = vmatpush1.bf16.msra.mxu0 %v2749_v1  ;;  %2878 = vmatpush1.bf16.msra.mxu1 %v2877_v32  ;;  %v1002_v0 = vmul.f32 %v4243_v7, %v852_v54  ;;  %v733_v32 = vadd.f32 1e-06, %v701_v57  ;;  %v668_v57 = vpop.xlane.xlu0 %667 }
 0x17c   : > { %1466 = vmatmul.mubr.f32.gmra.mrb[32].mxu0 %v985_v14  ;;  %1980 = vmatmul.mubr.f32.gmra.mrb[32].mxu1 %v985_v14  ;;  %v4535_v56 = vpop.eup %3197  ;;  %v3262_v14 = vld [vmem:[%s3906_s7 + $0x2a0] sm:$0xff]  ;;  %3207 = vrsqrt.f32 %v733_v32  ;;  %v3269_v32 = vld [vmem:[%s3906_s7 + $0x328] sm:$0xff] }
 0x17d   : > { %1471 = vmatprep.mubr.f32.mxu0 %v990_v20  ;;  %1985 = vmatprep.mubr.f32.mxu1 %v990_v20  ;;  %v856_v4 = vmul.f32 %v3261_v3, %v4535_v56  ;;  %v4543_v1 = vpop.eup %3199  ;;  %v855_v15 = vmul.f32 %v3262_v14, %v4535_v56  ;;  %v705_v3 = vmul.f32 0.001953125, %v668_v57 }
 0x17e   : > { %v860_v20 = vmul.f32 %v3263_v19, %v4543_v1  ;;  %v4551_v21 = vpop.eup %3201  ;;  %v859_v31 = vmul.f32 %v3264_v29, %v4543_v1 }
 0x17f   : > { %v1006_v17 = vmul.f32 %v4243_v7, %v856_v4  ;;  %v1005_v27 = vmul.f32 %v4246_v8, %v855_v15  ;;  %v864_v38 = vmul.f32 %v3265_v37, %v4551_v21  ;;  %v4559_v40 = vpop.eup %3203  ;;  %v863_v48 = vmul.f32 %v3266_v47, %v4551_v21  ;;  %v3274_v47 = vld [vmem:[%s3906_s7 + $0x360] sm:$0xff] }
 0x180   : > { %1472 = vmatmul.mubr.f32.gmra.mrb[34].mxu0 %v989_v28  ;;  %1986 = vmatmul.mubr.f32.gmra.mrb[34].mxu1 %v989_v28  ;;  %v734_v28 = vadd.f32 1e-06, %v702_v16  ;;  %v1010_v24 = vmul.f32 %v4243_v7, %v860_v20  ;;  %v1009_v44 = vmul.f32 %v4246_v8, %v859_v31  ;;  %v868_v54 = vmul.f32 %v3267_v51, %v4559_v40 }
 0x181   : > { %1477 = vmatprep.mubr.f32.mxu0 %v994_v34  ;;  %1991 = vmatprep.mubr.f32.mxu1 %v994_v34  ;;  %v663_v34 = vpop.xlane.xlu1 %662  ;;  %v1013_v61 = vmul.f32 %v4246_v8, %v863_v48  ;;  %v737_v16 = vadd.f32 1e-06, %v705_v3  ;;  %v3277_v3 = vld [vmem:[%s3906_s7 + $0x3a8] sm:$0xff] }
 0x182   : > { %3209 = vrsqrt.f32 %v734_v28  ;;  %v1018_v5 = vmul.f32 %v4243_v7, %v868_v54  ;;  %v3275_v54 = vld [vmem:[%s3906_s7 + $0x388] sm:$0xff] }
 0x183   : > { %3211 = vrsqrt.f32 %v735_v35 }
 0x184   : > { %1478 = vmatmul.mubr.f32.gmra.mrb[36].mxu0 %v993_v41  ;;  %1992 = vmatmul.mubr.f32.gmra.mrb[36].mxu1 %v993_v41  ;;  %v704_v41 = vmul.f32 0.001953125, %v663_v34  ;;  %v3272_v34 = vld [vmem:[%s3906_s7 + $0x340] sm:$0xff] }
 0x185   : > { %1483 = vmatprep.mubr.f32.mxu0 %v998_v50  ;;  %1997 = vmatprep.mubr.f32.mxu1 %v998_v50  ;;  %v1014_v50 = vmul.f32 %v4243_v7, %v864_v38  ;;  %v673_v14 = vpop.xlane.xlu1 %672  ;;  %v3273_v38 = vld [vmem:[%s3906_s7 + $0x368] sm:$0xff] }
 0x186   : > { %v736_v52 = vadd.f32 1e-06, %v704_v41  ;;  %v706_v20 = vmul.f32 0.001953125, %v673_v14  ;;  %v3278_v14 = vld [vmem:[%s3906_s7 + $0x3a0] sm:$0xff] }
 0x188   : > { %1484 = vmatmul.mubr.f32.gmra.mrb[38].mxu0 %v997_v59  ;;  %1998 = vmatmul.mubr.f32.gmra.mrb[38].mxu1 %v997_v59  ;;  %v4567_v59 = vpop.eup %3205  ;;  %3213 = vrsqrt.f32 %v736_v52  ;;  %v738_v33 = vadd.f32 1e-06, %v706_v20 }
 0x189   : > { %1489 = vmatprep.mubr.f32.mxu0 %v1002_v0  ;;  %2003 = vmatprep.mubr.f32.mxu1 %v1002_v0  ;;  %v867_v0 = vmul.f32 %v3268_v63, %v4559_v40  ;;  %v4572_v4 = vpop.eup %3207  ;;  %3215 = vrsqrt.f32 %v737_v16 }
 0x18a   : > { %3217 = vrsqrt.f32 %v738_v33  ;;  %v3281_v33 = vld [vmem:[%s3906_s7 + $0x3e8] sm:$0xff] }
 0x18b   : > { %v1017_v15 = vmul.f32 %v4246_v8, %v867_v0 }
 0x18c   : > { %1490 = vmatmul.mubr.f32.gmra.mrb[40].mxu0 %v1001_v12  ;;  %2004 = vmatmul.mubr.f32.gmra.mrb[40].mxu1 %v1001_v12  ;;  %v872_v12 = vmul.f32 %v3269_v32, %v4567_v59  ;;  %v4583_v29 = vpop.eup %3209 }
 0x18d   : > { %1495 = vmatprep.mubr.f32.mxu0 %v1006_v17  ;;  %2009 = vmatprep.mubr.f32.mxu1 %v1006_v17  ;;  %v3270_v17 = vld [vmem:[%s3906_s7 + $0x320] sm:$0xff]  ;;  %v880_v41 = vmul.f32 %v3273_v38, %v4583_v29  ;;  %v879_v48 = vmul.f32 %v3274_v47, %v4583_v29 }
 0x18e   : > { %v871_v19 = vmul.f32 %v3270_v17, %v4567_v59  ;;  %v1022_v22 = vmul.f32 %v4243_v7, %v872_v12  ;;  %v3279_v17 = vld [vmem:[%s3906_s7 + $0x3c8] sm:$0xff] }
 0x18f   : > { %v1030_v51 = vmul.f32 %v4243_v7, %v880_v41  ;;  %v1029_v52 = vmul.f32 %v4246_v8, %v879_v48 }
 0x190   : > { %1496 = vmatmul.mubr.f32.gmra.mrb[42].mxu0 %v1005_v27  ;;  %2010 = vmatmul.mubr.f32.gmra.mrb[42].mxu1 %v1005_v27  ;;  %v3271_v27 = vld [vmem:[%s3906_s7 + $0x348] sm:$0xff]  ;;  %v1021_v31 = vmul.f32 %v4246_v8, %v871_v19 }
 0x191   : > { %1501 = vmatprep.mubr.f32.mxu0 %v1010_v24  ;;  %2015 = vmatprep.mubr.f32.mxu1 %v1010_v24  ;;  %v876_v28 = vmul.f32 %v3271_v27, %v4572_v4  ;;  %v875_v24 = vmul.f32 %v3272_v34, %v4572_v4  ;;  %v3280_v27 = vld [vmem:[%s3906_s7 + $0x3c0] sm:$0xff] }
 0x193   : > { %v1026_v37 = vmul.f32 %v4243_v7, %v876_v28  ;;  %v1025_v35 = vmul.f32 %v4246_v8, %v875_v24 }
 0x194   : > { %1502 = vmatmul.mubr.f32.gmra.mrb[44].mxu0 %v1009_v44  ;;  %2016 = vmatmul.mubr.f32.gmra.mrb[44].mxu1 %v1009_v44  ;;  %v4591_v44 = vpop.eup %3211 }
 0x195   : > { %1507 = vmatprep.mubr.f32.mxu0 %v1014_v50  ;;  %2021 = vmatprep.mubr.f32.mxu1 %v1014_v50  ;;  %v4596_v50 = vpop.eup %3213  ;;  %v884_v57 = vmul.f32 %v3275_v54, %v4591_v44 }
 0x196   : > { %v4607_v32 = vpop.eup %3215 }
 0x197   : > { %v1034_v0 = vmul.f32 %v4243_v7, %v884_v57  ;;  %v892_v19 = vmul.f32 %v3279_v17, %v4607_v32  ;;  %v4615_v20 = vpop.eup %3217  ;;  %v891_v28 = vmul.f32 %v3280_v27, %v4607_v32 }
 0x198   : > { %1508 = vmatmul.mubr.f32.gmra.mrb[46].mxu0 %v1013_v61  ;;  %2022 = vmatmul.mubr.f32.gmra.mrb[46].mxu1 %v1013_v61  ;;  %v3276_v61 = vld [vmem:[%s3906_s7 + $0x380] sm:$0xff]  ;;  %v896_v34 = vmul.f32 %v3281_v33, %v4615_v20  ;;  %v3292_v33 = vld [vmem:[%s3906_s7 + $0x90] sm:$0xff] }
 0x199   : > { %1513 = vmatprep.mubr.f32.mxu0 %v1018_v5  ;;  %2027 = vmatprep.mubr.f32.mxu1 %v1018_v5  ;;  %v883_v63 = vmul.f32 %v3276_v61, %v4591_v44  ;;  %v888_v5 = vmul.f32 %v3277_v3, %v4596_v50  ;;  %v1041_v24 = vmul.f32 %v4246_v8, %v891_v28  ;;  %v3287_v3 = vld [vmem:[%s3906_s7 + $0x58] sm:$0xff] }
 0x19a   : > { %v1046_v41 = vmul.f32 %v4243_v7, %v896_v34  ;;  %v3291_v28 = vld [vmem:[%s3906_s7 + $0x98] sm:$0xff]  ;;  %v789_v34 = vmul.f32 %v3292_v33, %v4289_v58 }
 0x19b   : > { %v1033_v12 = vmul.f32 %v4246_v8, %v883_v63  ;;  %v1038_v16 = vmul.f32 %v4243_v7, %v888_v5  ;;  %v3305_v33 = vld [vmem:[%s3906_s7 + $0x178] sm:$0xff] }
 0x19c   : > { %1514 = vmatmul.mubr.f32.gmra.mrb[48].mxu0 %v1017_v15  ;;  %2028 = vmatmul.mubr.f32.gmra.mrb[48].mxu1 %v1017_v15  ;;  %v887_v15 = vmul.f32 %v3278_v14, %v4596_v50 }
 0x19d   : > { %1519 = vmatprep.mubr.f32.mxu0 %v1022_v22  ;;  %2033 = vmatprep.mubr.f32.mxu1 %v1022_v22 }
 0x19e   : > { %v1037_v22 = vmul.f32 %v4246_v8, %v887_v15 }
 0x1a0   : > { %1520 = vmatmul.mubr.f32.gmra.mrb[50].mxu0 %v1021_v31  ;;  %2034 = vmatmul.mubr.f32.gmra.mrb[50].mxu1 %v1021_v31  ;;  %v1042_v31 = vmul.f32 %v4243_v7, %v892_v19  ;;  %v3290_v19 = vld [vmem:[%s3906_s7 + $0x70] sm:$0xff] }
 0x1a1   : > { %1525 = vmatprep.mubr.f32.mxu0 %v1026_v37  ;;  %2039 = vmatprep.mubr.f32.mxu1 %v1026_v37  ;;  %v3282_v37 = vld [vmem:[%s3906_s7 + $0x3e0] sm:$0xff] }
 0x1a2   : > { %v895_v38 = vmul.f32 %v3282_v37, %v4615_v20  ;;  %v3293_v37 = vld [vmem:[%s3906_s7 + $0xb8] sm:$0xff] }
 0x1a4   : > { %1526 = vmatmul.mubr.f32.gmra.mrb[52].mxu0 %v1025_v35  ;;  %2040 = vmatmul.mubr.f32.gmra.mrb[52].mxu1 %v1025_v35  ;;  %v3283_v35 = vld [vmem:[%s3906_s7 + $0x18] sm:$0xff]  ;;  %v1045_v48 = vmul.f32 %v4246_v8, %v895_v38  ;;  %v3286_v8 = vld [vmem:[%s3906_s7 + $0x30] sm:$0xff]  ;;  %v939_v38 = vmul.f32 %v4205_v60, %v789_v34 }
 0x1a5   : > { %1531 = vmatprep.mubr.f32.mxu0 %v1030_v51  ;;  %2045 = vmatprep.mubr.f32.mxu1 %v1030_v51  ;;  %v774_v47 = vmul.f32 %v3283_v35, %v4250_v11  ;;  %v3284_v51 = vld [vmem:[%s3906_s7 + $0x10] sm:$0xff]  ;;  %v777_v63 = vmul.f32 %v3286_v8, %v4266_v30 }
 0x1a6   : > { %v773_v54 = vmul.f32 %v3284_v51, %v4250_v11  ;;  %v782_v11 = vmul.f32 %v3287_v3, %v4262_v25  ;;  %v3298_v8 = vld [vmem:[%s3906_s7 + $0xf0] sm:$0xff]  ;;  %v3299_v3 = vld [vmem:[%s3906_s7 + $0x118] sm:$0xff] }
 0x1a7   : > { %v924_v57 = vmul.f32 %v4211_v2, %v774_v47  ;;  %v927_v5 = vmul.f32 %v4205_v60, %v777_v63  ;;  %v801_v63 = vmul.f32 %v3298_v8, %v4339_v10 }
 0x1a8   : > { %1532 = vmatmul.mubr.f32.gmra.mrb[54].mxu0 %v1029_v52  ;;  %2046 = vmatmul.mubr.f32.gmra.mrb[54].mxu1 %v1029_v52  ;;  %v3285_v52 = vld [vmem:[%s3906_s7 + $0x38] sm:$0xff]  ;;  %v923_v7 = vmul.f32 %v4205_v60, %v773_v54  ;;  %v932_v15 = vmul.f32 %v4211_v2, %v782_v11  ;;  %v3296_v54 = vld [vmem:[%s3906_s7 + $0xd0] sm:$0xff] }
 0x1a9   : > { %1537 = vmatprep.mubr.f32.mxu0 %v1034_v0  ;;  %2051 = vmatprep.mubr.f32.mxu1 %v1034_v0  ;;  %v778_v61 = vmul.f32 %v3285_v52, %v4266_v30  ;;  %v951_v11 = vmul.f32 %v4205_v60, %v801_v63 }
 0x1ab   : > { %v928_v0 = vmul.f32 %v4211_v2, %v778_v61  ;;  %v3297_v61 = vld [vmem:[%s3906_s7 + $0xf8] sm:$0xff] }
 0x1ac   : > { %1538 = vmatmul.mubr.f32.gmra.mrb[56].mxu0 %v1033_v12  ;;  %2052 = vmatmul.mubr.f32.gmra.mrb[56].mxu1 %v1033_v12  ;;  %v3288_v12 = vld [vmem:[%s3906_s7 + $0x50] sm:$0xff] }
 0x1ad   : > { %1543 = vmatprep.mubr.f32.mxu0 %v1038_v16  ;;  %2057 = vmatprep.mubr.f32.mxu1 %v1038_v16  ;;  %v781_v14 = vmul.f32 %v3288_v12, %v4262_v25  ;;  %v3289_v16 = vld [vmem:[%s3906_s7 + $0x78] sm:$0xff]  ;;  %v790_v25 = vmul.f32 %v3291_v28, %v4289_v58  ;;  %v3304_v28 = vld [vmem:[%s3906_s7 + $0x150] sm:$0xff] }
 0x1ae   : > { %v786_v30 = vmul.f32 %v3289_v16, %v4284_v49 }
 0x1af   : > { %v931_v17 = vmul.f32 %v4205_v60, %v781_v14 }
 0x1b0   : > { %1544 = vmatmul.mubr.f32.gmra.mrb[58].mxu0 %v1037_v22  ;;  %2058 = vmatmul.mubr.f32.gmra.mrb[58].mxu1 %v1037_v22  ;;  %v785_v22 = vmul.f32 %v3290_v19, %v4284_v49  ;;  %v936_v27 = vmul.f32 %v4211_v2, %v786_v30  ;;  %v794_v49 = vmul.f32 %v3293_v37, %v4307_v55  ;;  %v3302_v30 = vld [vmem:[%s3906_s7 + $0x130] sm:$0xff] }
 0x1b1   : > { %1549 = vmatprep.mubr.f32.mxu0 %v1042_v31  ;;  %2063 = vmatprep.mubr.f32.mxu1 %v1042_v31 }
 0x1b2   : > { %v935_v31 = vmul.f32 %v4205_v60, %v785_v22  ;;  %v944_v47 = vmul.f32 %v4211_v2, %v794_v49  ;;  %v3303_v22 = vld [vmem:[%s3906_s7 + $0x158] sm:$0xff] }
 0x1b4   : > { %1550 = vmatmul.mubr.f32.gmra.mrb[60].mxu0 %v1041_v24  ;;  %2064 = vmatmul.mubr.f32.gmra.mrb[60].mxu1 %v1041_v24  ;;  %v940_v24 = vmul.f32 %v4211_v2, %v790_v25  ;;  %v813_v25 = vmul.f32 %v3304_v28, %v4387_v26 }
 0x1b5   : > { %1555 = vmatprep.mubr.f32.mxu0 %v1046_v41  ;;  %2069 = vmatprep.mubr.f32.mxu1 %v1046_v41  ;;  %v3294_v41 = vld [vmem:[%s3906_s7 + $0xb0] sm:$0xff] }
 0x1b6   : > { %v793_v35 = vmul.f32 %v3294_v41, %v4307_v55  ;;  %v802_v55 = vmul.f32 %v3297_v61, %v4339_v10  ;;  %v963_v34 = vmul.f32 %v4205_v60, %v813_v25  ;;  %v3311_v61 = vld [vmem:[%s3906_s7 + $0x1d8] sm:$0xff]  ;;  %v3320_v25 = vld [vmem:[%s3906_s7 + $0x250] sm:$0xff] }
 0x1b8   : > { %1556 = vmatmul.mubr.f32.gmra.mrb[62].mxu0 %v1045_v48  ;;  %2070 = vmatmul.mubr.f32.gmra.mrb[62].mxu1 %v1045_v48  ;;  %v3295_v48 = vld [vmem:[%s3906_s7 + $0xd8] sm:$0xff]  ;;  %v943_v51 = vmul.f32 %v4205_v60, %v793_v35  ;;  %v3308_v35 = vld [vmem:[%s3906_s7 + $0x190] sm:$0xff] }
 0x1b9   : > { %1626 = vmatprep.mubr.f32.mxu0 %v924_v57  ;;  %2140 = vmatprep.mubr.f32.mxu1 %v924_v57  ;;  %v798_v58 = vmul.f32 %v3295_v48, %v4323_v45  ;;  %v797_v57 = vmul.f32 %v3296_v54, %v4323_v45  ;;  %v806_v45 = vmul.f32 %v3299_v3, %v4355_v36  ;;  %v3310_v54 = vld [vmem:[%s3906_s7 + $0x1b0] sm:$0xff] }
 0x1bb   : > { %v948_v52 = vmul.f32 %v4211_v2, %v798_v58  ;;  %v956_v14 = vmul.f32 %v4211_v2, %v806_v45  ;;  %v3309_v58 = vld [vmem:[%s3906_s7 + $0x1b8] sm:$0xff]  ;;  %v3314_v45 = vld [vmem:[%s3906_s7 + $0x1f0] sm:$0xff] }
 0x1bc   : > { %1627 = vmatmul.mubr.f32.vlgmr.msra.gmra.mrb[0].mxu0 %v923_v7  ;;  %2141 = vmatmul.mubr.f32.vlgmr.msra.gmra.mrb[0].mxu1 %v923_v7  ;;  %v947_v7 = vmul.f32 %v4205_v60, %v797_v57  ;;  %v825_v57 = vmul.f32 %v3310_v54, %v4435_v46 }
 0x1bd   : > { %1632 = vmatprep.mubr.f32.mxu0 %v928_v0  ;;  %2146 = vmatprep.mubr.f32.mxu1 %v928_v0  ;;  %v952_v0 = vmul.f32 %v4211_v2, %v802_v55 }
 0x1be   : > { %v975_v55 = vmul.f32 %v4205_v60, %v825_v57  ;;  %v3327_v57 = vld [vmem:[%s3906_s7 + $0x2d8] sm:$0xff] }
 0x1c0   : > { %1633 = vmatmul.mubr.f32.gmra.mrb[2].mxu0 %v927_v5  ;;  %2147 = vmatmul.mubr.f32.gmra.mrb[2].mxu1 %v927_v5  ;;  %v3300_v5 = vld [vmem:[%s3906_s7 + $0x110] sm:$0xff] }
 0x1c1   : > { %1638 = vmatprep.mubr.f32.mxu0 %v932_v15  ;;  %2152 = vmatprep.mubr.f32.mxu1 %v932_v15  ;;  %v805_v12 = vmul.f32 %v3300_v5, %v4355_v36  ;;  %v3301_v15 = vld [vmem:[%s3906_s7 + $0x138] sm:$0xff]  ;;  %v814_v36 = vmul.f32 %v3303_v22, %v4387_v26 }
 0x1c2   : > { %v810_v10 = vmul.f32 %v3301_v15, %v4371_v62  ;;  %v3316_v15 = vld [vmem:[%s3906_s7 + $0x210] sm:$0xff] }
 0x1c3   : > { %v955_v16 = vmul.f32 %v4205_v60, %v805_v12  ;;  %v3315_v12 = vld [vmem:[%s3906_s7 + $0x218] sm:$0xff] }
 0x1c4   : > { %1639 = vmatmul.mubr.f32.gmra.mrb[4].mxu0 %v931_v17  ;;  %2153 = vmatmul.mubr.f32.gmra.mrb[4].mxu1 %v931_v17  ;;  %v809_v17 = vmul.f32 %v3302_v30, %v4371_v62  ;;  %v960_v19 = vmul.f32 %v4211_v2, %v810_v10  ;;  %v818_v62 = vmul.f32 %v3305_v33, %v4403_v53  ;;  %v3317_v30 = vld [vmem:[%s3906_s7 + $0x238] sm:$0xff] }
 0x1c5   : > { %1644 = vmatprep.mubr.f32.mxu0 %v936_v27  ;;  %2158 = vmatprep.mubr.f32.mxu1 %v936_v27  ;;  %v837_v10 = vmul.f32 %v3316_v15, %v4483_v13  ;;  %v3334_v15 = vld [vmem:[%s3906_s7 + $0x330] sm:$0xff] }
 0x1c6   : > { %v959_v27 = vmul.f32 %v4205_v60, %v809_v17  ;;  %v968_v49 = vmul.f32 %v4211_v2, %v818_v62  ;;  %v3321_v62 = vld [vmem:[%s3906_s7 + $0x278] sm:$0xff] }
 0x1c7   : > { %v987_v17 = vmul.f32 %v4205_v60, %v837_v10  ;;  %v873_v10 = vmul.f32 %v3334_v15, %v4567_v59 }
 0x1c8   : > { %1645 = vmatmul.mubr.f32.gmra.mrb[6].mxu0 %v935_v31  ;;  %2159 = vmatmul.mubr.f32.gmra.mrb[6].mxu1 %v935_v31  ;;  %v964_v31 = vmul.f32 %v4211_v2, %v814_v36 }
 0x1c9   : > { %1650 = vmatprep.mubr.f32.mxu0 %v940_v24  ;;  %2164 = vmatprep.mubr.f32.mxu1 %v940_v24  ;;  %v3306_v24 = vld [vmem:[%s3906_s7 + $0x170] sm:$0xff] }
 0x1ca   : > { %v817_v37 = vmul.f32 %v3306_v24, %v4403_v53  ;;  %v826_v53 = vmul.f32 %v3309_v58, %v4435_v46  ;;  %v3322_v24 = vld [vmem:[%s3906_s7 + $0x270] sm:$0xff] }
 0x1cc   : > { %1651 = vmatmul.mubr.f32.gmra.mrb[8].mxu0 %v939_v38  ;;  %2165 = vmatmul.mubr.f32.gmra.mrb[8].mxu1 %v939_v38  ;;  %v3307_v38 = vld [vmem:[%s3906_s7 + $0x198] sm:$0xff]  ;;  %v967_v41 = vmul.f32 %v4205_v60, %v817_v37  ;;  %v849_v37 = vmul.f32 %v3322_v24, %v4519_v23 }
 0x1cd   : > { %1656 = vmatprep.mubr.f32.mxu0 %v944_v47  ;;  %2170 = vmatprep.mubr.f32.mxu1 %v944_v47  ;;  %v822_v26 = vmul.f32 %v3307_v38, %v4419_v18  ;;  %v821_v47 = vmul.f32 %v3308_v35, %v4419_v18  ;;  %v830_v18 = vmul.f32 %v3311_v61, %v4451_v9  ;;  %v3323_v38 = vld [vmem:[%s3906_s7 + $0x298] sm:$0xff]  ;;  %v3328_v61 = vld [vmem:[%s3906_s7 + $0x2d0] sm:$0xff] }
 0x1ce   : > { %v3341_v24 = vld [vmem:[%s3906_s7 + $0x3b8] sm:$0xff] }
 0x1cf   : > { %v972_v48 = vmul.f32 %v4211_v2, %v822_v26  ;;  %v980_v63 = vmul.f32 %v4211_v2, %v830_v18  ;;  %v999_v26 = vmul.f32 %v4205_v60, %v849_v37  ;;  %v861_v18 = vmul.f32 %v3328_v61, %v4543_v1 }
 0x1d0   : > { %1657 = vmatmul.mubr.f32.gmra.mrb[10].mxu0 %v943_v51  ;;  %2171 = vmatmul.mubr.f32.gmra.mrb[10].mxu1 %v943_v51  ;;  %v971_v51 = vmul.f32 %v4205_v60, %v821_v47 }
 0x1d1   : > { %1662 = vmatprep.mubr.f32.mxu0 %v948_v52  ;;  %2176 = vmatprep.mubr.f32.mxu1 %v948_v52  ;;  %v976_v52 = vmul.f32 %v4211_v2, %v826_v53  ;;  %v3326_v53 = vld [vmem:[%s3906_s7 + $0x2b0] sm:$0xff] }
 0x1d4   : > { %1663 = vmatmul.mubr.f32.gmra.mrb[12].mxu0 %v947_v7  ;;  %2177 = vmatmul.mubr.f32.gmra.mrb[12].mxu1 %v947_v7  ;;  %v3312_v7 = vld [vmem:[%s3906_s7 + $0x1d0] sm:$0xff] }
 0x1d5   : > { %1668 = vmatprep.mubr.f32.mxu0 %v952_v0  ;;  %2182 = vmatprep.mubr.f32.mxu1 %v952_v0  ;;  %v829_v8 = vmul.f32 %v3312_v7, %v4451_v9  ;;  %v3313_v0 = vld [vmem:[%s3906_s7 + $0x1f8] sm:$0xff]  ;;  %v838_v9 = vmul.f32 %v3315_v12, %v4483_v13 }
 0x1d6   : > { %v834_v46 = vmul.f32 %v3313_v0, %v4467_v43  ;;  %v3329_v7 = vld [vmem:[%s3906_s7 + $0x2f8] sm:$0xff] }
 0x1d7   : > { %v979_v3 = vmul.f32 %v4205_v60, %v829_v8  ;;  %v1011_v8 = vmul.f32 %v4205_v60, %v861_v18 }
 0x1d8   : > { %1669 = vmatmul.mubr.f32.gmra.mrb[14].mxu0 %v951_v11  ;;  %2183 = vmatmul.mubr.f32.gmra.mrb[14].mxu1 %v951_v11  ;;  %v833_v11 = vmul.f32 %v3314_v45, %v4467_v43  ;;  %v984_v5 = vmul.f32 %v4211_v2, %v834_v46  ;;  %v842_v43 = vmul.f32 %v3317_v30, %v4499_v42  ;;  %v3335_v30 = vld [vmem:[%s3906_s7 + $0x358] sm:$0xff] }
 0x1d9   : > { %1674 = vmatprep.mubr.f32.mxu0 %v956_v14  ;;  %2188 = vmatprep.mubr.f32.mxu1 %v956_v14 }
 0x1da   : > { %v983_v14 = vmul.f32 %v4205_v60, %v833_v11  ;;  %v992_v36 = vmul.f32 %v4211_v2, %v842_v43  ;;  %v3332_v11 = vld [vmem:[%s3906_s7 + $0x310] sm:$0xff]  ;;  %v1023_v43 = vmul.f32 %v4205_v60, %v873_v10 }
 0x1dc   : > { %1675 = vmatmul.mubr.f32.gmra.mrb[16].mxu0 %v955_v16  ;;  %2189 = vmatmul.mubr.f32.gmra.mrb[16].mxu1 %v955_v16  ;;  %v988_v16 = vmul.f32 %v4211_v2, %v838_v9  ;;  %v3333_v9 = vld [vmem:[%s3906_s7 + $0x338] sm:$0xff] }
 0x1dd   : > { %1680 = vmatprep.mubr.f32.mxu0 %v960_v19  ;;  %2194 = vmatprep.mubr.f32.mxu1 %v960_v19  ;;  %v3318_v19 = vld [vmem:[%s3906_s7 + $0x230] sm:$0xff] }
 0x1de   : > { %v841_v22 = vmul.f32 %v3318_v19, %v4499_v42  ;;  %v850_v42 = vmul.f32 %v3321_v62, %v4519_v23  ;;  %v3340_v62 = vld [vmem:[%s3906_s7 + $0x390] sm:$0xff] }
 0x1e0   : > { %1681 = vmatmul.mubr.f32.gmra.mrb[18].mxu0 %v959_v27  ;;  %2195 = vmatmul.mubr.f32.gmra.mrb[18].mxu1 %v959_v27  ;;  %v3319_v27 = vld [vmem:[%s3906_s7 + $0x258] sm:$0xff]  ;;  %v991_v28 = vmul.f32 %v4205_v60, %v841_v22 }
 0x1e1   : > { %1686 = vmatprep.mubr.f32.mxu0 %v964_v31  ;;  %2200 = vmatprep.mubr.f32.mxu1 %v964_v31  ;;  %v846_v13 = vmul.f32 %v3319_v27, %v4511_v6  ;;  %v845_v31 = vmul.f32 %v3320_v25, %v4511_v6  ;;  %v854_v6 = vmul.f32 %v3323_v38, %v4527_v39 }
 0x1e3   : > { %v996_v33 = vmul.f32 %v4211_v2, %v846_v13  ;;  %v1004_v47 = vmul.f32 %v4211_v2, %v854_v6  ;;  %v3338_v13 = vld [vmem:[%s3906_s7 + $0x370] sm:$0xff] }
 0x1e4   : > { %1687 = vmatmul.mubr.f32.gmra.mrb[20].mxu0 %v963_v34  ;;  %2201 = vmatmul.mubr.f32.gmra.mrb[20].mxu1 %v963_v34  ;;  %v995_v34 = vmul.f32 %v4205_v60, %v845_v31  ;;  %v3339_v31 = vld [vmem:[%s3906_s7 + $0x398] sm:$0xff] }
 0x1e5   : > { %1692 = vmatprep.mubr.f32.mxu0 %v968_v49  ;;  %2206 = vmatprep.mubr.f32.mxu1 %v968_v49  ;;  %v1000_v49 = vmul.f32 %v4211_v2, %v850_v42  ;;  %v885_v42 = vmul.f32 %v3340_v62, %v4591_v44 }
 0x1e7   : > { %v1035_v37 = vmul.f32 %v4205_v60, %v885_v42 }
 0x1e8   : > { %1693 = vmatmul.mubr.f32.gmra.mrb[22].mxu0 %v967_v41  ;;  %2207 = vmatmul.mubr.f32.gmra.mrb[22].mxu1 %v967_v41  ;;  %v3324_v41 = vld [vmem:[%s3906_s7 + $0x290] sm:$0xff] }
 0x1e9   : > { %1698 = vmatprep.mubr.f32.mxu0 %v972_v48  ;;  %2212 = vmatprep.mubr.f32.mxu1 %v972_v48  ;;  %v853_v35 = vmul.f32 %v3324_v41, %v4527_v39  ;;  %v3325_v48 = vld [vmem:[%s3906_s7 + $0x2b8] sm:$0xff]  ;;  %v862_v39 = vmul.f32 %v3327_v57, %v4543_v1 }
 0x1ea   : > { %v858_v23 = vmul.f32 %v3325_v48, %v4535_v56 }
 0x1eb   : > { %v1003_v58 = vmul.f32 %v4205_v60, %v853_v35  ;;  %v3344_v35 = vld [vmem:[%s3906_s7 + $0x3d0] sm:$0xff] }
 0x1ec   : > { %1699 = vmatmul.mubr.f32.gmra.mrb[24].mxu0 %v971_v51  ;;  %2213 = vmatmul.mubr.f32.gmra.mrb[24].mxu1 %v971_v51  ;;  %v857_v51 = vmul.f32 %v3326_v53, %v4535_v56  ;;  %v1008_v54 = vmul.f32 %v4211_v2, %v858_v23  ;;  %v866_v56 = vmul.f32 %v3329_v7, %v4551_v21  ;;  %v3345_v23 = vld [vmem:[%s3906_s7 + $0x3f8] sm:$0xff]  ;;  %v3346_v53 = vld [vmem:[%s3906_s7 + $0x3f0] sm:$0xff] }
 0x1ed   : > { %1704 = vmatprep.mubr.f32.mxu0 %v976_v52  ;;  %2218 = vmatprep.mubr.f32.mxu1 %v976_v52 }
 0x1ee   : > { %v1007_v52 = vmul.f32 %v4205_v60, %v857_v51  ;;  %v1016_v46 = vmul.f32 %v4211_v2, %v866_v56  ;;  %v897_v51 = vmul.f32 %v3346_v53, %v4615_v20 }
 0x1f0   : > { %1705 = vmatmul.mubr.f32.gmra.mrb[26].mxu0 %v975_v55  ;;  %2219 = vmatmul.mubr.f32.gmra.mrb[26].mxu1 %v975_v55  ;;  %v1012_v55 = vmul.f32 %v4211_v2, %v862_v39 }
 0x1f1   : > { %1710 = vmatprep.mubr.f32.mxu0 %v980_v63  ;;  %2224 = vmatprep.mubr.f32.mxu1 %v980_v63  ;;  %v3330_v63 = vld [vmem:[%s3906_s7 + $0x2f0] sm:$0xff] }
 0x1f2   : > { %v865_v0 = vmul.f32 %v3330_v63, %v4551_v21  ;;  %v874_v21 = vmul.f32 %v3333_v9, %v4567_v59 }
 0x1f4   : > { %1711 = vmatmul.mubr.f32.gmra.mrb[28].mxu0 %v979_v3  ;;  %2225 = vmatmul.mubr.f32.gmra.mrb[28].mxu1 %v979_v3  ;;  %v3331_v3 = vld [vmem:[%s3906_s7 + $0x318] sm:$0xff]  ;;  %v1015_v45 = vmul.f32 %v4205_v60, %v865_v0 }
 0x1f5   : > { %1716 = vmatprep.mubr.f32.mxu0 %v984_v5  ;;  %2230 = vmatprep.mubr.f32.mxu1 %v984_v5  ;;  %v870_v1 = vmul.f32 %v3331_v3, %v4559_v40  ;;  %v869_v5 = vmul.f32 %v3332_v11, %v4559_v40  ;;  %v878_v40 = vmul.f32 %v3335_v30, %v4572_v4 }
 0x1f7   : > { %v1020_v12 = vmul.f32 %v4211_v2, %v870_v1  ;;  %v1028_v22 = vmul.f32 %v4211_v2, %v878_v40 }
 0x1f8   : > { %1717 = vmatmul.mubr.f32.gmra.mrb[30].mxu0 %v983_v14  ;;  %2231 = vmatmul.mubr.f32.gmra.mrb[30].mxu1 %v983_v14  ;;  %v1019_v14 = vmul.f32 %v4205_v60, %v869_v5 }
 0x1f9   : > { %1722 = vmatprep.mubr.f32.mxu0 %v988_v16  ;;  %2236 = vmatprep.mubr.f32.mxu1 %v988_v16  ;;  %v1024_v16 = vmul.f32 %v4211_v2, %v874_v21 }
 0x1fc   : > { %1723 = vmatmul.mubr.f32.gmra.mrb[32].mxu0 %v987_v17  ;;  %2237 = vmatmul.mubr.f32.gmra.mrb[32].mxu1 %v987_v17  ;;  %v3336_v17 = vld [vmem:[%s3906_s7 + $0x350] sm:$0xff] }
 0x1fd   : > { %1728 = vmatprep.mubr.f32.mxu0 %v992_v36  ;;  %2242 = vmatprep.mubr.f32.mxu1 %v992_v36  ;;  %v877_v19 = vmul.f32 %v3336_v17, %v4572_v4  ;;  %v3337_v36 = vld [vmem:[%s3906_s7 + $0x378] sm:$0xff]  ;;  %v886_v4 = vmul.f32 %v3339_v31, %v4591_v44 }
 0x1fe   : > { %v882_v59 = vmul.f32 %v3337_v36, %v4583_v29 }
 0x1ff   : > { %v1027_v27 = vmul.f32 %v4205_v60, %v877_v19 }
 0x200   : > { %1729 = vmatmul.mubr.f32.gmra.mrb[34].mxu0 %v991_v28  ;;  %2243 = vmatmul.mubr.f32.gmra.mrb[34].mxu1 %v991_v28  ;;  %v881_v28 = vmul.f32 %v3338_v13, %v4583_v29  ;;  %v1032_v25 = vmul.f32 %v4211_v2, %v882_v59  ;;  %v890_v29 = vmul.f32 %v3341_v24, %v4596_v50 }
 0x201   : > { %1734 = vmatprep.mubr.f32.mxu0 %v996_v33  ;;  %2248 = vmatprep.mubr.f32.mxu1 %v996_v33 }
 0x202   : > { %v1031_v33 = vmul.f32 %v4205_v60, %v881_v28  ;;  %v1040_v6 = vmul.f32 %v4211_v2, %v890_v29 }
 0x204   : > { %1735 = vmatmul.mubr.f32.gmra.mrb[36].mxu0 %v995_v34  ;;  %2249 = vmatmul.mubr.f32.gmra.mrb[36].mxu1 %v995_v34  ;;  %v1036_v34 = vmul.f32 %v4211_v2, %v886_v4 }
 0x205   : > { %1740 = vmatprep.mubr.f32.mxu0 %v1000_v49  ;;  %2254 = vmatprep.mubr.f32.mxu1 %v1000_v49  ;;  %v3342_v49 = vld [vmem:[%s3906_s7 + $0x3b0] sm:$0xff] }
 0x206   : > { %v889_v38 = vmul.f32 %v3342_v49, %v4596_v50  ;;  %v898_v50 = vmul.f32 %v3345_v23, %v4615_v20 }
 0x208   : > { %1741 = vmatmul.mubr.f32.gmra.mrb[38].mxu0 %v999_v26  ;;  %2255 = vmatmul.mubr.f32.gmra.mrb[38].mxu1 %v999_v26  ;;  %v3343_v26 = vld [vmem:[%s3906_s7 + $0x3d8] sm:$0xff]  ;;  %v1039_v41 = vmul.f32 %v4205_v60, %v889_v38  ;;  %s3597_s7 = smov [#allocation8]  }
 0x209   : > { %1746 = vmatprep.mubr.f32.mxu0 %v1004_v47  ;;  %2260 = vmatprep.mubr.f32.mxu1 %v1004_v47  ;;  %v894_v44 = vmul.f32 %v3343_v26, %v4607_v32  ;;  %v893_v47 = vmul.f32 %v3344_v35, %v4607_v32  ;;  %v1047_v32 = vmul.f32 %v4205_v60, %v897_v51  ;;  %s3439_s10 = sshll.u32 %s3597_s7, 4  ;;  %s3440_s10 = int_to_ptr.vmem [resolvable:$false] %s3439_s10 }
 0x20a   : > { %s3441_s28 = scalar_lea.vmem %s3440_s10, 32768  ;;  %p3442_p0 = scmp.lt.s32.totalorder %s4952_s6, %s3440_s10 }
 0x20b   : > { %v1044_v48 = vmul.f32 %v4211_v2, %v894_v44  ;;  %p3443_p5 = scmp.lt.s32.totalorder %s3441_s28, %s3435_s27 }
 0x20c   : > { %1747 = vmatmul.mubr.f32.gmra.mrb[40].mxu0 %v1003_v58  ;;  %2261 = vmatmul.mubr.f32.gmra.mrb[40].mxu1 %v1003_v58  ;;  %v1043_v58 = vmul.f32 %v4205_v60, %v893_v47 }
 0x20d   : > { %1752 = vmatprep.mubr.f32.mxu0 %v1008_v54  ;;  %2266 = vmatprep.mubr.f32.mxu1 %v1008_v54  ;;  %v1048_v54 = vmul.f32 %v4211_v2, %v898_v50  ;;  %p3444_p12 = por %p3443_p5, %p3442_p0 }
 0x20f   : > { %p3445_p13 = pnand %p3444_p12, %p3438_p8 }
 0x210   : > { %1753 = vmatmul.mubr.f32.gmra.mrb[42].mxu0 %v1007_v52  ;;  %2267 = vmatmul.mubr.f32.gmra.mrb[42].mxu1 %v1007_v52 }
 0x211   : > { %1758 = vmatprep.mubr.f32.mxu0 %v1012_v55  ;;  %2272 = vmatprep.mubr.f32.mxu1 %v1012_v55 }
 0x214   : > { %1759 = vmatmul.mubr.f32.gmra.mrb[44].mxu0 %v1011_v8  ;;  %2273 = vmatmul.mubr.f32.gmra.mrb[44].mxu1 %v1011_v8 }
 0x215   : > { %1764 = vmatprep.mubr.f32.mxu0 %v1016_v46  ;;  %2278 = vmatprep.mubr.f32.mxu1 %v1016_v46 }
 0x218   : > { %1765 = vmatmul.mubr.f32.gmra.mrb[46].mxu0 %v1015_v45  ;;  %2279 = vmatmul.mubr.f32.gmra.mrb[46].mxu1 %v1015_v45 }
 0x219   : > { %1770 = vmatprep.mubr.f32.mxu0 %v1020_v12  ;;  %2284 = vmatprep.mubr.f32.mxu1 %v1020_v12 }
 0x21c   : > { %1771 = vmatmul.mubr.f32.gmra.mrb[48].mxu0 %v1019_v14  ;;  %2285 = vmatmul.mubr.f32.gmra.mrb[48].mxu1 %v1019_v14 }
 0x21d   : > { %1776 = vmatprep.mubr.f32.mxu0 %v1024_v16  ;;  %2290 = vmatprep.mubr.f32.mxu1 %v1024_v16 }
 0x220   : > { %1777 = vmatmul.mubr.f32.gmra.mrb[50].mxu0 %v1023_v43  ;;  %2291 = vmatmul.mubr.f32.gmra.mrb[50].mxu1 %v1023_v43 }
 0x221   : > { %1782 = vmatprep.mubr.f32.mxu0 %v1028_v22  ;;  %2296 = vmatprep.mubr.f32.mxu1 %v1028_v22 }
 0x224   : > { %1783 = vmatmul.mubr.f32.gmra.mrb[52].mxu0 %v1027_v27  ;;  %2297 = vmatmul.mubr.f32.gmra.mrb[52].mxu1 %v1027_v27 }
 0x225   : > { %1788 = vmatprep.mubr.f32.mxu0 %v1032_v25  ;;  %2302 = vmatprep.mubr.f32.mxu1 %v1032_v25 }
 0x228   : > { %1789 = vmatmul.mubr.f32.gmra.mrb[54].mxu0 %v1031_v33  ;;  %2303 = vmatmul.mubr.f32.gmra.mrb[54].mxu1 %v1031_v33 }
 0x229   : > { %1794 = vmatprep.mubr.f32.mxu0 %v1036_v34  ;;  %2308 = vmatprep.mubr.f32.mxu1 %v1036_v34 }
 0x22c   : > { %1795 = vmatmul.mubr.f32.gmra.mrb[56].mxu0 %v1035_v37  ;;  %2309 = vmatmul.mubr.f32.gmra.mrb[56].mxu1 %v1035_v37 }
 0x22d   : > { %1800 = vmatprep.mubr.f32.mxu0 %v1040_v6  ;;  %2314 = vmatprep.mubr.f32.mxu1 %v1040_v6 }
 0x230   : > { %1801 = vmatmul.mubr.f32.gmra.mrb[58].mxu0 %v1039_v41  ;;  %2315 = vmatmul.mubr.f32.gmra.mrb[58].mxu1 %v1039_v41 }
 0x231   : > { %1806 = vmatprep.mubr.f32.mxu0 %v1044_v48  ;;  %2320 = vmatprep.mubr.f32.mxu1 %v1044_v48 }
 0x234   : > { %1807 = vmatmul.mubr.f32.gmra.mrb[60].mxu0 %v1043_v58  ;;  %2321 = vmatmul.mubr.f32.gmra.mrb[60].mxu1 %v1043_v58 }
 0x235   : > { %1812 = vmatprep.mubr.f32.mxu0 %v1048_v54  ;;  %2326 = vmatprep.mubr.f32.mxu1 %v1048_v54 }
 0x238   : > { %1813 = vmatmul.mubr.f32.gmra.mrb[62].mxu0 %v1047_v32  ;;  %2327 = vmatmul.mubr.f32.gmra.mrb[62].mxu1 %v1047_v32 }
 0x28f   : > { %v1628_v57 = vpop.f32.mrb[0].mxu0  ;;  %v2142_v39 = vpop.f32.mrb[0].mxu1 }
 0x290   : > { %2333 = vst [vmem:[%s4823_s18] sm:$0xff] %v1628_v57  ;;  %2335 = vst [vmem:[%s4823_s18 + $0x10] sm:$0xff] %v2142_v39  ;;  %v1630_v60 = vpop.f32.mrb[1].mxu0  ;;  %v2144_v2 = vpop.f32.mrb[1].mxu1 }
 0x291   : > { %2334 = vst [vmem:[%s4823_s18 + $0x8] sm:$0xff] %v1630_v60  ;;  %2336 = vst [vmem:[%s4823_s18 + $0x18] sm:$0xff] %v2144_v2 }
 0x293   : > { %v1634_v20 = vpop.f32.mrb[2].mxu0  ;;  %v2148_v52 = vpop.f32.mrb[2].mxu1 }
 0x294   : > { %2337 = vst [vmem:[%s4823_s18 + $0x20] sm:$0xff] %v1634_v20  ;;  %2339 = vst [vmem:[%s4823_s18 + $0x30] sm:$0xff] %v2148_v52  ;;  %v1636_v61 = vpop.f32.mrb[3].mxu0  ;;  %v2150_v18 = vpop.f32.mrb[3].mxu1 }
 0x295   : > { %2338 = vst [vmem:[%s4823_s18 + $0x28] sm:$0xff] %v1636_v61  ;;  %2340 = vst [vmem:[%s4823_s18 + $0x38] sm:$0xff] %v2150_v18 }
 0x297   : > { %v1640_v55 = vpop.f32.mrb[4].mxu0  ;;  %v2154_v7 = vpop.f32.mrb[4].mxu1 }
 0x298   : > { %2341 = vst [vmem:[%s4823_s18 + $0x40] sm:$0xff] %v1640_v55  ;;  %2343 = vst [vmem:[%s4823_s18 + $0x50] sm:$0xff] %v2154_v7  ;;  %v1642_v56 = vpop.f32.mrb[5].mxu0  ;;  %v2156_v8 = vpop.f32.mrb[5].mxu1 }
 0x299   : > { %2342 = vst [vmem:[%s4823_s18 + $0x48] sm:$0xff] %v1642_v56  ;;  %2344 = vst [vmem:[%s4823_s18 + $0x58] sm:$0xff] %v2156_v8 }
 0x29b   : > { %v1646_v63 = vpop.f32.mrb[6].mxu0  ;;  %v2160_v0 = vpop.f32.mrb[6].mxu1 }
 0x29c   : > { %2345 = vst [vmem:[%s4823_s18 + $0x60] sm:$0xff] %v1646_v63  ;;  %2347 = vst [vmem:[%s4823_s18 + $0x70] sm:$0xff] %v2160_v0  ;;  %v1648_v46 = vpop.f32.mrb[7].mxu0  ;;  %v2162_v3 = vpop.f32.mrb[7].mxu1 }
 0x29d   : > { %2346 = vst [vmem:[%s4823_s18 + $0x68] sm:$0xff] %v1648_v46  ;;  %2348 = vst [vmem:[%s4823_s18 + $0x78] sm:$0xff] %v2162_v3 }
 0x29f   : > { %v1652_v1 = vpop.f32.mrb[8].mxu0  ;;  %v2166_v45 = vpop.f32.mrb[8].mxu1 }
 0x2a0   : > { %2349 = vst [vmem:[%s4823_s18 + $0x80] sm:$0xff] %v1652_v1  ;;  %2351 = vst [vmem:[%s4823_s18 + $0x90] sm:$0xff] %v2166_v45  ;;  %v1654_v11 = vpop.f32.mrb[9].mxu0  ;;  %v2168_v5 = vpop.f32.mrb[9].mxu1 }
 0x2a1   : > { %2350 = vst [vmem:[%s4823_s18 + $0x88] sm:$0xff] %v1654_v11  ;;  %2352 = vst [vmem:[%s4823_s18 + $0x98] sm:$0xff] %v2168_v5 }
 0x2a3   : > { %v1658_v12 = vpop.f32.mrb[10].mxu0  ;;  %v2172_v9 = vpop.f32.mrb[10].mxu1 }
 0x2a4   : > { %2353 = vst [vmem:[%s4823_s18 + $0xa0] sm:$0xff] %v1658_v12  ;;  %2355 = vst [vmem:[%s4823_s18 + $0xb0] sm:$0xff] %v2172_v9  ;;  %v1660_v21 = vpop.f32.mrb[11].mxu0  ;;  %v2174_v14 = vpop.f32.mrb[11].mxu1 }
 0x2a5   : > { %2354 = vst [vmem:[%s4823_s18 + $0xa8] sm:$0xff] %v1660_v21  ;;  %2356 = vst [vmem:[%s4823_s18 + $0xb8] sm:$0xff] %v2174_v14 }
 0x2a7   : > { %v1664_v15 = vpop.f32.mrb[12].mxu0  ;;  %v2178_v10 = vpop.f32.mrb[12].mxu1 }
 0x2a8   : > { %2357 = vst [vmem:[%s4823_s18 + $0xc0] sm:$0xff] %v1664_v15  ;;  %2359 = vst [vmem:[%s4823_s18 + $0xd0] sm:$0xff] %v2178_v10  ;;  %v1666_v16 = vpop.f32.mrb[13].mxu0  ;;  %v2180_v30 = vpop.f32.mrb[13].mxu1 }
 0x2a9   : > { %2358 = vst [vmem:[%s4823_s18 + $0xc8] sm:$0xff] %v1666_v16  ;;  %2360 = vst [vmem:[%s4823_s18 + $0xd8] sm:$0xff] %v2180_v30 }
 0x2ab   : > { %v1670_v40 = vpop.f32.mrb[14].mxu0  ;;  %v2184_v43 = vpop.f32.mrb[14].mxu1 }
 0x2ac   : > { %2361 = vst [vmem:[%s4823_s18 + $0xe0] sm:$0xff] %v1670_v40  ;;  %2363 = vst [vmem:[%s4823_s18 + $0xf0] sm:$0xff] %v2184_v43  ;;  %v1672_v17 = vpop.f32.mrb[15].mxu0  ;;  %v2186_v19 = vpop.f32.mrb[15].mxu1 }
 0x2ad   : > { %2362 = vst [vmem:[%s4823_s18 + $0xe8] sm:$0xff] %v1672_v17  ;;  %2364 = vst [vmem:[%s4823_s18 + $0xf8] sm:$0xff] %v2186_v19 }
 0x2af   : > { %v1676_v22 = vpop.f32.mrb[16].mxu0  ;;  %v2190_v36 = vpop.f32.mrb[16].mxu1 }
 0x2b0   : > { %2365 = vst [vmem:[%s4823_s18 + $0x100] sm:$0xff] %v1676_v22  ;;  %2367 = vst [vmem:[%s4823_s18 + $0x110] sm:$0xff] %v2190_v36  ;;  %v1678_v59 = vpop.f32.mrb[17].mxu0  ;;  %v2192_v27 = vpop.f32.mrb[17].mxu1 }
 0x2b1   : > { %2366 = vst [vmem:[%s4823_s18 + $0x108] sm:$0xff] %v1678_v59  ;;  %2368 = vst [vmem:[%s4823_s18 + $0x118] sm:$0xff] %v2192_v27 }
 0x2b3   : > { %v1682_v13 = vpop.f32.mrb[18].mxu0  ;;  %v2196_v28 = vpop.f32.mrb[18].mxu1 }
 0x2b4   : > { %2369 = vst [vmem:[%s4823_s18 + $0x120] sm:$0xff] %v1682_v13  ;;  %2371 = vst [vmem:[%s4823_s18 + $0x130] sm:$0xff] %v2196_v28  ;;  %v1684_v25 = vpop.f32.mrb[19].mxu0  ;;  %v2198_v31 = vpop.f32.mrb[19].mxu1 }
 0x2b5   : > { %2370 = vst [vmem:[%s4823_s18 + $0x128] sm:$0xff] %v1684_v25  ;;  %2372 = vst [vmem:[%s4823_s18 + $0x138] sm:$0xff] %v2198_v31 }
 0x2b7   : > { %v1688_v4 = vpop.f32.mrb[20].mxu0  ;;  %v2202_v33 = vpop.f32.mrb[20].mxu1 }
 0x2b8   : > { %2373 = vst [vmem:[%s4823_s18 + $0x140] sm:$0xff] %v1688_v4  ;;  %2375 = vst [vmem:[%s4823_s18 + $0x150] sm:$0xff] %v2202_v33  ;;  %v1690_v62 = vpop.f32.mrb[21].mxu0  ;;  %v2204_v42 = vpop.f32.mrb[21].mxu1 }
 0x2b9   : > { %2374 = vst [vmem:[%s4823_s18 + $0x148] sm:$0xff] %v1690_v62  ;;  %2376 = vst [vmem:[%s4823_s18 + $0x158] sm:$0xff] %v2204_v42 }
 0x2bb   : > { %v1694_v34 = vpop.f32.mrb[22].mxu0  ;;  %v2208_v24 = vpop.f32.mrb[22].mxu1 }
 0x2bc   : > { %2377 = vst [vmem:[%s4823_s18 + $0x160] sm:$0xff] %v1694_v34  ;;  %2379 = vst [vmem:[%s4823_s18 + $0x170] sm:$0xff] %v2208_v24  ;;  %v1696_v29 = vpop.f32.mrb[23].mxu0  ;;  %v2210_v37 = vpop.f32.mrb[23].mxu1 }
 0x2bd   : > { %2378 = vst [vmem:[%s4823_s18 + $0x168] sm:$0xff] %v1696_v29  ;;  %2380 = vst [vmem:[%s4823_s18 + $0x178] sm:$0xff] %v2210_v37 }
 0x2bf   : > { %v1700_v49 = vpop.f32.mrb[24].mxu0  ;;  %v2214_v38 = vpop.f32.mrb[24].mxu1 }
 0x2c0   : > { %2381 = vst [vmem:[%s4823_s18 + $0x180] sm:$0xff] %v1700_v49  ;;  %2383 = vst [vmem:[%s4823_s18 + $0x190] sm:$0xff] %v2214_v38  ;;  %v1702_v6 = vpop.f32.mrb[25].mxu0  ;;  %v2216_v26 = vpop.f32.mrb[25].mxu1 }
 0x2c1   : > { %2382 = vst [vmem:[%s4823_s18 + $0x188] sm:$0xff] %v1702_v6  ;;  %2384 = vst [vmem:[%s4823_s18 + $0x198] sm:$0xff] %v2216_v26 }
 0x2c3   : > { %v1706_v44 = vpop.f32.mrb[26].mxu0  ;;  %v2220_v41 = vpop.f32.mrb[26].mxu1 }
 0x2c4   : > { %2385 = vst [vmem:[%s4823_s18 + $0x1a0] sm:$0xff] %v1706_v44  ;;  %2387 = vst [vmem:[%s4823_s18 + $0x1b0] sm:$0xff] %v2220_v41  ;;  %v1708_v35 = vpop.f32.mrb[27].mxu0  ;;  %v2222_v47 = vpop.f32.mrb[27].mxu1 }
 0x2c5   : > { %2386 = vst [vmem:[%s4823_s18 + $0x1a8] sm:$0xff] %v1708_v35  ;;  %2388 = vst [vmem:[%s4823_s18 + $0x1b8] sm:$0xff] %v2222_v47 }
 0x2c7   : > { %v1712_v48 = vpop.f32.mrb[28].mxu0  ;;  %v2226_v23 = vpop.f32.mrb[28].mxu1 }
 0x2c8   : > { %2389 = vst [vmem:[%s4823_s18 + $0x1c0] sm:$0xff] %v1712_v48  ;;  %2391 = vst [vmem:[%s4823_s18 + $0x1d0] sm:$0xff] %v2226_v23  ;;  %v1714_v50 = vpop.f32.mrb[29].mxu0  ;;  %v2228_v58 = vpop.f32.mrb[29].mxu1 }
 0x2c9   : > { %2390 = vst [vmem:[%s4823_s18 + $0x1c8] sm:$0xff] %v1714_v50  ;;  %2392 = vst [vmem:[%s4823_s18 + $0x1d8] sm:$0xff] %v2228_v58 }
 0x2cb   : > { %v1718_v53 = vpop.f32.mrb[30].mxu0  ;;  %v2232_v51 = vpop.f32.mrb[30].mxu1 }
 0x2cc   : > { %2393 = vst [vmem:[%s4823_s18 + $0x1e0] sm:$0xff] %v1718_v53  ;;  %2395 = vst [vmem:[%s4823_s18 + $0x1f0] sm:$0xff] %v2232_v51  ;;  %v1720_v54 = vpop.f32.mrb[31].mxu0  ;;  %v2234_v32 = vpop.f32.mrb[31].mxu1 }
 0x2cd   : > { %2394 = vst [vmem:[%s4823_s18 + $0x1e8] sm:$0xff] %v1720_v54  ;;  %2396 = vst [vmem:[%s4823_s18 + $0x1f8] sm:$0xff] %v2234_v32 }
 0x2cf   : > { %v1724_v57 = vpop.f32.mrb[32].mxu0  ;;  %v2238_v39 = vpop.f32.mrb[32].mxu1 }
 0x2d0   : > { %2397 = vst [vmem:[%s4823_s18 + $0x200] sm:$0xff] %v1724_v57  ;;  %2399 = vst [vmem:[%s4823_s18 + $0x210] sm:$0xff] %v2238_v39  ;;  %v1726_v60 = vpop.f32.mrb[33].mxu0  ;;  %v2240_v2 = vpop.f32.mrb[33].mxu1 }
 0x2d1   : > { %2398 = vst [vmem:[%s4823_s18 + $0x208] sm:$0xff] %v1726_v60  ;;  %2400 = vst [vmem:[%s4823_s18 + $0x218] sm:$0xff] %v2240_v2 }
 0x2d3   : > { %v1730_v20 = vpop.f32.mrb[34].mxu0  ;;  %v2244_v52 = vpop.f32.mrb[34].mxu1 }
 0x2d4   : > { %2401 = vst [vmem:[%s4823_s18 + $0x220] sm:$0xff] %v1730_v20  ;;  %2403 = vst [vmem:[%s4823_s18 + $0x230] sm:$0xff] %v2244_v52  ;;  %v1732_v61 = vpop.f32.mrb[35].mxu0  ;;  %v2246_v18 = vpop.f32.mrb[35].mxu1 }
 0x2d5   : > { %2402 = vst [vmem:[%s4823_s18 + $0x228] sm:$0xff] %v1732_v61  ;;  %2404 = vst [vmem:[%s4823_s18 + $0x238] sm:$0xff] %v2246_v18 }
 0x2d7   : > { %v1736_v55 = vpop.f32.mrb[36].mxu0  ;;  %v2250_v7 = vpop.f32.mrb[36].mxu1 }
 0x2d8   : > { %2405 = vst [vmem:[%s4823_s18 + $0x240] sm:$0xff] %v1736_v55  ;;  %2407 = vst [vmem:[%s4823_s18 + $0x250] sm:$0xff] %v2250_v7  ;;  %v1738_v56 = vpop.f32.mrb[37].mxu0  ;;  %v2252_v8 = vpop.f32.mrb[37].mxu1 }
 0x2d9   : > { %2406 = vst [vmem:[%s4823_s18 + $0x248] sm:$0xff] %v1738_v56  ;;  %2408 = vst [vmem:[%s4823_s18 + $0x258] sm:$0xff] %v2252_v8 }
 0x2db   : > { %v1742_v63 = vpop.f32.mrb[38].mxu0  ;;  %v2256_v0 = vpop.f32.mrb[38].mxu1 }
 0x2dc   : > { %2409 = vst [vmem:[%s4823_s18 + $0x260] sm:$0xff] %v1742_v63  ;;  %2411 = vst [vmem:[%s4823_s18 + $0x270] sm:$0xff] %v2256_v0  ;;  %v1744_v46 = vpop.f32.mrb[39].mxu0  ;;  %v2258_v3 = vpop.f32.mrb[39].mxu1 }
 0x2dd   : > { %2410 = vst [vmem:[%s4823_s18 + $0x268] sm:$0xff] %v1744_v46  ;;  %2412 = vst [vmem:[%s4823_s18 + $0x278] sm:$0xff] %v2258_v3 }
 0x2df   : > { %v1748_v1 = vpop.f32.mrb[40].mxu0  ;;  %v2262_v45 = vpop.f32.mrb[40].mxu1 }
 0x2e0   : > { %2413 = vst [vmem:[%s4823_s18 + $0x280] sm:$0xff] %v1748_v1  ;;  %2415 = vst [vmem:[%s4823_s18 + $0x290] sm:$0xff] %v2262_v45  ;;  %v1750_v11 = vpop.f32.mrb[41].mxu0  ;;  %v2264_v5 = vpop.f32.mrb[41].mxu1 }
 0x2e1   : > { %2414 = vst [vmem:[%s4823_s18 + $0x288] sm:$0xff] %v1750_v11  ;;  %2416 = vst [vmem:[%s4823_s18 + $0x298] sm:$0xff] %v2264_v5 }
 0x2e3   : > { %v1754_v12 = vpop.f32.mrb[42].mxu0  ;;  %v2268_v9 = vpop.f32.mrb[42].mxu1 }
 0x2e4   : > { %2417 = vst [vmem:[%s4823_s18 + $0x2a0] sm:$0xff] %v1754_v12  ;;  %2419 = vst [vmem:[%s4823_s18 + $0x2b0] sm:$0xff] %v2268_v9  ;;  %v1756_v21 = vpop.f32.mrb[43].mxu0  ;;  %v2270_v14 = vpop.f32.mrb[43].mxu1 }
 0x2e5   : > { %2418 = vst [vmem:[%s4823_s18 + $0x2a8] sm:$0xff] %v1756_v21  ;;  %2420 = vst [vmem:[%s4823_s18 + $0x2b8] sm:$0xff] %v2270_v14 }
 0x2e7   : > { %v1760_v15 = vpop.f32.mrb[44].mxu0  ;;  %v2274_v10 = vpop.f32.mrb[44].mxu1 }
 0x2e8   : > { %2421 = vst [vmem:[%s4823_s18 + $0x2c0] sm:$0xff] %v1760_v15  ;;  %2423 = vst [vmem:[%s4823_s18 + $0x2d0] sm:$0xff] %v2274_v10  ;;  %v1762_v16 = vpop.f32.mrb[45].mxu0  ;;  %v2276_v30 = vpop.f32.mrb[45].mxu1 }
 0x2e9   : > { %2422 = vst [vmem:[%s4823_s18 + $0x2c8] sm:$0xff] %v1762_v16  ;;  %2424 = vst [vmem:[%s4823_s18 + $0x2d8] sm:$0xff] %v2276_v30 }
 0x2eb   : > { %v1766_v40 = vpop.f32.mrb[46].mxu0  ;;  %v2280_v43 = vpop.f32.mrb[46].mxu1 }
 0x2ec   : > { %2425 = vst [vmem:[%s4823_s18 + $0x2e0] sm:$0xff] %v1766_v40  ;;  %2427 = vst [vmem:[%s4823_s18 + $0x2f0] sm:$0xff] %v2280_v43  ;;  %v1768_v17 = vpop.f32.mrb[47].mxu0  ;;  %v2282_v19 = vpop.f32.mrb[47].mxu1 }
 0x2ed   : > { %2426 = vst [vmem:[%s4823_s18 + $0x2e8] sm:$0xff] %v1768_v17  ;;  %2428 = vst [vmem:[%s4823_s18 + $0x2f8] sm:$0xff] %v2282_v19 }
 0x2ef   : > { %v1772_v22 = vpop.f32.mrb[48].mxu0  ;;  %v2286_v36 = vpop.f32.mrb[48].mxu1 }
 0x2f0   : > { %2429 = vst [vmem:[%s4823_s18 + $0x300] sm:$0xff] %v1772_v22  ;;  %2431 = vst [vmem:[%s4823_s18 + $0x310] sm:$0xff] %v2286_v36  ;;  %v1774_v59 = vpop.f32.mrb[49].mxu0  ;;  %v2288_v27 = vpop.f32.mrb[49].mxu1 }
 0x2f1   : > { %2430 = vst [vmem:[%s4823_s18 + $0x308] sm:$0xff] %v1774_v59  ;;  %2432 = vst [vmem:[%s4823_s18 + $0x318] sm:$0xff] %v2288_v27 }
 0x2f3   : > { %v1778_v13 = vpop.f32.mrb[50].mxu0  ;;  %v2292_v28 = vpop.f32.mrb[50].mxu1 }
 0x2f4   : > { %2433 = vst [vmem:[%s4823_s18 + $0x320] sm:$0xff] %v1778_v13  ;;  %2435 = vst [vmem:[%s4823_s18 + $0x330] sm:$0xff] %v2292_v28  ;;  %v1780_v25 = vpop.f32.mrb[51].mxu0  ;;  %v2294_v31 = vpop.f32.mrb[51].mxu1 }
 0x2f5   : > { %2434 = vst [vmem:[%s4823_s18 + $0x328] sm:$0xff] %v1780_v25  ;;  %2436 = vst [vmem:[%s4823_s18 + $0x338] sm:$0xff] %v2294_v31 }
 0x2f7   : > { %v1784_v4 = vpop.f32.mrb[52].mxu0  ;;  %v2298_v33 = vpop.f32.mrb[52].mxu1 }
 0x2f8   : > { %2437 = vst [vmem:[%s4823_s18 + $0x340] sm:$0xff] %v1784_v4  ;;  %2439 = vst [vmem:[%s4823_s18 + $0x350] sm:$0xff] %v2298_v33  ;;  %v1786_v62 = vpop.f32.mrb[53].mxu0  ;;  %v2300_v42 = vpop.f32.mrb[53].mxu1 }
 0x2f9   : > { %2438 = vst [vmem:[%s4823_s18 + $0x348] sm:$0xff] %v1786_v62  ;;  %2440 = vst [vmem:[%s4823_s18 + $0x358] sm:$0xff] %v2300_v42 }
 0x2fb   : > { %v1790_v34 = vpop.f32.mrb[54].mxu0  ;;  %v2304_v24 = vpop.f32.mrb[54].mxu1 }
 0x2fc   : > { %2441 = vst [vmem:[%s4823_s18 + $0x360] sm:$0xff] %v1790_v34  ;;  %2443 = vst [vmem:[%s4823_s18 + $0x370] sm:$0xff] %v2304_v24  ;;  %v1792_v29 = vpop.f32.mrb[55].mxu0  ;;  %v2306_v37 = vpop.f32.mrb[55].mxu1 }
 0x2fd   : > { %2442 = vst [vmem:[%s4823_s18 + $0x368] sm:$0xff] %v1792_v29  ;;  %2444 = vst [vmem:[%s4823_s18 + $0x378] sm:$0xff] %v2306_v37 }
 0x2ff   : > { %v1796_v49 = vpop.f32.mrb[56].mxu0  ;;  %v2310_v38 = vpop.f32.mrb[56].mxu1 }
 0x300   : > { %2445 = vst [vmem:[%s4823_s18 + $0x380] sm:$0xff] %v1796_v49  ;;  %2447 = vst [vmem:[%s4823_s18 + $0x390] sm:$0xff] %v2310_v38  ;;  %v1798_v6 = vpop.f32.mrb[57].mxu0  ;;  %v2312_v26 = vpop.f32.mrb[57].mxu1 }
 0x301   : > { %2446 = vst [vmem:[%s4823_s18 + $0x388] sm:$0xff] %v1798_v6  ;;  %2448 = vst [vmem:[%s4823_s18 + $0x398] sm:$0xff] %v2312_v26 }
 0x303   : > { %v1802_v44 = vpop.f32.mrb[58].mxu0  ;;  %v2316_v41 = vpop.f32.mrb[58].mxu1 }
 0x304   : > { %2449 = vst [vmem:[%s4823_s18 + $0x3a0] sm:$0xff] %v1802_v44  ;;  %2451 = vst [vmem:[%s4823_s18 + $0x3b0] sm:$0xff] %v2316_v41  ;;  %v1804_v35 = vpop.f32.mrb[59].mxu0  ;;  %v2318_v47 = vpop.f32.mrb[59].mxu1 }
 0x305   : > { %2450 = vst [vmem:[%s4823_s18 + $0x3a8] sm:$0xff] %v1804_v35  ;;  %2452 = vst [vmem:[%s4823_s18 + $0x3b8] sm:$0xff] %v2318_v47 }
 0x307   : > { %v1808_v48 = vpop.f32.mrb[60].mxu0  ;;  %v2322_v23 = vpop.f32.mrb[60].mxu1 }
 0x308   : > { %2453 = vst [vmem:[%s4823_s18 + $0x3c0] sm:$0xff] %v1808_v48  ;;  %2455 = vst [vmem:[%s4823_s18 + $0x3d0] sm:$0xff] %v2322_v23  ;;  %v1810_v50 = vpop.f32.mrb[61].mxu0  ;;  %v2324_v58 = vpop.f32.mrb[61].mxu1 }
 0x309   : > { %2454 = vst [vmem:[%s4823_s18 + $0x3c8] sm:$0xff] %v1810_v50  ;;  %2456 = vst [vmem:[%s4823_s18 + $0x3d8] sm:$0xff] %v2324_v58 }
 0x30b   : > { %v1814_v53 = vpop.f32.mrb[62].mxu0  ;;  %v2328_v51 = vpop.f32.mrb[62].mxu1 }
 0x30c   : > { %2457 = vst [vmem:[%s4823_s18 + $0x3e0] sm:$0xff] %v1814_v53  ;;  %2459 = vst [vmem:[%s4823_s18 + $0x3f0] sm:$0xff] %v2328_v51  ;;  %v1816_v54 = vpop.f32.mrb[63].mxu0  ;;  %v2330_v32 = vpop.f32.mrb[63].mxu1 }
 0x30d   : > { %2458 = vst [vmem:[%s4823_s18 + $0x3e8] sm:$0xff] %v1816_v54  ;;  %2460 = vst [vmem:[%s4823_s18 + $0x3f8] sm:$0xff] %v2330_v32 }
 0x30e   : > { %3448 = shalt.err (!%p3445_p13)
}
 0x30f   : > { %s3449_s11 = scalar_lea.hbm %s4957_s23, 16384  ;;  %s3453_s18 = scalar_lea.hbm %s5101_s3, 65536 }
 0x310   : > { %p3450_p10 = scmp.ne.s32.totalorder %s4957_s23, %s3449_s11  ;;  %p3454_p3 = scmp.lt.u32.totalorder %s4957_s23, %s5101_s3 }
 0x311   : > { %p3455_p4 = scmp.lt.u32.totalorder %s3453_s18, %s3449_s11  ;;  %p3457_p2 = scmp.lt.u32.totalorder %s3449_s11, %s4957_s23 }
 0x312   : > { %p3451_p11 = pnand %p3450_p10, %p5102_p6 }
 0x313   : > { %p3456_p7 = por %p3455_p4, %p3454_p3 }
 0x314   : > { %p3452_p1 = pneg %p3451_p11 }
 0x315   : > { %p3458_p9 = por %p3457_p2, %p3456_p7 }
 0x317   : > { %p3459_p8 = pnand %p3458_p9, %p3452_p1 }
 0x319   : > { %3462 = shalt.err (!%p3459_p8)
}
 0x31a   : > { %s3598_s30 = smov 512   ;;  %s3599_s26 = smov 1024  }
 0x31b   : > { %s3600_s4 = smov 32  }
 0x31c   : > { %3015 = dma.vmem_to_hbm [thread:$0]  (%p5102_p6), %s4952_s6, 16384, %s4957_s23, %s4965_s24, %s3598_s30, %s3599_s26, %s3600_s4  }
 0x31d PF: > { %p3035_p0 = scmp.ge.s32.totalorder %s3589_s25, 2  ;;  %s2493_s22 = sand.u32 1, %s3537_s12  }
 0x31e   : > { %p5103_p5 = scmp.ne.s32.totalorder %s5085_s9, 0  ;;  %s2494_s0 = scalar_lea.sflag [#allocation4], %s2493_s22 }
 0x320   : > { %p3029_p12 = pnand %p3035_p0, %p5103_p5 }
 0x322   : > { %3532 = dma.done.wait (!%p3029_p12), %s2494_s0, 16384  }
 0x323   : > { %3534 = vsyncadd (!%p3029_p12), %s2494_s0, 4294950912  ;;  %s20_s25 = sadd.s32 1, %s3589_s25   ;;  %s5105_s15 = sld [smem:[#allocation23_spill]] }
 0x324   : > { %p4994_p13 = scmp.ge.s32.totalorder %s20_s25, 6   ;;  %s5106_s6 = sld [smem:[#allocation13_spill]] }
 0x325   : > { %s5107_s20 = sld [smem:[#allocation22_spill]]  ;;  %s5108_s23 = sld [smem:[#allocation14_spill]] }
 0x326   : > { %s5109_s24 = sld [smem:[#allocation21_spill]]  ;;  %s5110_s21 = sld [smem:[#allocation17_spill]] }
 0x327   : > { %s5111_s22 = sld [smem:[#allocation18_spill]]  ;;  %s5112_s9 = sld [smem:[#allocation19_spill]] }
 0x328   : > { %s5113_s27 = sld [smem:[#allocation20_spill]]  ;;  %s5115_s12 = smov %s3541_s13 }
 0x329   : > { %s5116_s13 = smov %s3545_s14  ;;  %s5117_s14 = smov %s5105_s15 }
 0x32a   : > { %s5118_s15 = smov %s3553_s16  ;;  %s5119_s16 = smov %s5106_s6 }
 0x32b   : > { %s5120_s17 = smov %s5107_s20  ;;  %s5121_s18 = smov %s3565_s19 }
 0x32c   : > { %s5122_s19 = smov %s5108_s23  ;;  %s5123_s20 = smov %s5109_s24 }
 0x32d   : > { %s5124_s23 = smov %s5112_s9  ;;  %19 = sbr.rel (!%p4994_p13) target bundleno = 14 (0xe), region = 92 }
 0x32e   : > { %s5125_s24 = smov %s5113_s27 }
 0x334   :  { %2499 = vsyncpa [#allocation3], 1 }
 0x335   :  { %2501 = vsyncpa [#allocation3 + $0x1], 1 }
 0x336   :  { %2502 = vsyncpa [#allocation6], 1 }
 0x337   :  { %2503 = vsyncpa [#allocation4], 1 }
 0x338   :  { %2505 = vsyncpa [#allocation4 + $0x1], 1 }

</bundles_post_ra>
